<compile_context>
chip_gen: v7x
topology: tpu7x:2x2x1
jax: 0.10.0
libtpu: 0.0.40
codegen_flags: <defaults>
</compile_context>

<pallas_src>
import functools

import jax
import jax.numpy as jnp
from jax.experimental import pallas as pl
from jax.experimental.pallas import tpu as pltpu


def _out_dim(n, stride):
    # 3x3 conv with padding=1
    return (n - 1) // stride + 1


# ------------------------------ fused kernel --------------------------------

def _mbv2_fused_kernel(*refs, N, H0, W0, blocks):
    """Whole-network forward for the full batch in one kernel invocation.

    refs layout (inputs, then output, then scratch):
      [ x_im2col(bf16), stem_w(bf16), stem_b(f32),
        (w1, b1, wd, b2, w2, b3) x nblocks,
        head_w(bf16), head_b(f32), dense_w(bf16), dense_b(f32),
        out(f32),
        pad_scratch x nblocks ]
    blocks: static tuple of (H, W, Ho, Wo, stride) per bottleneck.
    """
    f32, bf16 = jnp.float32, jnp.bfloat16
    nblk = len(blocks)

    x_ref, stem_w, stem_b = refs[0], refs[1], refs[2]
    off = 3
    blk_refs = [refs[off + 6 * i: off + 6 * (i + 1)] for i in range(nblk)]
    off += 6 * nblk
    head_w, head_b, dense_w, dense_b = refs[off:off + 4]
    out_ref = refs[off + 4]
    pad_refs = refs[off + 5: off + 5 + nblk]

    # ---- stem: single im2col matmul (K = 9*Cin) + folded BN + ReLU6 ----------
    c0 = stem_w.shape[1]
    t = jnp.dot(x_ref[...], stem_w[...], preferred_element_type=f32)
    act = jnp.clip(t + stem_b[...], 0.0, 6.0).reshape(N, H0, W0, c0)

    # ---- inverted-residual blocks: activations never leave VMEM --------------
    for bi, (H, W, Ho, Wo, stride) in enumerate(blocks):
        w1, b1, wd, b2, w2, b3 = blk_refs[bi]
        pad_ref = pad_refs[bi]
        cin = act.shape[-1]
        ex = w1.shape[1]
        cout = w2.shape[1]

        # 1x1 expand (scale-folded) + ReLU6; batch folded into M.
        xm = act.reshape(N * H * W, cin).astype(bf16)
        t = jnp.dot(xm, w1[...], preferred_element_type=f32)
        t = jnp.clip(t + b1[...], 0.0, 6.0)

        # Stage into the padded VMEM scratch (halo zeroed once -- single step).
        pad_ref[...] = jnp.zeros_like(pad_ref)
        pad_ref[:, 1:H + 1, 1:W + 1, :] = t.reshape(N, H, W, ex)

        # 3x3 depthwise (scale-folded) + ReLU6; stride applied directly via
        # strided sublane reads -- only the kept output positions are computed.
        acc = jnp.zeros((N, Ho, Wo, ex), f32)
        for kh in range(3):
            for kw in range(3):
                if stride == 1:
                    win = pad_ref[:, kh:kh + Ho, kw:kw + Wo, :]
                else:
                    win = pad_ref[:, pl.ds(kh, Ho, stride),
                                  pl.ds(kw, Wo, stride), :]
                tap = wd[kh * 3 + kw:kh * 3 + kw + 1, :].reshape(1, 1, 1, ex)
                acc = acc + win * tap
        y = jnp.clip(acc.reshape(N * Ho * Wo, ex) + b2[...], 0.0, 6.0)

        # 1x1 linear projection (scale-folded), no activation.
        act = (jnp.dot(y.astype(bf16), w2[...], preferred_element_type=f32)
               + b3[...]).reshape(N, Ho, Wo, cout)

    # ---- head: conv2 1x1 + BN + ReLU6, global avg pool, Linear ---------------
    Hf, Wf, cf = act.shape[1], act.shape[2], act.shape[3]
    y = jnp.dot(act.reshape(N * Hf * Wf, cf).astype(bf16), head_w[...],
                preferred_element_type=f32)
    y = jnp.clip(y + head_b[...], 0.0, 6.0)
    pooled = jnp.mean(y.reshape(N, Hf * Wf, y.shape[-1]), axis=1)   # (N, last)
    # TODO(synk): nn.Dropout is identity in eval/inference mode; training-mode
    # stochastic masking is not implemented.
    out_ref[...] = (jnp.dot(pooled.astype(bf16), dense_w[...],
                            preferred_element_type=f32) + dense_b[...])


# ------------------------------ wrapper --------------------------------------

def _stem_im2col(x_nhwc):
    """3x3 / stride-2 / pad-1 patch extraction -> (N*Ho*Wo, 9*Cin), done once
    in the jitted XLA prologue (output is smaller than the input)."""
    N, H, W, Cin = x_nhwc.shape
    Ho, Wo = _out_dim(H, 2), _out_dim(W, 2)
    xp = jnp.pad(x_nhwc, ((0, 0), (1, 1), (1, 1), (0, 0)))
    cols = [xp[:, kh:kh + 2 * (Ho - 1) + 1:2, kw:kw + 2 * (Wo - 1) + 1:2, :]
            for kh in range(3) for kw in range(3)]
    patches = jnp.concatenate(cols, axis=-1)            # (N, Ho, Wo, 9*Cin)
    return patches.reshape(N * Ho * Wo, 9 * Cin), Ho, Wo


@functools.partial(jax.jit, static_argnames=("strides",))
def mbv2_forward(prep, x_nchw, strides):
    x = jnp.transpose(x_nchw, (0, 2, 3, 1)).astype(jnp.float32)   # NCHW -> NHWC
    N = x.shape[0]
    xi, H0, W0 = _stem_im2col(x)
    xi = xi.astype(jnp.bfloat16)

    inputs = [xi, prep["stem"]["w"], prep["stem"]["b"]]
    blocks = []
    scratch_shapes = []
    H, W = H0, W0
    for i, s in enumerate(strides, start=1):
        bp = prep[f"block{i}"]
        ex = bp["w1"].shape[1]
        Ho, Wo = _out_dim(H, s), _out_dim(W, s)
        blocks.append((H, W, Ho, Wo, s))
        scratch_shapes.append(pltpu.VMEM((N, H + 2, W + 2, ex), jnp.float32))
        inputs += [bp["w1"], bp["b1"], bp["wd"], bp["b2"], bp["w2"], bp["b3"]]
        H, W = Ho, Wo
    hp = prep["head"]
    inputs += [hp["w"], hp["b"], hp["dw"], hp["db"]]
    num_classes = hp["dw"].shape[1]

    kernel = functools.partial(_mbv2_fused_kernel, N=N, H0=H0, W0=W0,
                               blocks=tuple(blocks))
    # Single invocation (no grid): every operand/scratch fits comfortably in
    # VMEM (total well under 1 MiB), weights are loaded exactly once.
    return pl.pallas_call(
        kernel,
        out_shape=jax.ShapeDtypeStruct((N, num_classes), jnp.float32),
        scratch_shapes=scratch_shapes,
    )(*inputs)


# ------------------------------- parameters ----------------------------------

def bn_fold(p, eps=1e-5):
    scale = p["gamma"] / jnp.sqrt(p["var"] + eps)
    return scale, p["beta"] - p["mean"] * scale


def init_params(key, input_ch, num_classes, channels, last_ch):
    ks = iter(jax.random.split(key, 64))

    def nrm(shape, s=0.1):
        return s * jax.random.normal(next(ks), shape, jnp.float32)

    def bn(c):
        return dict(gamma=jax.random.uniform(next(ks), (c,), jnp.float32, 0.5, 1.5),
                    beta=nrm((c,)),
                    mean=nrm((c,)),
                    var=jax.random.uniform(next(ks), (c,), jnp.float32, 0.5, 1.5))

    p = {}
    p["conv1_w"] = nrm((channels[0], input_ch, 3, 3))        # torch (Cout,Cin,3,3)
    p["conv1_bn"] = bn(channels[0])
    cin = channels[0]
    for i, cout in enumerate(channels[1:], start=1):
        ex = round(cin * 3)                                  # k=3 expansion
        p[f"bottleneck{i}"] = {
            "pw1_w": nrm((ex, cin, 1, 1)), "pw1_bn": bn(ex),
            "dw_w": nrm((ex, 1, 3, 3)),    "dw_bn": bn(ex),
            "pw2_w": nrm((cout, ex, 1, 1)), "pw2_bn": bn(cout),
        }
        cin = cout
    p["conv2_w"] = nrm((last_ch, channels[-1], 1, 1))
    p["conv2_bn"] = bn(last_ch)
    p["dense_w"] = nrm((num_classes, last_ch))               # torch Linear weight
    p["dense_b"] = nrm((num_classes,))
    return p


def prepare_params(params, strides):
    """One-time layout prep: BN scales folded into conv weights (bias-only
    epilogues), pointwise/dense weights pre-cast to bf16 for the MXU."""
    bf16, f32 = jnp.bfloat16, jnp.float32
    prep = {}

    w = params["conv1_w"]                                   # (C0, Cin, 3, 3)
    c0, cin = w.shape[0], w.shape[1]
    s, b = bn_fold(params["conv1_bn"])
    w9 = jnp.transpose(w, (2, 3, 1, 0)).reshape(9 * cin, c0)  # (kh,kw,Cin) x C0
    prep["stem"] = dict(w=(w9 * s[None, :]).astype(bf16),
                        b=b.reshape(1, c0).astype(f32))

    for i, _ in enumerate(strides, start=1):
        blk = params[f"bottleneck{i}"]
        ex, ci = blk["pw1_w"].shape[0], blk["pw1_w"].shape[1]
        co = blk["pw2_w"].shape[0]
        s1, b1 = bn_fold(blk["pw1_bn"])
        s2, b2 = bn_fold(blk["dw_bn"])
        s3, b3 = bn_fold(blk["pw2_bn"])
        prep[f"block{i}"] = dict(
            w1=(blk["pw1_w"].reshape(ex, ci).T * s1[None, :]).astype(bf16),
            b1=b1.reshape(1, ex).astype(f32),
            wd=(jnp.transpose(blk["dw_w"].reshape(ex, 3, 3), (1, 2, 0))
                .reshape(9, ex) * s2[None, :]).astype(f32),
            b2=b2.reshape(1, ex).astype(f32),
            w2=(blk["pw2_w"].reshape(co, ex).T * s3[None, :]).astype(bf16),
            b3=b3.reshape(1, co).astype(f32))

    w2c = params["conv2_w"]
    last, c2in = w2c.shape[0], w2c.shape[1]
    s, b = bn_fold(params["conv2_bn"])
    ncls = params["dense_w"].shape[0]
    prep["head"] = dict(
        w=(w2c.reshape(last, c2in).T * s[None, :]).astype(bf16),
        b=b.reshape(1, last).astype(f32),
        dw=params["dense_w"].T.astype(bf16),
        db=params["dense_b"].reshape(1, ncls).astype(f32))
    return prep


# -------------------------- pure-JAX reference --------------------------------

def mbv2_forward_ref(prep, x_nchw, strides):
    """Same math (folded BN, bf16 matmul operands, f32 accumulation), XLA only."""
    f32, bf16 = jnp.float32, jnp.bfloat16
    x = jnp.transpose(x_nchw, (0, 2, 3, 1)).astype(f32)
    N = x.shape[0]
    xi, Ho, Wo = _stem_im2col(x)
    c0 = prep["stem"]["w"].shape[1]
    t = jnp.dot(xi.astype(bf16), prep["stem"]["w"], preferred_element_type=f32)
    act = jnp.clip(t + prep["stem"]["b"], 0.0, 6.0).reshape(N, Ho, Wo, c0)

    for i, stride in enumerate(strides, start=1):
        bp = prep[f"block{i}"]
        ex = bp["w1"].shape[1]
        _, H, W, _ = act.shape
        Ho, Wo = _out_dim(H, stride), _out_dim(W, stride)
        t = jnp.einsum("nhwc,ce->nhwe", act.astype(bf16), bp["w1"],
                       preferred_element_type=f32)
        t = jnp.clip(t + bp["b1"], 0.0, 6.0)
        tp = jnp.pad(t, ((0, 0), (1, 1), (1, 1), (0, 0)))
        acc = jnp.zeros((N, Ho, Wo, ex), f32)
        for kh in range(3):
            for kw in range(3):
                win = tp[:, kh:kh + stride * (Ho - 1) + 1:stride,
                         kw:kw + stride * (Wo - 1) + 1:stride, :]
                acc = acc + win * bp["wd"][kh * 3 + kw][None, None, None, :]
        y = jnp.clip(acc + bp["b2"], 0.0, 6.0)
        act = (jnp.einsum("nhwe,ec->nhwc", y.astype(bf16), bp["w2"],
                          preferred_element_type=f32) + bp["b3"])

    hp = prep["head"]
    y = jnp.clip(jnp.einsum("nhwc,cd->nhwd", act.astype(bf16), hp["w"],
                            preferred_element_type=f32) + hp["b"], 0.0, 6.0)
    pooled = jnp.mean(y, axis=(1, 2))
    return (jnp.dot(pooled.astype(bf16), hp["dw"], preferred_element_type=f32)
            + hp["db"])


# --------------------------------- main ---------------------------------------

if __name__ == "__main__":
    input_ch, num_classes = 4, 10
    channels = [8, 16, 16, 32]
    last_ch = 64
    strides = (1, 2, 2)
    dropout_p = 0.5          # eval-mode dropout -> identity
    N, H, W = 2, 16, 16

    root = jax.random.PRNGKey(0)
    k_in, k_par = jax.random.split(root)
    x = jax.random.normal(k_in, (N, input_ch, H, W), jnp.float32)   # NCHW input
    params = init_params(k_par, input_ch, num_classes, channels, last_ch)
    prep = prepare_params(params, strides)                          # one-time prep

    ref = jax.block_until_ready(mbv2_forward_ref(prep, x, strides))
    logits = jax.block_until_ready(mbv2_forward(prep, x, strides=strides))

    assert logits.shape == (N, num_classes)
    assert bool(jnp.all(jnp.isfinite(logits)))
    assert bool(jnp.allclose(logits, ref, rtol=2e-2, atol=2e-2))
    print("KERNEL_OK")
</pallas_src>

<mosaic_0001>
module attributes {stable_mosaic.version = 11 : i64} {
  func.func @_mbv2_fused_kernel(%arg0: memref<128x36xbf16, #tpu.memory_space<vmem>>, %arg1: memref<36x8xbf16, #tpu.memory_space<vmem>>, %arg2: memref<1x8xf32, #tpu.memory_space<vmem>>, %arg3: memref<8x24xbf16, #tpu.memory_space<vmem>>, %arg4: memref<1x24xf32, #tpu.memory_space<vmem>>, %arg5: memref<9x24xf32, #tpu.memory_space<vmem>>, %arg6: memref<1x24xf32, #tpu.memory_space<vmem>>, %arg7: memref<24x16xbf16, #tpu.memory_space<vmem>>, %arg8: memref<1x16xf32, #tpu.memory_space<vmem>>, %arg9: memref<16x48xbf16, #tpu.memory_space<vmem>>, %arg10: memref<1x48xf32, #tpu.memory_space<vmem>>, %arg11: memref<9x48xf32, #tpu.memory_space<vmem>>, %arg12: memref<1x48xf32, #tpu.memory_space<vmem>>, %arg13: memref<48x16xbf16, #tpu.memory_space<vmem>>, %arg14: memref<1x16xf32, #tpu.memory_space<vmem>>, %arg15: memref<16x48xbf16, #tpu.memory_space<vmem>>, %arg16: memref<1x48xf32, #tpu.memory_space<vmem>>, %arg17: memref<9x48xf32, #tpu.memory_space<vmem>>, %arg18: memref<1x48xf32, #tpu.memory_space<vmem>>, %arg19: memref<48x32xbf16, #tpu.memory_space<vmem>>, %arg20: memref<1x32xf32, #tpu.memory_space<vmem>>, %arg21: memref<32x64xbf16, #tpu.memory_space<vmem>>, %arg22: memref<1x64xf32, #tpu.memory_space<vmem>>, %arg23: memref<64x10xbf16, #tpu.memory_space<vmem>>, %arg24: memref<1x10xf32, #tpu.memory_space<vmem>>, %arg25: memref<2x10xf32, #tpu.memory_space<vmem>>, %arg26: memref<2x10x10x24xf32, #tpu.memory_space<vmem>>, %arg27: memref<2x10x10x48xf32, #tpu.memory_space<vmem>>, %arg28: memref<2x6x6x48xf32, #tpu.memory_space<vmem>>) attributes {dimension_semantics = [], scalar_prefetch = 0 : i64, scratch_operands = 3 : i64, tpu.core_type = #tpu.core_type<tc>} {
    %c0 = arith.constant 0 : index
    %c0_0 = arith.constant 0 : index
    %0 = vector.load %arg0[%c0, %c0_0] : memref<128x36xbf16, #tpu.memory_space<vmem>>, vector<128x36xbf16>
    %c0_1 = arith.constant 0 : index
    %c0_2 = arith.constant 0 : index
    %1 = vector.load %arg1[%c0_1, %c0_2] : memref<36x8xbf16, #tpu.memory_space<vmem>>, vector<36x8xbf16>
    %cst = arith.constant dense<0.000000e+00> : vector<128x8xf32>
    %2 = tpu.matmul %0, %1, %cst {dimension_numbers = #tpu.dot_dimension_numbers<[1], [0], [0], [1], [0, 0, 1, 1], [], []>} : vector<128x36xbf16>, vector<36x8xbf16>, vector<128x8xf32> -> vector<128x8xf32>
    %c0_3 = arith.constant 0 : index
    %c0_4 = arith.constant 0 : index
    %3 = vector.load %arg2[%c0_3, %c0_4] : memref<1x8xf32, #tpu.memory_space<vmem>>, vector<1x8xf32>
    %4 = vector.broadcast %3 : vector<1x8xf32> to vector<128x8xf32>
    %5 = arith.addf %2, %4 : vector<128x8xf32>
    %cst_5 = arith.constant 0.000000e+00 : f32
    %cst_6 = arith.constant 6.000000e+00 : f32
    %6 = vector.broadcast %cst_5 : f32 to vector<128x8xf32>
    %7 = arith.maximumf %6, %5 : vector<128x8xf32>
    %8 = vector.broadcast %cst_6 : f32 to vector<128x8xf32>
    %9 = arith.minimumf %8, %7 : vector<128x8xf32>
    %10 = vector.shape_cast %9 : vector<128x8xf32> to vector<2x8x8x8xf32>
    %11 = vector.shape_cast %10 : vector<2x8x8x8xf32> to vector<128x8xf32>
    %12 = arith.truncf %11 : vector<128x8xf32> to vector<128x8xbf16>
    %c0_7 = arith.constant 0 : index
    %c0_8 = arith.constant 0 : index
    %13 = vector.load %arg3[%c0_7, %c0_8] : memref<8x24xbf16, #tpu.memory_space<vmem>>, vector<8x24xbf16>
    %cst_9 = arith.constant dense<0.000000e+00> : vector<128x24xf32>
    %14 = tpu.matmul %12, %13, %cst_9 {dimension_numbers = #tpu.dot_dimension_numbers<[1], [0], [0], [1], [0, 0, 1, 1], [], []>} : vector<128x8xbf16>, vector<8x24xbf16>, vector<128x24xf32> -> vector<128x24xf32>
    %c0_10 = arith.constant 0 : index
    %c0_11 = arith.constant 0 : index
    %15 = vector.load %arg4[%c0_10, %c0_11] : memref<1x24xf32, #tpu.memory_space<vmem>>, vector<1x24xf32>
    %16 = vector.broadcast %15 : vector<1x24xf32> to vector<128x24xf32>
    %17 = arith.addf %14, %16 : vector<128x24xf32>
    %cst_12 = arith.constant 0.000000e+00 : f32
    %cst_13 = arith.constant 6.000000e+00 : f32
    %18 = vector.broadcast %cst_12 : f32 to vector<128x24xf32>
    %19 = arith.maximumf %18, %17 : vector<128x24xf32>
    %20 = vector.broadcast %cst_13 : f32 to vector<128x24xf32>
    %21 = arith.minimumf %20, %19 : vector<128x24xf32>
    %cst_14 = arith.constant 0.000000e+00 : f32
    %22 = vector.broadcast %cst_14 : f32 to vector<2x10x10x24xf32>
    %c0_15 = arith.constant 0 : index
    %c0_16 = arith.constant 0 : index
    %c0_17 = arith.constant 0 : index
    %c0_18 = arith.constant 0 : index
    %23 = vector.load %arg26[%c0_15, %c0_16, %c0_17, %c0_18] : memref<2x10x10x24xf32, #tpu.memory_space<vmem>>, vector<2x10x10x24xf32>
    tpu.vector_store %arg26[%c0_15, %c0_16, %c0_17, %c0_18], %22 {strides = array<i32>} : memref<2x10x10x24xf32, #tpu.memory_space<vmem>>, vector<2x10x10x24xf32>,
    %24 = vector.shape_cast %21 : vector<128x24xf32> to vector<2x8x8x24xf32>
    %c0_19 = arith.constant 0 : index
    %c1 = arith.constant 1 : index
    %c1_20 = arith.constant 1 : index
    %c0_21 = arith.constant 0 : index
    %25 = vector.load %arg26[%c0_19, %c1, %c1_20, %c0_21] : memref<2x10x10x24xf32, #tpu.memory_space<vmem>>, vector<2x8x8x24xf32>
    tpu.vector_store %arg26[%c0_19, %c1, %c1_20, %c0_21], %24 {strides = array<i32>} : memref<2x10x10x24xf32, #tpu.memory_space<vmem>>, vector<2x8x8x24xf32>,
    %cst_22 = arith.constant 0.000000e+00 : f32
    %26 = vector.broadcast %cst_22 : f32 to vector<2x8x8x24xf32>
    %c0_23 = arith.constant 0 : index
    %c0_24 = arith.constant 0 : index
    %c0_25 = arith.constant 0 : index
    %c0_26 = arith.constant 0 : index
    %27 = vector.load %arg26[%c0_23, %c0_24, %c0_25, %c0_26] : memref<2x10x10x24xf32, #tpu.memory_space<vmem>>, vector<2x8x8x24xf32>
    %c0_27 = arith.constant 0 : index
    %c0_28 = arith.constant 0 : index
    %28 = vector.load %arg5[%c0_27, %c0_28] : memref<9x24xf32, #tpu.memory_space<vmem>>, vector<1x24xf32>
    %29 = vector.shape_cast %28 : vector<1x24xf32> to vector<1x1x1x24xf32>
    %30 = vector.broadcast %29 : vector<1x1x1x24xf32> to vector<2x8x8x24xf32>
    %31 = arith.mulf %27, %30 : vector<2x8x8x24xf32>
    %32 = arith.addf %26, %31 : vector<2x8x8x24xf32>
    %c0_29 = arith.constant 0 : index
    %c0_30 = arith.constant 0 : index
    %c1_31 = arith.constant 1 : index
    %c0_32 = arith.constant 0 : index
    %33 = vector.load %arg26[%c0_29, %c0_30, %c1_31, %c0_32] : memref<2x10x10x24xf32, #tpu.memory_space<vmem>>, vector<2x8x8x24xf32>
    %c1_33 = arith.constant 1 : index
    %c0_34 = arith.constant 0 : index
    %34 = vector.load %arg5[%c1_33, %c0_34] : memref<9x24xf32, #tpu.memory_space<vmem>>, vector<1x24xf32>
    %35 = vector.shape_cast %34 : vector<1x24xf32> to vector<1x1x1x24xf32>
    %36 = vector.broadcast %35 : vector<1x1x1x24xf32> to vector<2x8x8x24xf32>
    %37 = arith.mulf %33, %36 : vector<2x8x8x24xf32>
    %38 = arith.addf %32, %37 : vector<2x8x8x24xf32>
    %c0_35 = arith.constant 0 : index
    %c0_36 = arith.constant 0 : index
    %c2 = arith.constant 2 : index
    %c0_37 = arith.constant 0 : index
    %39 = vector.load %arg26[%c0_35, %c0_36, %c2, %c0_37] : memref<2x10x10x24xf32, #tpu.memory_space<vmem>>, vector<2x8x8x24xf32>
    %c2_38 = arith.constant 2 : index
    %c0_39 = arith.constant 0 : index
    %40 = vector.load %arg5[%c2_38, %c0_39] : memref<9x24xf32, #tpu.memory_space<vmem>>, vector<1x24xf32>
    %41 = vector.shape_cast %40 : vector<1x24xf32> to vector<1x1x1x24xf32>
    %42 = vector.broadcast %41 : vector<1x1x1x24xf32> to vector<2x8x8x24xf32>
    %43 = arith.mulf %39, %42 : vector<2x8x8x24xf32>
    %44 = arith.addf %38, %43 : vector<2x8x8x24xf32>
    %c0_40 = arith.constant 0 : index
    %c1_41 = arith.constant 1 : index
    %c0_42 = arith.constant 0 : index
    %c0_43 = arith.constant 0 : index
    %45 = vector.load %arg26[%c0_40, %c1_41, %c0_42, %c0_43] : memref<2x10x10x24xf32, #tpu.memory_space<vmem>>, vector<2x8x8x24xf32>
    %c3 = arith.constant 3 : index
    %c0_44 = arith.constant 0 : index
    %46 = vector.load %arg5[%c3, %c0_44] : memref<9x24xf32, #tpu.memory_space<vmem>>, vector<1x24xf32>
    %47 = vector.shape_cast %46 : vector<1x24xf32> to vector<1x1x1x24xf32>
    %48 = vector.broadcast %47 : vector<1x1x1x24xf32> to vector<2x8x8x24xf32>
    %49 = arith.mulf %45, %48 : vector<2x8x8x24xf32>
    %50 = arith.addf %44, %49 : vector<2x8x8x24xf32>
    %c0_45 = arith.constant 0 : index
    %c1_46 = arith.constant 1 : index
    %c1_47 = arith.constant 1 : index
    %c0_48 = arith.constant 0 : index
    %51 = vector.load %arg26[%c0_45, %c1_46, %c1_47, %c0_48] : memref<2x10x10x24xf32, #tpu.memory_space<vmem>>, vector<2x8x8x24xf32>
    %c4 = arith.constant 4 : index
    %c0_49 = arith.constant 0 : index
    %52 = vector.load %arg5[%c4, %c0_49] : memref<9x24xf32, #tpu.memory_space<vmem>>, vector<1x24xf32>
    %53 = vector.shape_cast %52 : vector<1x24xf32> to vector<1x1x1x24xf32>
    %54 = vector.broadcast %53 : vector<1x1x1x24xf32> to vector<2x8x8x24xf32>
    %55 = arith.mulf %51, %54 : vector<2x8x8x24xf32>
    %56 = arith.addf %50, %55 : vector<2x8x8x24xf32>
    %c0_50 = arith.constant 0 : index
    %c1_51 = arith.constant 1 : index
    %c2_52 = arith.constant 2 : index
    %c0_53 = arith.constant 0 : index
    %57 = vector.load %arg26[%c0_50, %c1_51, %c2_52, %c0_53] : memref<2x10x10x24xf32, #tpu.memory_space<vmem>>, vector<2x8x8x24xf32>
    %c5 = arith.constant 5 : index
    %c0_54 = arith.constant 0 : index
    %58 = vector.load %arg5[%c5, %c0_54] : memref<9x24xf32, #tpu.memory_space<vmem>>, vector<1x24xf32>
    %59 = vector.shape_cast %58 : vector<1x24xf32> to vector<1x1x1x24xf32>
    %60 = vector.broadcast %59 : vector<1x1x1x24xf32> to vector<2x8x8x24xf32>
    %61 = arith.mulf %57, %60 : vector<2x8x8x24xf32>
    %62 = arith.addf %56, %61 : vector<2x8x8x24xf32>
    %c0_55 = arith.constant 0 : index
    %c2_56 = arith.constant 2 : index
    %c0_57 = arith.constant 0 : index
    %c0_58 = arith.constant 0 : index
    %63 = vector.load %arg26[%c0_55, %c2_56, %c0_57, %c0_58] : memref<2x10x10x24xf32, #tpu.memory_space<vmem>>, vector<2x8x8x24xf32>
    %c6 = arith.constant 6 : index
    %c0_59 = arith.constant 0 : index
    %64 = vector.load %arg5[%c6, %c0_59] : memref<9x24xf32, #tpu.memory_space<vmem>>, vector<1x24xf32>
    %65 = vector.shape_cast %64 : vector<1x24xf32> to vector<1x1x1x24xf32>
    %66 = vector.broadcast %65 : vector<1x1x1x24xf32> to vector<2x8x8x24xf32>
    %67 = arith.mulf %63, %66 : vector<2x8x8x24xf32>
    %68 = arith.addf %62, %67 : vector<2x8x8x24xf32>
    %c0_60 = arith.constant 0 : index
    %c2_61 = arith.constant 2 : index
    %c1_62 = arith.constant 1 : index
    %c0_63 = arith.constant 0 : index
    %69 = vector.load %arg26[%c0_60, %c2_61, %c1_62, %c0_63] : memref<2x10x10x24xf32, #tpu.memory_space<vmem>>, vector<2x8x8x24xf32>
    %c7 = arith.constant 7 : index
    %c0_64 = arith.constant 0 : index
    %70 = vector.load %arg5[%c7, %c0_64] : memref<9x24xf32, #tpu.memory_space<vmem>>, vector<1x24xf32>
    %71 = vector.shape_cast %70 : vector<1x24xf32> to vector<1x1x1x24xf32>
    %72 = vector.broadcast %71 : vector<1x1x1x24xf32> to vector<2x8x8x24xf32>
    %73 = arith.mulf %69, %72 : vector<2x8x8x24xf32>
    %74 = arith.addf %68, %73 : vector<2x8x8x24xf32>
    %c0_65 = arith.constant 0 : index
    %c2_66 = arith.constant 2 : index
    %c2_67 = arith.constant 2 : index
    %c0_68 = arith.constant 0 : index
    %75 = vector.load %arg26[%c0_65, %c2_66, %c2_67, %c0_68] : memref<2x10x10x24xf32, #tpu.memory_space<vmem>>, vector<2x8x8x24xf32>
    %c8 = arith.constant 8 : index
    %c0_69 = arith.constant 0 : index
    %76 = vector.load %arg5[%c8, %c0_69] : memref<9x24xf32, #tpu.memory_space<vmem>>, vector<1x24xf32>
    %77 = vector.shape_cast %76 : vector<1x24xf32> to vector<1x1x1x24xf32>
    %78 = vector.broadcast %77 : vector<1x1x1x24xf32> to vector<2x8x8x24xf32>
    %79 = arith.mulf %75, %78 : vector<2x8x8x24xf32>
    %80 = arith.addf %74, %79 : vector<2x8x8x24xf32>
    %81 = vector.shape_cast %80 : vector<2x8x8x24xf32> to vector<128x24xf32>
    %c0_70 = arith.constant 0 : index
    %c0_71 = arith.constant 0 : index
    %82 = vector.load %arg6[%c0_70, %c0_71] : memref<1x24xf32, #tpu.memory_space<vmem>>, vector<1x24xf32>
    %83 = vector.broadcast %82 : vector<1x24xf32> to vector<128x24xf32>
    %84 = arith.addf %81, %83 : vector<128x24xf32>
    %cst_72 = arith.constant 0.000000e+00 : f32
    %cst_73 = arith.constant 6.000000e+00 : f32
    %85 = vector.broadcast %cst_72 : f32 to vector<128x24xf32>
    %86 = arith.maximumf %85, %84 : vector<128x24xf32>
    %87 = vector.broadcast %cst_73 : f32 to vector<128x24xf32>
    %88 = arith.minimumf %87, %86 : vector<128x24xf32>
    %89 = arith.truncf %88 : vector<128x24xf32> to vector<128x24xbf16>
    %c0_74 = arith.constant 0 : index
    %c0_75 = arith.constant 0 : index
    %90 = vector.load %arg7[%c0_74, %c0_75] : memref<24x16xbf16, #tpu.memory_space<vmem>>, vector<24x16xbf16>
    %cst_76 = arith.constant dense<0.000000e+00> : vector<128x16xf32>
    %91 = tpu.matmul %89, %90, %cst_76 {dimension_numbers = #tpu.dot_dimension_numbers<[1], [0], [0], [1], [0, 0, 1, 1], [], []>} : vector<128x24xbf16>, vector<24x16xbf16>, vector<128x16xf32> -> vector<128x16xf32>
    %c0_77 = arith.constant 0 : index
    %c0_78 = arith.constant 0 : index
    %92 = vector.load %arg8[%c0_77, %c0_78] : memref<1x16xf32, #tpu.memory_space<vmem>>, vector<1x16xf32>
    %93 = vector.broadcast %92 : vector<1x16xf32> to vector<128x16xf32>
    %94 = arith.addf %91, %93 : vector<128x16xf32>
    %95 = vector.shape_cast %94 : vector<128x16xf32> to vector<2x8x8x16xf32>
    %96 = vector.shape_cast %95 : vector<2x8x8x16xf32> to vector<128x16xf32>
    %97 = arith.truncf %96 : vector<128x16xf32> to vector<128x16xbf16>
    %c0_79 = arith.constant 0 : index
    %c0_80 = arith.constant 0 : index
    %98 = vector.load %arg9[%c0_79, %c0_80] : memref<16x48xbf16, #tpu.memory_space<vmem>>, vector<16x48xbf16>
    %cst_81 = arith.constant dense<0.000000e+00> : vector<128x48xf32>
    %99 = tpu.matmul %97, %98, %cst_81 {dimension_numbers = #tpu.dot_dimension_numbers<[1], [0], [0], [1], [0, 0, 1, 1], [], []>} : vector<128x16xbf16>, vector<16x48xbf16>, vector<128x48xf32> -> vector<128x48xf32>
    %c0_82 = arith.constant 0 : index
    %c0_83 = arith.constant 0 : index
    %100 = vector.load %arg10[%c0_82, %c0_83] : memref<1x48xf32, #tpu.memory_space<vmem>>, vector<1x48xf32>
    %101 = vector.broadcast %100 : vector<1x48xf32> to vector<128x48xf32>
    %102 = arith.addf %99, %101 : vector<128x48xf32>
    %cst_84 = arith.constant 0.000000e+00 : f32
    %cst_85 = arith.constant 6.000000e+00 : f32
    %103 = vector.broadcast %cst_84 : f32 to vector<128x48xf32>
    %104 = arith.maximumf %103, %102 : vector<128x48xf32>
    %105 = vector.broadcast %cst_85 : f32 to vector<128x48xf32>
    %106 = arith.minimumf %105, %104 : vector<128x48xf32>
    %cst_86 = arith.constant 0.000000e+00 : f32
    %107 = vector.broadcast %cst_86 : f32 to vector<2x10x10x48xf32>
    %c0_87 = arith.constant 0 : index
    %c0_88 = arith.constant 0 : index
    %c0_89 = arith.constant 0 : index
    %c0_90 = arith.constant 0 : index
    %108 = vector.load %arg27[%c0_87, %c0_88, %c0_89, %c0_90] : memref<2x10x10x48xf32, #tpu.memory_space<vmem>>, vector<2x10x10x48xf32>
    tpu.vector_store %arg27[%c0_87, %c0_88, %c0_89, %c0_90], %107 {strides = array<i32>} : memref<2x10x10x48xf32, #tpu.memory_space<vmem>>, vector<2x10x10x48xf32>,
    %109 = vector.shape_cast %106 : vector<128x48xf32> to vector<2x8x8x48xf32>
    %c0_91 = arith.constant 0 : index
    %c1_92 = arith.constant 1 : index
    %c1_93 = arith.constant 1 : index
    %c0_94 = arith.constant 0 : index
    %110 = vector.load %arg27[%c0_91, %c1_92, %c1_93, %c0_94] : memref<2x10x10x48xf32, #tpu.memory_space<vmem>>, vector<2x8x8x48xf32>
    tpu.vector_store %arg27[%c0_91, %c1_92, %c1_93, %c0_94], %109 {strides = array<i32>} : memref<2x10x10x48xf32, #tpu.memory_space<vmem>>, vector<2x8x8x48xf32>,
    %cst_95 = arith.constant 0.000000e+00 : f32
    %111 = vector.broadcast %cst_95 : f32 to vector<2x4x4x48xf32>
    %c0_96 = arith.constant 0 : index
    %c0_97 = arith.constant 0 : index
    %c0_98 = arith.constant 0 : index
    %c0_99 = arith.constant 0 : index
    %112 = tpu.strided_load %arg27[%c0_96, %c0_97, %c0_98, %c0_99] {strides = array<i32: 1, 2, 2, 1>} : memref<2x10x10x48xf32, #tpu.memory_space<vmem>>, vector<2x4x4x48xf32>
    %c0_100 = arith.constant 0 : index
    %c0_101 = arith.constant 0 : index
    %113 = vector.load %arg11[%c0_100, %c0_101] : memref<9x48xf32, #tpu.memory_space<vmem>>, vector<1x48xf32>
    %114 = vector.shape_cast %113 : vector<1x48xf32> to vector<1x1x1x48xf32>
    %115 = vector.broadcast %114 : vector<1x1x1x48xf32> to vector<2x4x4x48xf32>
    %116 = arith.mulf %112, %115 : vector<2x4x4x48xf32>
    %117 = arith.addf %111, %116 : vector<2x4x4x48xf32>
    %c0_102 = arith.constant 0 : index
    %c0_103 = arith.constant 0 : index
    %c1_104 = arith.constant 1 : index
    %c0_105 = arith.constant 0 : index
    %118 = tpu.strided_load %arg27[%c0_102, %c0_103, %c1_104, %c0_105] {strides = array<i32: 1, 2, 2, 1>} : memref<2x10x10x48xf32, #tpu.memory_space<vmem>>, vector<2x4x4x48xf32>
    %c1_106 = arith.constant 1 : index
    %c0_107 = arith.constant 0 : index
    %119 = vector.load %arg11[%c1_106, %c0_107] : memref<9x48xf32, #tpu.memory_space<vmem>>, vector<1x48xf32>
    %120 = vector.shape_cast %119 : vector<1x48xf32> to vector<1x1x1x48xf32>
    %121 = vector.broadcast %120 : vector<1x1x1x48xf32> to vector<2x4x4x48xf32>
    %122 = arith.mulf %118, %121 : vector<2x4x4x48xf32>
    %123 = arith.addf %117, %122 : vector<2x4x4x48xf32>
    %c0_108 = arith.constant 0 : index
    %c0_109 = arith.constant 0 : index
    %c2_110 = arith.constant 2 : index
    %c0_111 = arith.constant 0 : index
    %124 = tpu.strided_load %arg27[%c0_108, %c0_109, %c2_110, %c0_111] {strides = array<i32: 1, 2, 2, 1>} : memref<2x10x10x48xf32, #tpu.memory_space<vmem>>, vector<2x4x4x48xf32>
    %c2_112 = arith.constant 2 : index
    %c0_113 = arith.constant 0 : index
    %125 = vector.load %arg11[%c2_112, %c0_113] : memref<9x48xf32, #tpu.memory_space<vmem>>, vector<1x48xf32>
    %126 = vector.shape_cast %125 : vector<1x48xf32> to vector<1x1x1x48xf32>
    %127 = vector.broadcast %126 : vector<1x1x1x48xf32> to vector<2x4x4x48xf32>
    %128 = arith.mulf %124, %127 : vector<2x4x4x48xf32>
    %129 = arith.addf %123, %128 : vector<2x4x4x48xf32>
    %c0_114 = arith.constant 0 : index
    %c1_115 = arith.constant 1 : index
    %c0_116 = arith.constant 0 : index
    %c0_117 = arith.constant 0 : index
    %130 = tpu.strided_load %arg27[%c0_114, %c1_115, %c0_116, %c0_117] {strides = array<i32: 1, 2, 2, 1>} : memref<2x10x10x48xf32, #tpu.memory_space<vmem>>, vector<2x4x4x48xf32>
    %c3_118 = arith.constant 3 : index
    %c0_119 = arith.constant 0 : index
    %131 = vector.load %arg11[%c3_118, %c0_119] : memref<9x48xf32, #tpu.memory_space<vmem>>, vector<1x48xf32>
    %132 = vector.shape_cast %131 : vector<1x48xf32> to vector<1x1x1x48xf32>
    %133 = vector.broadcast %132 : vector<1x1x1x48xf32> to vector<2x4x4x48xf32>
    %134 = arith.mulf %130, %133 : vector<2x4x4x48xf32>
    %135 = arith.addf %129, %134 : vector<2x4x4x48xf32>
    %c0_120 = arith.constant 0 : index
    %c1_121 = arith.constant 1 : index
    %c1_122 = arith.constant 1 : index
    %c0_123 = arith.constant 0 : index
    %136 = tpu.strided_load %arg27[%c0_120, %c1_121, %c1_122, %c0_123] {strides = array<i32: 1, 2, 2, 1>} : memref<2x10x10x48xf32, #tpu.memory_space<vmem>>, vector<2x4x4x48xf32>
    %c4_124 = arith.constant 4 : index
    %c0_125 = arith.constant 0 : index
    %137 = vector.load %arg11[%c4_124, %c0_125] : memref<9x48xf32, #tpu.memory_space<vmem>>, vector<1x48xf32>
    %138 = vector.shape_cast %137 : vector<1x48xf32> to vector<1x1x1x48xf32>
    %139 = vector.broadcast %138 : vector<1x1x1x48xf32> to vector<2x4x4x48xf32>
    %140 = arith.mulf %136, %139 : vector<2x4x4x48xf32>
    %141 = arith.addf %135, %140 : vector<2x4x4x48xf32>
    %c0_126 = arith.constant 0 : index
    %c1_127 = arith.constant 1 : index
    %c2_128 = arith.constant 2 : index
    %c0_129 = arith.constant 0 : index
    %142 = tpu.strided_load %arg27[%c0_126, %c1_127, %c2_128, %c0_129] {strides = array<i32: 1, 2, 2, 1>} : memref<2x10x10x48xf32, #tpu.memory_space<vmem>>, vector<2x4x4x48xf32>
    %c5_130 = arith.constant 5 : index
    %c0_131 = arith.constant 0 : index
    %143 = vector.load %arg11[%c5_130, %c0_131] : memref<9x48xf32, #tpu.memory_space<vmem>>, vector<1x48xf32>
    %144 = vector.shape_cast %143 : vector<1x48xf32> to vector<1x1x1x48xf32>
    %145 = vector.broadcast %144 : vector<1x1x1x48xf32> to vector<2x4x4x48xf32>
    %146 = arith.mulf %142, %145 : vector<2x4x4x48xf32>
    %147 = arith.addf %141, %146 : vector<2x4x4x48xf32>
    %c0_132 = arith.constant 0 : index
    %c2_133 = arith.constant 2 : index
    %c0_134 = arith.constant 0 : index
    %c0_135 = arith.constant 0 : index
    %148 = tpu.strided_load %arg27[%c0_132, %c2_133, %c0_134, %c0_135] {strides = array<i32: 1, 2, 2, 1>} : memref<2x10x10x48xf32, #tpu.memory_space<vmem>>, vector<2x4x4x48xf32>
    %c6_136 = arith.constant 6 : index
    %c0_137 = arith.constant 0 : index
    %149 = vector.load %arg11[%c6_136, %c0_137] : memref<9x48xf32, #tpu.memory_space<vmem>>, vector<1x48xf32>
    %150 = vector.shape_cast %149 : vector<1x48xf32> to vector<1x1x1x48xf32>
    %151 = vector.broadcast %150 : vector<1x1x1x48xf32> to vector<2x4x4x48xf32>
    %152 = arith.mulf %148, %151 : vector<2x4x4x48xf32>
    %153 = arith.addf %147, %152 : vector<2x4x4x48xf32>
    %c0_138 = arith.constant 0 : index
    %c2_139 = arith.constant 2 : index
    %c1_140 = arith.constant 1 : index
    %c0_141 = arith.constant 0 : index
    %154 = tpu.strided_load %arg27[%c0_138, %c2_139, %c1_140, %c0_141] {strides = array<i32: 1, 2, 2, 1>} : memref<2x10x10x48xf32, #tpu.memory_space<vmem>>, vector<2x4x4x48xf32>
    %c7_142 = arith.constant 7 : index
    %c0_143 = arith.constant 0 : index
    %155 = vector.load %arg11[%c7_142, %c0_143] : memref<9x48xf32, #tpu.memory_space<vmem>>, vector<1x48xf32>
    %156 = vector.shape_cast %155 : vector<1x48xf32> to vector<1x1x1x48xf32>
    %157 = vector.broadcast %156 : vector<1x1x1x48xf32> to vector<2x4x4x48xf32>
    %158 = arith.mulf %154, %157 : vector<2x4x4x48xf32>
    %159 = arith.addf %153, %158 : vector<2x4x4x48xf32>
    %c0_144 = arith.constant 0 : index
    %c2_145 = arith.constant 2 : index
    %c2_146 = arith.constant 2 : index
    %c0_147 = arith.constant 0 : index
    %160 = tpu.strided_load %arg27[%c0_144, %c2_145, %c2_146, %c0_147] {strides = array<i32: 1, 2, 2, 1>} : memref<2x10x10x48xf32, #tpu.memory_space<vmem>>, vector<2x4x4x48xf32>
    %c8_148 = arith.constant 8 : index
    %c0_149 = arith.constant 0 : index
    %161 = vector.load %arg11[%c8_148, %c0_149] : memref<9x48xf32, #tpu.memory_space<vmem>>, vector<1x48xf32>
    %162 = vector.shape_cast %161 : vector<1x48xf32> to vector<1x1x1x48xf32>
    %163 = vector.broadcast %162 : vector<1x1x1x48xf32> to vector<2x4x4x48xf32>
    %164 = arith.mulf %160, %163 : vector<2x4x4x48xf32>
    %165 = arith.addf %159, %164 : vector<2x4x4x48xf32>
    %166 = vector.shape_cast %165 : vector<2x4x4x48xf32> to vector<32x48xf32>
    %c0_150 = arith.constant 0 : index
    %c0_151 = arith.constant 0 : index
    %167 = vector.load %arg12[%c0_150, %c0_151] : memref<1x48xf32, #tpu.memory_space<vmem>>, vector<1x48xf32>
    %168 = vector.broadcast %167 : vector<1x48xf32> to vector<32x48xf32>
    %169 = arith.addf %166, %168 : vector<32x48xf32>
    %cst_152 = arith.constant 0.000000e+00 : f32
    %cst_153 = arith.constant 6.000000e+00 : f32
    %170 = vector.broadcast %cst_152 : f32 to vector<32x48xf32>
    %171 = arith.maximumf %170, %169 : vector<32x48xf32>
    %172 = vector.broadcast %cst_153 : f32 to vector<32x48xf32>
    %173 = arith.minimumf %172, %171 : vector<32x48xf32>
    %174 = arith.truncf %173 : vector<32x48xf32> to vector<32x48xbf16>
    %c0_154 = arith.constant 0 : index
    %c0_155 = arith.constant 0 : index
    %175 = vector.load %arg13[%c0_154, %c0_155] : memref<48x16xbf16, #tpu.memory_space<vmem>>, vector<48x16xbf16>
    %cst_156 = arith.constant dense<0.000000e+00> : vector<32x16xf32>
    %176 = tpu.matmul %174, %175, %cst_156 {dimension_numbers = #tpu.dot_dimension_numbers<[1], [0], [0], [1], [0, 0, 1, 1], [], []>} : vector<32x48xbf16>, vector<48x16xbf16>, vector<32x16xf32> -> vector<32x16xf32>
    %c0_157 = arith.constant 0 : index
    %c0_158 = arith.constant 0 : index
    %177 = vector.load %arg14[%c0_157, %c0_158] : memref<1x16xf32, #tpu.memory_space<vmem>>, vector<1x16xf32>
    %178 = vector.broadcast %177 : vector<1x16xf32> to vector<32x16xf32>
    %179 = arith.addf %176, %178 : vector<32x16xf32>
    %180 = vector.shape_cast %179 : vector<32x16xf32> to vector<2x4x4x16xf32>
    %181 = vector.shape_cast %180 : vector<2x4x4x16xf32> to vector<32x16xf32>
    %182 = arith.truncf %181 : vector<32x16xf32> to vector<32x16xbf16>
    %c0_159 = arith.constant 0 : index
    %c0_160 = arith.constant 0 : index
    %183 = vector.load %arg15[%c0_159, %c0_160] : memref<16x48xbf16, #tpu.memory_space<vmem>>, vector<16x48xbf16>
    %cst_161 = arith.constant dense<0.000000e+00> : vector<32x48xf32>
    %184 = tpu.matmul %182, %183, %cst_161 {dimension_numbers = #tpu.dot_dimension_numbers<[1], [0], [0], [1], [0, 0, 1, 1], [], []>} : vector<32x16xbf16>, vector<16x48xbf16>, vector<32x48xf32> -> vector<32x48xf32>
    %c0_162 = arith.constant 0 : index
    %c0_163 = arith.constant 0 : index
    %185 = vector.load %arg16[%c0_162, %c0_163] : memref<1x48xf32, #tpu.memory_space<vmem>>, vector<1x48xf32>
    %186 = vector.broadcast %185 : vector<1x48xf32> to vector<32x48xf32>
    %187 = arith.addf %184, %186 : vector<32x48xf32>
    %cst_164 = arith.constant 0.000000e+00 : f32
    %cst_165 = arith.constant 6.000000e+00 : f32
    %188 = vector.broadcast %cst_164 : f32 to vector<32x48xf32>
    %189 = arith.maximumf %188, %187 : vector<32x48xf32>
    %190 = vector.broadcast %cst_165 : f32 to vector<32x48xf32>
    %191 = arith.minimumf %190, %189 : vector<32x48xf32>
    %cst_166 = arith.constant 0.000000e+00 : f32
    %192 = vector.broadcast %cst_166 : f32 to vector<2x6x6x48xf32>
    %c0_167 = arith.constant 0 : index
    %c0_168 = arith.constant 0 : index
    %c0_169 = arith.constant 0 : index
    %c0_170 = arith.constant 0 : index
    %193 = vector.load %arg28[%c0_167, %c0_168, %c0_169, %c0_170] : memref<2x6x6x48xf32, #tpu.memory_space<vmem>>, vector<2x6x6x48xf32>
    tpu.vector_store %arg28[%c0_167, %c0_168, %c0_169, %c0_170], %192 {strides = array<i32>} : memref<2x6x6x48xf32, #tpu.memory_space<vmem>>, vector<2x6x6x48xf32>,
    %194 = vector.shape_cast %191 : vector<32x48xf32> to vector<2x4x4x48xf32>
    %c0_171 = arith.constant 0 : index
    %c1_172 = arith.constant 1 : index
    %c1_173 = arith.constant 1 : index
    %c0_174 = arith.constant 0 : index
    %195 = vector.load %arg28[%c0_171, %c1_172, %c1_173, %c0_174] : memref<2x6x6x48xf32, #tpu.memory_space<vmem>>, vector<2x4x4x48xf32>
    tpu.vector_store %arg28[%c0_171, %c1_172, %c1_173, %c0_174], %194 {strides = array<i32>} : memref<2x6x6x48xf32, #tpu.memory_space<vmem>>, vector<2x4x4x48xf32>,
    %cst_175 = arith.constant 0.000000e+00 : f32
    %196 = vector.broadcast %cst_175 : f32 to vector<2x2x2x48xf32>
    %c0_176 = arith.constant 0 : index
    %c0_177 = arith.constant 0 : index
    %c0_178 = arith.constant 0 : index
    %c0_179 = arith.constant 0 : index
    %197 = tpu.strided_load %arg28[%c0_176, %c0_177, %c0_178, %c0_179] {strides = array<i32: 1, 2, 2, 1>} : memref<2x6x6x48xf32, #tpu.memory_space<vmem>>, vector<2x2x2x48xf32>
    %c0_180 = arith.constant 0 : index
    %c0_181 = arith.constant 0 : index
    %198 = vector.load %arg17[%c0_180, %c0_181] : memref<9x48xf32, #tpu.memory_space<vmem>>, vector<1x48xf32>
    %199 = vector.shape_cast %198 : vector<1x48xf32> to vector<1x1x1x48xf32>
    %200 = vector.broadcast %199 : vector<1x1x1x48xf32> to vector<2x2x2x48xf32>
    %201 = arith.mulf %197, %200 : vector<2x2x2x48xf32>
    %202 = arith.addf %196, %201 : vector<2x2x2x48xf32>
    %c0_182 = arith.constant 0 : index
    %c0_183 = arith.constant 0 : index
    %c1_184 = arith.constant 1 : index
    %c0_185 = arith.constant 0 : index
    %203 = tpu.strided_load %arg28[%c0_182, %c0_183, %c1_184, %c0_185] {strides = array<i32: 1, 2, 2, 1>} : memref<2x6x6x48xf32, #tpu.memory_space<vmem>>, vector<2x2x2x48xf32>
    %c1_186 = arith.constant 1 : index
    %c0_187 = arith.constant 0 : index
    %204 = vector.load %arg17[%c1_186, %c0_187] : memref<9x48xf32, #tpu.memory_space<vmem>>, vector<1x48xf32>
    %205 = vector.shape_cast %204 : vector<1x48xf32> to vector<1x1x1x48xf32>
    %206 = vector.broadcast %205 : vector<1x1x1x48xf32> to vector<2x2x2x48xf32>
    %207 = arith.mulf %203, %206 : vector<2x2x2x48xf32>
    %208 = arith.addf %202, %207 : vector<2x2x2x48xf32>
    %c0_188 = arith.constant 0 : index
    %c0_189 = arith.constant 0 : index
    %c2_190 = arith.constant 2 : index
    %c0_191 = arith.constant 0 : index
    %209 = tpu.strided_load %arg28[%c0_188, %c0_189, %c2_190, %c0_191] {strides = array<i32: 1, 2, 2, 1>} : memref<2x6x6x48xf32, #tpu.memory_space<vmem>>, vector<2x2x2x48xf32>
    %c2_192 = arith.constant 2 : index
    %c0_193 = arith.constant 0 : index
    %210 = vector.load %arg17[%c2_192, %c0_193] : memref<9x48xf32, #tpu.memory_space<vmem>>, vector<1x48xf32>
    %211 = vector.shape_cast %210 : vector<1x48xf32> to vector<1x1x1x48xf32>
    %212 = vector.broadcast %211 : vector<1x1x1x48xf32> to vector<2x2x2x48xf32>
    %213 = arith.mulf %209, %212 : vector<2x2x2x48xf32>
    %214 = arith.addf %208, %213 : vector<2x2x2x48xf32>
    %c0_194 = arith.constant 0 : index
    %c1_195 = arith.constant 1 : index
    %c0_196 = arith.constant 0 : index
    %c0_197 = arith.constant 0 : index
    %215 = tpu.strided_load %arg28[%c0_194, %c1_195, %c0_196, %c0_197] {strides = array<i32: 1, 2, 2, 1>} : memref<2x6x6x48xf32, #tpu.memory_space<vmem>>, vector<2x2x2x48xf32>
    %c3_198 = arith.constant 3 : index
    %c0_199 = arith.constant 0 : index
    %216 = vector.load %arg17[%c3_198, %c0_199] : memref<9x48xf32, #tpu.memory_space<vmem>>, vector<1x48xf32>
    %217 = vector.shape_cast %216 : vector<1x48xf32> to vector<1x1x1x48xf32>
    %218 = vector.broadcast %217 : vector<1x1x1x48xf32> to vector<2x2x2x48xf32>
    %219 = arith.mulf %215, %218 : vector<2x2x2x48xf32>
    %220 = arith.addf %214, %219 : vector<2x2x2x48xf32>
    %c0_200 = arith.constant 0 : index
    %c1_201 = arith.constant 1 : index
    %c1_202 = arith.constant 1 : index
    %c0_203 = arith.constant 0 : index
    %221 = tpu.strided_load %arg28[%c0_200, %c1_201, %c1_202, %c0_203] {strides = array<i32: 1, 2, 2, 1>} : memref<2x6x6x48xf32, #tpu.memory_space<vmem>>, vector<2x2x2x48xf32>
    %c4_204 = arith.constant 4 : index
    %c0_205 = arith.constant 0 : index
    %222 = vector.load %arg17[%c4_204, %c0_205] : memref<9x48xf32, #tpu.memory_space<vmem>>, vector<1x48xf32>
    %223 = vector.shape_cast %222 : vector<1x48xf32> to vector<1x1x1x48xf32>
    %224 = vector.broadcast %223 : vector<1x1x1x48xf32> to vector<2x2x2x48xf32>
    %225 = arith.mulf %221, %224 : vector<2x2x2x48xf32>
    %226 = arith.addf %220, %225 : vector<2x2x2x48xf32>
    %c0_206 = arith.constant 0 : index
    %c1_207 = arith.constant 1 : index
    %c2_208 = arith.constant 2 : index
    %c0_209 = arith.constant 0 : index
    %227 = tpu.strided_load %arg28[%c0_206, %c1_207, %c2_208, %c0_209] {strides = array<i32: 1, 2, 2, 1>} : memref<2x6x6x48xf32, #tpu.memory_space<vmem>>, vector<2x2x2x48xf32>
    %c5_210 = arith.constant 5 : index
    %c0_211 = arith.constant 0 : index
    %228 = vector.load %arg17[%c5_210, %c0_211] : memref<9x48xf32, #tpu.memory_space<vmem>>, vector<1x48xf32>
    %229 = vector.shape_cast %228 : vector<1x48xf32> to vector<1x1x1x48xf32>
    %230 = vector.broadcast %229 : vector<1x1x1x48xf32> to vector<2x2x2x48xf32>
    %231 = arith.mulf %227, %230 : vector<2x2x2x48xf32>
    %232 = arith.addf %226, %231 : vector<2x2x2x48xf32>
    %c0_212 = arith.constant 0 : index
    %c2_213 = arith.constant 2 : index
    %c0_214 = arith.constant 0 : index
    %c0_215 = arith.constant 0 : index
    %233 = tpu.strided_load %arg28[%c0_212, %c2_213, %c0_214, %c0_215] {strides = array<i32: 1, 2, 2, 1>} : memref<2x6x6x48xf32, #tpu.memory_space<vmem>>, vector<2x2x2x48xf32>
    %c6_216 = arith.constant 6 : index
    %c0_217 = arith.constant 0 : index
    %234 = vector.load %arg17[%c6_216, %c0_217] : memref<9x48xf32, #tpu.memory_space<vmem>>, vector<1x48xf32>
    %235 = vector.shape_cast %234 : vector<1x48xf32> to vector<1x1x1x48xf32>
    %236 = vector.broadcast %235 : vector<1x1x1x48xf32> to vector<2x2x2x48xf32>
    %237 = arith.mulf %233, %236 : vector<2x2x2x48xf32>
    %238 = arith.addf %232, %237 : vector<2x2x2x48xf32>
    %c0_218 = arith.constant 0 : index
    %c2_219 = arith.constant 2 : index
    %c1_220 = arith.constant 1 : index
    %c0_221 = arith.constant 0 : index
    %239 = tpu.strided_load %arg28[%c0_218, %c2_219, %c1_220, %c0_221] {strides = array<i32: 1, 2, 2, 1>} : memref<2x6x6x48xf32, #tpu.memory_space<vmem>>, vector<2x2x2x48xf32>
    %c7_222 = arith.constant 7 : index
    %c0_223 = arith.constant 0 : index
    %240 = vector.load %arg17[%c7_222, %c0_223] : memref<9x48xf32, #tpu.memory_space<vmem>>, vector<1x48xf32>
    %241 = vector.shape_cast %240 : vector<1x48xf32> to vector<1x1x1x48xf32>
    %242 = vector.broadcast %241 : vector<1x1x1x48xf32> to vector<2x2x2x48xf32>
    %243 = arith.mulf %239, %242 : vector<2x2x2x48xf32>
    %244 = arith.addf %238, %243 : vector<2x2x2x48xf32>
    %c0_224 = arith.constant 0 : index
    %c2_225 = arith.constant 2 : index
    %c2_226 = arith.constant 2 : index
    %c0_227 = arith.constant 0 : index
    %245 = tpu.strided_load %arg28[%c0_224, %c2_225, %c2_226, %c0_227] {strides = array<i32: 1, 2, 2, 1>} : memref<2x6x6x48xf32, #tpu.memory_space<vmem>>, vector<2x2x2x48xf32>
    %c8_228 = arith.constant 8 : index
    %c0_229 = arith.constant 0 : index
    %246 = vector.load %arg17[%c8_228, %c0_229] : memref<9x48xf32, #tpu.memory_space<vmem>>, vector<1x48xf32>
    %247 = vector.shape_cast %246 : vector<1x48xf32> to vector<1x1x1x48xf32>
    %248 = vector.broadcast %247 : vector<1x1x1x48xf32> to vector<2x2x2x48xf32>
    %249 = arith.mulf %245, %248 : vector<2x2x2x48xf32>
    %250 = arith.addf %244, %249 : vector<2x2x2x48xf32>
    %251 = vector.shape_cast %250 : vector<2x2x2x48xf32> to vector<8x48xf32>
    %c0_230 = arith.constant 0 : index
    %c0_231 = arith.constant 0 : index
    %252 = vector.load %arg18[%c0_230, %c0_231] : memref<1x48xf32, #tpu.memory_space<vmem>>, vector<1x48xf32>
    %253 = vector.broadcast %252 : vector<1x48xf32> to vector<8x48xf32>
    %254 = arith.addf %251, %253 : vector<8x48xf32>
    %cst_232 = arith.constant 0.000000e+00 : f32
    %cst_233 = arith.constant 6.000000e+00 : f32
    %255 = vector.broadcast %cst_232 : f32 to vector<8x48xf32>
    %256 = arith.maximumf %255, %254 : vector<8x48xf32>
    %257 = vector.broadcast %cst_233 : f32 to vector<8x48xf32>
    %258 = arith.minimumf %257, %256 : vector<8x48xf32>
    %259 = arith.truncf %258 : vector<8x48xf32> to vector<8x48xbf16>
    %c0_234 = arith.constant 0 : index
    %c0_235 = arith.constant 0 : index
    %260 = vector.load %arg19[%c0_234, %c0_235] : memref<48x32xbf16, #tpu.memory_space<vmem>>, vector<48x32xbf16>
    %cst_236 = arith.constant dense<0.000000e+00> : vector<8x32xf32>
    %261 = tpu.matmul %259, %260, %cst_236 {dimension_numbers = #tpu.dot_dimension_numbers<[1], [0], [0], [1], [0, 0, 1, 1], [], []>} : vector<8x48xbf16>, vector<48x32xbf16>, vector<8x32xf32> -> vector<8x32xf32>
    %c0_237 = arith.constant 0 : index
    %c0_238 = arith.constant 0 : index
    %262 = vector.load %arg20[%c0_237, %c0_238] : memref<1x32xf32, #tpu.memory_space<vmem>>, vector<1x32xf32>
    %263 = vector.broadcast %262 : vector<1x32xf32> to vector<8x32xf32>
    %264 = arith.addf %261, %263 : vector<8x32xf32>
    %265 = vector.shape_cast %264 : vector<8x32xf32> to vector<2x2x2x32xf32>
    %266 = vector.shape_cast %265 : vector<2x2x2x32xf32> to vector<8x32xf32>
    %267 = arith.truncf %266 : vector<8x32xf32> to vector<8x32xbf16>
    %c0_239 = arith.constant 0 : index
    %c0_240 = arith.constant 0 : index
    %268 = vector.load %arg21[%c0_239, %c0_240] : memref<32x64xbf16, #tpu.memory_space<vmem>>, vector<32x64xbf16>
    %cst_241 = arith.constant dense<0.000000e+00> : vector<8x64xf32>
    %269 = tpu.matmul %267, %268, %cst_241 {dimension_numbers = #tpu.dot_dimension_numbers<[1], [0], [0], [1], [0, 0, 1, 1], [], []>} : vector<8x32xbf16>, vector<32x64xbf16>, vector<8x64xf32> -> vector<8x64xf32>
    %c0_242 = arith.constant 0 : index
    %c0_243 = arith.constant 0 : index
    %270 = vector.load %arg22[%c0_242, %c0_243] : memref<1x64xf32, #tpu.memory_space<vmem>>, vector<1x64xf32>
    %271 = vector.broadcast %270 : vector<1x64xf32> to vector<8x64xf32>
    %272 = arith.addf %269, %271 : vector<8x64xf32>
    %cst_244 = arith.constant 0.000000e+00 : f32
    %cst_245 = arith.constant 6.000000e+00 : f32
    %273 = vector.broadcast %cst_244 : f32 to vector<8x64xf32>
    %274 = arith.maximumf %273, %272 : vector<8x64xf32>
    %275 = vector.broadcast %cst_245 : f32 to vector<8x64xf32>
    %276 = arith.minimumf %275, %274 : vector<8x64xf32>
    %277 = vector.shape_cast %276 : vector<8x64xf32> to vector<2x4x64xf32>
    %cst_246 = arith.constant dense<0.000000e+00> : vector<2x64xf32>
    %278 = vector.multi_reduction <add>, %277, %cst_246 [1] : vector<2x4x64xf32> to vector<2x64xf32>
    %cst_247 = arith.constant 4.000000e+00 : f32
    %279 = vector.broadcast %cst_247 : f32 to vector<2x64xf32>
    %280 = arith.divf %278, %279 : vector<2x64xf32>
    %281 = arith.truncf %280 : vector<2x64xf32> to vector<2x64xbf16>
    %c0_248 = arith.constant 0 : index
    %c0_249 = arith.constant 0 : index
    %282 = vector.load %arg23[%c0_248, %c0_249] : memref<64x10xbf16, #tpu.memory_space<vmem>>, vector<64x10xbf16>
    %cst_250 = arith.constant dense<0.000000e+00> : vector<2x10xf32>
    %283 = tpu.matmul %281, %282, %cst_250 {dimension_numbers = #tpu.dot_dimension_numbers<[1], [0], [0], [1], [0, 0, 1, 1], [], []>} : vector<2x64xbf16>, vector<64x10xbf16>, vector<2x10xf32> -> vector<2x10xf32>
    %c0_251 = arith.constant 0 : index
    %c0_252 = arith.constant 0 : index
    %284 = vector.load %arg24[%c0_251, %c0_252] : memref<1x10xf32, #tpu.memory_space<vmem>>, vector<1x10xf32>
    %285 = vector.broadcast %284 : vector<1x10xf32> to vector<2x10xf32>
    %286 = arith.addf %283, %285 : vector<2x10xf32>
    %c0_253 = arith.constant 0 : index
    %c0_254 = arith.constant 0 : index
    %287 = vector.load %arg25[%c0_253, %c0_254] : memref<2x10xf32, #tpu.memory_space<vmem>>, vector<2x10xf32>
    tpu.vector_store %arg25[%c0_253, %c0_254], %286 {strides = array<i32>} : memref<2x10xf32, #tpu.memory_space<vmem>>, vector<2x10xf32>,
    return
  }
}

</mosaic_0001>

<bundles_post_ra>
// kernel: mbv2_forward.1
= control target key start
LH: loop header
LB: loop body
LE: loop exit
PB: predicated region body
PF: predicated region fallthrough
CT: control target
= control target key end

     0   :  { %s3992_s0 = inlined_call_operand.vmem [shape: bf16[128,36], index: 0, kind: input, shape index: {}]   ;;  %s3993_s1 = inlined_call_operand.vmem [shape: bf16[36,8], index: 1, kind: input, shape index: {}]   ;;  %s3994_s2 = inlined_call_operand.vmem [shape: f32[1,8], index: 2, kind: input, shape index: {}]   ;;  %s3995_s3 = inlined_call_operand.vmem [shape: bf16[8,24], index: 3, kind: input, shape index: {}]   ;;  %s3996_s4 = inlined_call_operand.vmem [shape: f32[1,24], index: 4, kind: input, shape index: {}]   ;;  %s3997_s5 = inlined_call_operand.vmem [shape: f32[9,24], index: 5, kind: input, shape index: {}]   ;;  %s3998_s6 = inlined_call_operand.vmem [shape: f32[1,24], index: 6, kind: input, shape index: {}]   ;;  %s3999_s7 = inlined_call_operand.vmem [shape: bf16[24,16], index: 7, kind: input, shape index: {}]   ;;  %s4000_s8 = inlined_call_operand.vmem [shape: f32[1,16], index: 8, kind: input, shape index: {}]   ;;  %s4001_s9 = inlined_call_operand.vmem [shape: bf16[16,48], index: 9, kind: input, shape index: {}]   ;;  %s4002_s10 = inlined_call_operand.vmem [shape: f32[1,48], index: 10, kind: input, shape index: {}]   ;;  %s4003_s11 = inlined_call_operand.vmem [shape: f32[9,48], index: 11, kind: input, shape index: {}]   ;;  %s4004_s12 = inlined_call_operand.vmem [shape: f32[1,48], index: 12, kind: input, shape index: {}]   ;;  %s4005_s13 = inlined_call_operand.vmem [shape: bf16[48,16], index: 13, kind: input, shape index: {}]   ;;  %s4006_s14 = inlined_call_operand.vmem [shape: f32[1,16], index: 14, kind: input, shape index: {}]   ;;  %s4007_s15 = inlined_call_operand.vmem [shape: bf16[16,48], index: 15, kind: input, shape index: {}]   ;;  %s4008_s16 = inlined_call_operand.vmem [shape: f32[1,48], index: 16, kind: input, shape index: {}]   ;;  %s4009_s17 = inlined_call_operand.vmem [shape: f32[9,48], index: 17, kind: input, shape index: {}]   ;;  %s4010_s18 = inlined_call_operand.vmem [shape: f32[1,48], index: 18, kind: input, shape index: {}]   ;;  %s4011_s19 = inlined_call_operand.vmem [shape: bf16[48,32], index: 19, kind: input, shape index: {}]   ;;  %s4012_s20 = inlined_call_operand.vmem [shape: f32[1,32], index: 20, kind: input, shape index: {}]   ;;  %s4013_s21 = inlined_call_operand.vmem [shape: bf16[32,64], index: 21, kind: input, shape index: {}]   ;;  %s4014_s22 = inlined_call_operand.vmem [shape: f32[1,64], index: 22, kind: input, shape index: {}]   ;;  %s4015_s23 = inlined_call_operand.vmem [shape: bf16[64,10], index: 23, kind: input, shape index: {}]   ;;  %s4016_s24 = inlined_call_operand.vmem [shape: f32[1,10], index: 24, kind: input, shape index: {}]   ;;  %s4017_s25 = inlined_call_operand.hbm [shape: f32[2,10], index: 25, kind: output, shape index: {}]  }
   0x1   :  { %4022 = sst [smem:[#allocation8_spill]] %s3992_s0 }
   0x2   :  { %4023 = sst [smem:[#allocation9_spill]] %s3993_s1 }
   0x3   :  { %4024 = sst [smem:[#allocation10_spill]] %s3994_s2 }
   0x4   :  { %4025 = sst [smem:[#allocation11_spill]] %s3995_s3 }
   0x5   :  { %4026 = sst [smem:[#allocation12_spill]] %s3996_s4 }
   0x6   :  { %4027 = sst [smem:[#allocation13_spill]] %s3997_s5 }
   0x7   :  { %4028 = sst [smem:[#allocation14_spill]] %s3998_s6 }
   0x8   :  { %4029 = sst [smem:[#allocation15_spill]] %s3999_s7 }
   0x9   :  { %4030 = sst [smem:[#allocation16_spill]] %s4000_s8 }
   0xa   :  { %4031 = sst [smem:[#allocation17_spill]] %s4001_s9 }
   0xb   :  { %s4032_s6 = sld [smem:[#allocation9_spill]]  ;;  %vm165_vm0 = vcmask 293888   ;;  %s4033_s27 = sld [smem:[#allocation8_spill]]  ;;  %vm190_vm1 = vcmask 1041408  }
  0x11   :  { %v2944_v0 = vld [vmem:[%s4032_s6] sm:$0xff]   ;;  %v2945_v1 = vld [vmem:[%s4032_s6 + $0x8] sm:$0xff]   ;;  %v2946_v2 = vld [vmem:[%s4032_s6 + $0x10] ss:$0 sps:$4 sm:$0x33]  }
  0x12   :  { %2813 = vmatprep.subr.bf16.mxu0 %v2944_v0  ;;  %v2947_v3 = vld [vmem:[%s4033_s27] sm:$0xff]   ;;  %v192_v4 = vsel %vm190_vm1, %v2946_v2, 0  ;;  %v2948_v5 = vld [vmem:[%s4033_s27 + $0x8] sm:$0xff]   ;;  %v2949_v6 = vld [vmem:[%s4033_s27 + $0x10] sm:$0xff]  }
  0x13   :  { %2814 = vmatpush3.bf16.msra.mxu0 %v2944_v0  ;;  %2819 = vmatprep.mubr.msk.bf16.mxu0 %vm165_vm0, %v2947_v3  ;;  %v2950_v7 = vld [vmem:[%s4033_s27 + $0x18] sm:$0xff]   ;;  %v2951_v8 = vld [vmem:[%s4033_s27 + $0x20] sm:$0xff]  }
  0x14   :  { %2815 = vmatprep.subr.bf16.mxu0 %v2945_v1 }
  0x17   :  { %2816 = vmatpush3.bf16.msra.mxu0 %v2945_v1 }
  0x18   :  { %2937 = vmatprep.subr.msk.bf16.mxu0 %vm190_vm1, %v2946_v2 }
  0x1b   :  { %2818 = vmatpush3.bf16.msra.mxu0 %v192_v4 }
  0x1e   :  { %2820 = vmatmul.mubr.msk.bf16.vlgmr.msra.gmra.mrb[0].mxu0 %vm165_vm0, %v2948_v5 }
  0x1f   :  { %2823 = vmatprep.mubr.msk.bf16.mxu0 %vm165_vm0, %v2949_v6 }
  0x20   :  { %30 = vsyncpa [#allocation6], 0  ;;  %v2952_v9 = vld [vmem:[%s4033_s27 + $0x28] sm:$0xff]   ;;  %v2953_v10 = vld [vmem:[%s4033_s27 + $0x30] sm:$0xff]   ;;  %s4034_s9 = sld [smem:[#allocation11_spill]]  ;;  %vm364_vm2 = vcmask 1043456  }
  0x21   :  { %v2954_v11 = vld [vmem:[%s4033_s27 + $0x38] sm:$0xff]   ;;  %s4035_s29 = sld [smem:[#allocation10_spill]]  ;;  %vm339_vm3 = vcmask 64512   ;;  %vm497_vm4 = vcmask 195584   ;;  %vm499_vm5 = vcmask 189440   ;;  %s4036_s6 = sld [smem:[#allocation15_spill]] }
  0x22   :  { %s4037_s1 = sld [smem:[#allocation17_spill]]  ;;  %s4038_s28 = sld [smem:[#allocation12_spill]]  ;;  %vm1263_vm6 = vcmask 130048   ;;  %vm1417_vm7 = vcmask 392192   ;;  %vm1419_vm8 = vcmask 386048   ;;  %vm2024_vm9 = vcmask 390144  }
  0x23   :  { %s4039_s0 = sld [smem:[#allocation13_spill]]  ;;  %s4041_s3 = sld [smem:[#allocation16_spill]]  ;;  %vm2996_vm10 = vmmov 0   ;;  %vm2050_vm11 = vcmask 388096   ;;  %vm2406_vm12 = vcmask 261120   ;;  %vm2455_vm13 = vcmask 519168  }
  0x24   :  { %vm2494_vm14 = vcmask 1041409   ;;  %vm2521_vm15 = vcmask 523264  }
  0x26   :  { %2824 = vmatmul.mubr.msk.bf16.gmra.mrb[4].mxu0 %vm165_vm0, %v2950_v7  ;;  %v331_v12 = vld [vmem:[%s4034_s9] sm:$0xf] }
  0x27   :  { %2827 = vmatprep.mubr.msk.bf16.mxu0 %vm165_vm0, %v2951_v8  ;;  %2938 = vmatprep.subr.msk.bf16.mxu1 %vm364_vm2, %v331_v12  ;;  %v366_v13 = vsel %vm364_vm2, %v331_v12, 0  ;;  %v3178_v14 = vld [vmem:[%s4035_s29] ss:$0 sm:$0xff] }
  0x28   :  { %2836 = vmatpush3.bf16.msra.mxu1 %v366_v13 }
  0x2e   :  { %2828 = vmatmul.mubr.msk.bf16.gmra.mrb[8].mxu0 %vm165_vm0, %v2952_v9 }
  0x2f   :  { %2831 = vmatprep.mubr.msk.bf16.mxu0 %vm165_vm0, %v2953_v10 }
  0x36   :  { %2832 = vmatmul.mubr.msk.bf16.gmra.mrb[12].mxu0 %vm165_vm0, %v2954_v11  ;;  %vm2565_vm0 = vcmask 74752  }
  0xf1   :  { %v2821_v15 = vpop.f32.mrb[0].mxu0 }
  0xf2   :  { %v237_v16 = vadd.f32 %v2821_v15, %v3178_v14  ;;  %v228_v17 = vpop.f32.mrb[1].mxu0 }
  0xf3   :  { %v229_v18 = vadd.f32 %v3178_v14, %v228_v17  ;;  %v2822_v19 = vpop.f32.mrb[2].mxu0 }
  0xf4   :  { %v293_v20 = vmax.f32 %v237_v16, 0.0  ;;  %v240_v21 = vadd.f32 %v2822_v19, %v3178_v14  ;;  %v231_v22 = vpop.f32.mrb[3].mxu0 }
  0xf5   :  { %v291_v23 = vmax.f32 %v229_v18, 0.0  ;;  %v232_v24 = vadd.f32 %v3178_v14, %v231_v22 }
  0xf6   :  { %v294_v25 = vmax.f32 %v240_v21, 0.0  ;;  %v309_v27 = vmin.f32 %v293_v20, 6.0 }
  0xf7   :  { %v292_v26 = vmax.f32 %v232_v24, 0.0  ;;  %v307_v29 = vmin.f32 %v291_v23, 6.0  ;;  %v2995_v24 = vmov 0.0  }
  0xf8   :  { %v310_v28 = vmin.f32 %v294_v25, 6.0  ;;  %505 = vst.msk [vmem:[#allocation2 + $0x30] sm:$0xff] %vm497_vm4, %v2995_v24  ;;  %498 = vst.msk [vmem:[#allocation2] sm:$0xff] %vm497_vm4, %v2995_v24  ;;  %v2956_v25 = vld [vmem:[%s4036_s6 + $0x8] ss:$0 sps:$4 sm:$0xff]  }
  0xf9   :  { %v308_v30 = vmin.f32 %v292_v26, 6.0  ;;  %v2825_v31 = vpop.f32.mrb[4].mxu0  ;;  %506 = vst.msk [vmem:[#allocation2 + $0x38] sm:$0x3] %vm499_vm5, %v2995_v24  ;;  %500 = vst.msk [vmem:[#allocation2 + $0x8] sm:$0x3] %vm499_vm5, %v2995_v24 }
  0xfa   :  { %v324_v32 = vpack.c.bf16 %v310_v28, %v309_v27  ;;  %v253_v33 = vadd.f32 %v2825_v31, %v3178_v14  ;;  %v244_v34 = vpop.f32.mrb[5].mxu0  ;;  %501 = vst.msk [vmem:[#allocation2 + $0x10] sm:$0xff] %vm497_vm4, %v2995_v24  ;;  %503 = vst.msk [vmem:[#allocation2 + $0x20] sm:$0xff] %vm497_vm4, %v2995_v24  ;;  %v1141_v26 = vsel %vm364_vm2, %v2956_v25, 0  ;;  %v2957_v27 = vld [vmem:[%s4037_s1] sm:$0xff]  }
  0xfb   :  { %v245_v35 = vadd.f32 %v3178_v14, %v244_v34  ;;  %v2826_v36 = vpop.f32.mrb[6].mxu0  ;;  %v323_v37 = vpack.c.bf16 %v308_v30, %v307_v29  ;;  %502 = vst.msk [vmem:[#allocation2 + $0x18] sm:$0x3] %vm499_vm5, %v2995_v24  ;;  %504 = vst.msk [vmem:[#allocation2 + $0x28] sm:$0x3] %vm499_vm5, %v2995_v24  ;;  %2873 = vmatprep.subr.bf16.mxu0 %v2957_v27 }
  0xfc   :  { %v297_v38 = vmax.f32 %v253_v33, 0.0  ;;  %v256_v39 = vadd.f32 %v2826_v36, %v3178_v14  ;;  %v247_v40 = vpop.f32.mrb[7].mxu0  ;;  %507 = vst.msk [vmem:[#allocation2 + $0x40] sm:$0xff] %vm497_vm4, %v2995_v24  ;;  %509 = vst.msk [vmem:[#allocation2 + $0x50] sm:$0xff] %vm497_vm4, %v2995_v24  ;;  %2874 = vmatpush3.bf16.msra.mxu0 %v2957_v27  ;;  %v3299_v28 = vld [vmem:[%s4038_s28] ss:$0 sm:$0xff] }
  0xfd   :  { %v295_v41 = vmax.f32 %v245_v35, 0.0  ;;  %v248_v42 = vadd.f32 %v3178_v14, %v247_v40  ;;  %2837 = vmatprep.mubr.msk.bf16.mxu1 %vm339_vm3, %v323_v37  ;;  %508 = vst.msk [vmem:[#allocation2 + $0x48] sm:$0x3] %vm499_vm5, %v2995_v24  ;;  %510 = vst.msk [vmem:[#allocation2 + $0x58] sm:$0x3] %vm499_vm5, %v2995_v24 }
  0xfe   :  { %v298_v43 = vmax.f32 %v256_v39, 0.0  ;;  %2838 = vmatmul.mubr.msk.bf16.vlgmr.msra.gmra.mrb[0].mxu1 %vm339_vm3, %v324_v32  ;;  %v313_v45 = vmin.f32 %v297_v38, 6.0  ;;  %511 = vst.msk [vmem:[#allocation2 + $0x60] sm:$0xff] %vm497_vm4, %v2995_v24  ;;  %513 = vst.msk [vmem:[#allocation2 + $0x70] sm:$0xff] %vm497_vm4, %v2995_v24  ;;  %v3305_v33 = vld [vmem:[%s4039_s0] ss:$0 sm:$0xff] }
  0xff   :  { %v296_v44 = vmax.f32 %v248_v42, 0.0  ;;  %v311_v47 = vmin.f32 %v295_v41, 6.0  ;;  %512 = vst.msk [vmem:[#allocation2 + $0x68] sm:$0x3] %vm499_vm5, %v2995_v24  ;;  %514 = vst.msk [vmem:[#allocation2 + $0x78] sm:$0x3] %vm499_vm5, %v2995_v24 }
 0x100   :  { %v314_v46 = vmin.f32 %v298_v43, 6.0  ;;  %515 = vst.msk [vmem:[#allocation2 + $0x80] sm:$0xff] %vm497_vm4, %v2995_v24  ;;  %517 = vst.msk [vmem:[#allocation2 + $0x90] sm:$0xff] %vm497_vm4, %v2995_v24  ;;  %v556_v30 = vld [vmem:[#allocation2] sm:$0xff] }
 0x101   :  { %v312_v48 = vmin.f32 %v296_v44, 6.0  ;;  %v2829_v49 = vpop.f32.mrb[8].mxu0  ;;  %516 = vst.msk [vmem:[#allocation2 + $0x88] sm:$0x3] %vm499_vm5, %v2995_v24  ;;  %518 = vst.msk [vmem:[#allocation2 + $0x98] sm:$0x3] %vm499_vm5, %v2995_v24 }
 0x102   :  { %v326_v50 = vpack.c.bf16 %v314_v46, %v313_v45  ;;  %v269_v51 = vadd.f32 %v2829_v49, %v3178_v14  ;;  %v260_v52 = vpop.f32.mrb[9].mxu0  ;;  %519 = vst.msk [vmem:[#allocation2 + $0xa0] sm:$0xff] %vm497_vm4, %v2995_v24  ;;  %521 = vst.msk [vmem:[#allocation2 + $0xb0] sm:$0xff] %vm497_vm4, %v2995_v24  ;;  %v609_v34 = vld [vmem:[#allocation2 + $0x1] sm:$0xff]  ;;  %v577_v45 = vmul.f32 %v3305_v33, %v556_v30 }
 0x103   :  { %v325_v53 = vpack.c.bf16 %v312_v48, %v311_v47  ;;  %v261_v54 = vadd.f32 %v3178_v14, %v260_v52  ;;  %v2830_v55 = vpop.f32.mrb[10].mxu0  ;;  %520 = vst.msk [vmem:[#allocation2 + $0xa8] sm:$0x3] %vm499_vm5, %v2995_v24  ;;  %522 = vst.msk [vmem:[#allocation2 + $0xb8] sm:$0x3] %vm499_vm5, %v2995_v24  ;;  %v662_v49 = vld [vmem:[#allocation2 + $0x2] sm:$0xff] }
 0x104   :  { %v301_v56 = vmax.f32 %v269_v51, 0.0  ;;  %v272_v57 = vadd.f32 %v2830_v55, %v3178_v14  ;;  %v263_v58 = vpop.f32.mrb[11].mxu0  ;;  %523 = vst.msk [vmem:[#allocation2 + $0xc0] sm:$0xff] %vm497_vm4, %v2995_v24  ;;  %525 = vst.msk [vmem:[#allocation2 + $0xd0] sm:$0xff] %vm497_vm4, %v2995_v24  ;;  %v3310_v35 = vld [vmem:[%s4039_s0 + $0x1] ss:$0 sm:$0xff] }
 0x105   :  { %v299_v59 = vmax.f32 %v261_v54, 0.0  ;;  %v264_v60 = vadd.f32 %v3178_v14, %v263_v58  ;;  %2841 = vmatprep.mubr.msk.bf16.mxu1 %vm339_vm3, %v325_v53  ;;  %524 = vst.msk [vmem:[#allocation2 + $0xc8] sm:$0x3] %vm499_vm5, %v2995_v24  ;;  %526 = vst.msk [vmem:[#allocation2 + $0xd8] sm:$0x3] %vm499_vm5, %v2995_v24  ;;  %v630_v46 = vmul.f32 %v3310_v35, %v609_v34 }
 0x106   :  { %v302_v61 = vmax.f32 %v272_v57, 0.0  ;;  %2842 = vmatmul.mubr.msk.bf16.gmra.mrb[4].mxu1 %vm339_vm3, %v326_v50  ;;  %v317_v63 = vmin.f32 %v301_v56, 6.0  ;;  %527 = vst.msk [vmem:[#allocation2 + $0xe0] sm:$0xff] %vm497_vm4, %v2995_v24  ;;  %529 = vst.msk [vmem:[#allocation2 + $0xf0] sm:$0xff] %vm497_vm4, %v2995_v24  ;;  %v3320_v50 = vld [vmem:[%s4039_s0 + $0x2] ss:$0 sm:$0xff] }
 0x107   :  { %v300_v62 = vmax.f32 %v264_v60, 0.0  ;;  %v315_v1 = vmin.f32 %v299_v59, 6.0  ;;  %528 = vst.msk [vmem:[#allocation2 + $0xe8] sm:$0x3] %vm499_vm5, %v2995_v24  ;;  %530 = vst.msk [vmem:[#allocation2 + $0xf8] sm:$0x3] %vm499_vm5, %v2995_v24  ;;  %v683_v59 = vmul.f32 %v3320_v50, %v662_v49 }
 0x108   :  { %v318_v0 = vmin.f32 %v302_v61, 6.0  ;;  %531 = vst.msk [vmem:[#allocation2 + $0x100] sm:$0xff] %vm497_vm4, %v2995_v24  ;;  %533 = vst.msk [vmem:[#allocation2 + $0x110] sm:$0xff] %vm497_vm4, %v2995_v24 }
 0x109   :  { %v316_v2 = vmin.f32 %v300_v62, 6.0  ;;  %v2833_v3 = vpop.f32.mrb[12].mxu0  ;;  %532 = vst.msk [vmem:[#allocation2 + $0x108] sm:$0x3] %vm499_vm5, %v2995_v24  ;;  %534 = vst.msk [vmem:[#allocation2 + $0x118] sm:$0x3] %vm499_vm5, %v2995_v24  ;;  %v646_v62 = vadd.f32 %v630_v46, %v577_v45 }
 0x10a   :  { %v328_v4 = vpack.c.bf16 %v318_v0, %v317_v63  ;;  %v285_v5 = vadd.f32 %v2833_v3, %v3178_v14  ;;  %v276_v6 = vpop.f32.mrb[13].mxu0  ;;  %535 = vst.msk [vmem:[#allocation2 + $0x120] sm:$0xff] %vm497_vm4, %v2995_v24  ;;  %537 = vst.msk [vmem:[#allocation2 + $0x130] sm:$0xff] %vm497_vm4, %v2995_v24  ;;  %v564_v38 = vld [vmem:[#allocation2 + $0xa0] sm:$0xff] }
 0x10b   :  { %v327_v7 = vpack.c.bf16 %v316_v2, %v315_v1  ;;  %v277_v8 = vadd.f32 %v3178_v14, %v276_v6  ;;  %v2834_v9 = vpop.f32.mrb[14].mxu0  ;;  %536 = vst.msk [vmem:[#allocation2 + $0x128] sm:$0x3] %vm499_vm5, %v2995_v24  ;;  %538 = vst.msk [vmem:[#allocation2 + $0x138] sm:$0x3] %vm499_vm5, %v2995_v24  ;;  %v617_v39 = vld [vmem:[#allocation2 + $0xa1] sm:$0xff]  ;;  %v585_v51 = vmul.f32 %v3305_v33, %v564_v38 }
 0x10c   :  { %v305_v10 = vmax.f32 %v285_v5, 0.0  ;;  %v288_v11 = vadd.f32 %v2834_v9, %v3178_v14  ;;  %v279_v12 = vpop.f32.mrb[15].mxu0  ;;  %v638_v52 = vmul.f32 %v3310_v35, %v617_v39  ;;  %v670_v55 = vld [vmem:[#allocation2 + $0xa2] sm:$0xff]  ;;  %1425 = vst.msk [vmem:[#allocation3 + $0x30] sm:$0xff] %vm1417_vm7, %v2995_v24  ;;  %1418 = vst.msk [vmem:[#allocation3] sm:$0xff] %vm1417_vm7, %v2995_v24 }
 0x10d   :  { %v303_v13 = vmax.f32 %v277_v8, 0.0  ;;  %v280_v15 = vadd.f32 %v3178_v14, %v279_v12  ;;  %2845 = vmatprep.mubr.msk.bf16.mxu1 %vm339_vm3, %v327_v7  ;;  %v2955_v14 = vld [vmem:[%s4036_s6] sm:$0xff]   ;;  %v691_v0 = vmul.f32 %v3320_v50, %v670_v55  ;;  %v882_v7 = vld [vmem:[#allocation2 + $0x90] sm:$0xff]  ;;  %s4040_s6 = sld [smem:[#allocation14_spill]]  ;;  %1426 = vst.msk [vmem:[#allocation3 + $0x38] sm:$0x3] %vm1419_vm8, %v2995_v24 }
 0x10e   :  { %v306_v16 = vmax.f32 %v288_v11, 0.0  ;;  %2846 = vmatmul.mubr.msk.bf16.gmra.mrb[8].mxu1 %vm339_vm3, %v328_v4  ;;  %v321_v18 = vmin.f32 %v305_v10, 6.0  ;;  %2853 = vmatprep.subr.bf16.mxu1 %v2955_v14  ;;  %v654_v63 = vadd.f32 %v638_v52, %v585_v51  ;;  %v3336_v6 = vld [vmem:[%s4039_s0 + $0x6] ss:$0 sm:$0xff]  ;;  %v935_v8 = vld [vmem:[#allocation2 + $0x91] sm:$0xff]  ;;  %1421 = vst.msk [vmem:[#allocation3 + $0x10] sm:$0xff] %vm1417_vm7, %v2995_v24 }
 0x10f   :  { %v304_v17 = vmax.f32 %v280_v15, 0.0  ;;  %v319_v20 = vmin.f32 %v303_v13, 6.0  ;;  %2854 = vmatpush3.bf16.msra.mxu1 %v2955_v14  ;;  %v3342_v11 = vld [vmem:[%s4039_s0 + $0x3] ss:$0 sm:$0xff]  ;;  %v3347_v12 = vld [vmem:[%s4039_s0 + $0x7] ss:$0 sm:$0xff] }
 0x110   :  { %v322_v19 = vmin.f32 %v306_v16, 6.0  ;;  %2939 = vmatprep.subr.msk.bf16.mxu1 %vm364_vm2, %v2956_v25  ;;  %v3352_v13 = vld [vmem:[%s4039_s0 + $0x8] ss:$0 sm:$0xff]  ;;  %v3376_v27 = vmul.f32 %v3347_v12, %v935_v8  ;;  %1420 = vst.msk [vmem:[#allocation3 + $0x8] sm:$0x3] %vm1419_vm8, %v2995_v24 }
 0x111   :  { %v320_v21 = vmin.f32 %v304_v17, 6.0  ;;  %v699_v17 = vadd.f32 %v683_v59, %v646_v62  ;;  %1422 = vst.msk [vmem:[#allocation3 + $0x18] sm:$0x3] %vm1419_vm8, %v2995_v24  ;;  %1424 = vst.msk [vmem:[#allocation3 + $0x28] sm:$0x3] %vm1419_vm8, %v2995_v24 }
 0x112   :  { %v330_v22 = vpack.c.bf16 %v322_v19, %v321_v18  ;;  %v3357_v18 = vld [vmem:[%s4039_s0 + $0x4] ss:$0 sm:$0xff]  ;;  %v3362_v19 = vld [vmem:[%s4039_s0 + $0x5] ss:$0 sm:$0xff]  ;;  %1423 = vst.msk [vmem:[#allocation3 + $0x20] sm:$0xff] %vm1417_vm7, %v2995_v24  ;;  %1427 = vst.msk [vmem:[#allocation3 + $0x40] sm:$0xff] %vm1417_vm7, %v2995_v24 }
 0x113   :  { %v329_v23 = vpack.c.bf16 %v320_v21, %v319_v20  ;;  %2856 = vmatpush3.bf16.msra.mxu1 %v1141_v26  ;;  %v3364_v20 = vadd.f32 %v691_v0, %v654_v63  ;;  %v3373_v26 = vmul.f32 %v3336_v6, %v882_v7  ;;  %1428 = vst.msk [vmem:[#allocation3 + $0x48] sm:$0x3] %vm1419_vm8, %v2995_v24  ;;  %1430 = vst.msk [vmem:[#allocation3 + $0x58] sm:$0x3] %vm1419_vm8, %v2995_v24 }
 0x114   :  { %2907 = vmatprep.subr.bf16.mxu1 %v2995_v24  ;;  %1429 = vst.msk [vmem:[#allocation3 + $0x50] sm:$0xff] %vm1417_vm7, %v2995_v24  ;;  %1431 = vst.msk [vmem:[#allocation3 + $0x60] sm:$0xff] %vm1417_vm7, %v2995_v24 }
 0x115   :  { %2849 = vmatprep.mubr.msk.bf16.mxu1 %vm339_vm3, %v329_v23  ;;  %1432 = vst.msk [vmem:[#allocation3 + $0x68] sm:$0x3] %vm1419_vm8, %v2995_v24  ;;  %1434 = vst.msk [vmem:[#allocation3 + $0x78] sm:$0x3] %vm1419_vm8, %v2995_v24 }
 0x116   :  { %2850 = vmatmul.mubr.msk.bf16.gmra.mrb[12].mxu1 %vm339_vm3, %v330_v22  ;;  %1433 = vst.msk [vmem:[#allocation3 + $0x70] sm:$0xff] %vm1417_vm7, %v2995_v24  ;;  %1435 = vst.msk [vmem:[#allocation3 + $0x80] sm:$0xff] %vm1417_vm7, %v2995_v24 }
 0x117   :  { %1436 = vst.msk [vmem:[#allocation3 + $0x88] sm:$0x3] %vm1419_vm8, %v2995_v24  ;;  %1440 = vst.msk [vmem:[#allocation3 + $0xa8] sm:$0x3] %vm1419_vm8, %v2995_v24 }
 0x118   :  { %1439 = vst.msk [vmem:[#allocation3 + $0xa0] sm:$0xff] %vm1417_vm7, %v2995_v24  ;;  %1441 = vst.msk [vmem:[#allocation3 + $0xb0] sm:$0xff] %vm1417_vm7, %v2995_v24 }
 0x119   :  { %1442 = vst.msk [vmem:[#allocation3 + $0xb8] sm:$0x3] %vm1419_vm8, %v2995_v24  ;;  %1444 = vst.msk [vmem:[#allocation3 + $0xc8] sm:$0x3] %vm1419_vm8, %v2995_v24 }
 0x11a   :  { %1443 = vst.msk [vmem:[#allocation3 + $0xc0] sm:$0xff] %vm1417_vm7, %v2995_v24  ;;  %1445 = vst.msk [vmem:[#allocation3 + $0xd0] sm:$0xff] %vm1417_vm7, %v2995_v24 }
 0x11b   :  { %1446 = vst.msk [vmem:[#allocation3 + $0xd8] sm:$0x3] %vm1419_vm8, %v2995_v24  ;;  %1448 = vst.msk [vmem:[#allocation3 + $0xe8] sm:$0x3] %vm1419_vm8, %v2995_v24 }
 0x11c   :  { %1447 = vst.msk [vmem:[#allocation3 + $0xe0] sm:$0xff] %vm1417_vm7, %v2995_v24  ;;  %1449 = vst.msk [vmem:[#allocation3 + $0xf0] sm:$0xff] %vm1417_vm7, %v2995_v24 }
 0x11d   :  { %1450 = vst.msk [vmem:[#allocation3 + $0xf8] sm:$0x3] %vm1419_vm8, %v2995_v24  ;;  %1452 = vst.msk [vmem:[#allocation3 + $0x108] sm:$0x3] %vm1419_vm8, %v2995_v24 }
 0x11e   :  { %1451 = vst.msk [vmem:[#allocation3 + $0x100] sm:$0xff] %vm1417_vm7, %v2995_v24  ;;  %1453 = vst.msk [vmem:[#allocation3 + $0x110] sm:$0xff] %vm1417_vm7, %v2995_v24 }
 0x11f   :  { %1454 = vst.msk [vmem:[#allocation3 + $0x118] sm:$0x3] %vm1419_vm8, %v2995_v24  ;;  %1456 = vst.msk [vmem:[#allocation3 + $0x128] sm:$0x3] %vm1419_vm8, %v2995_v24 }
 0x120   :  { %1455 = vst.msk [vmem:[#allocation3 + $0x120] sm:$0xff] %vm1417_vm7, %v2995_v24 }
 0x121   :  { %2032 = vst.msk [vmem:[#allocation4 + $0x38] sm:$0x3f] %vm2024_vm9, %v2995_v24  ;;  %2033 = vst.msk [vmem:[#allocation4 + $0x40] sm:$0x3f] %vm2024_vm9, %v2995_v24 }
 0x122   :  { %2025 = vst.msk [vmem:[#allocation4] sm:$0x3f] %vm2024_vm9, %v2995_v24  ;;  %2026 = vst.msk [vmem:[#allocation4 + $0x8] sm:$0x3f] %vm2024_vm9, %v2995_v24 }
 0x123   :  { %2027 = vst.msk [vmem:[#allocation4 + $0x10] sm:$0x3f] %vm2024_vm9, %v2995_v24  ;;  %2028 = vst.msk [vmem:[#allocation4 + $0x18] sm:$0x3f] %vm2024_vm9, %v2995_v24 }
 0x124   :  { %2029 = vst.msk [vmem:[#allocation4 + $0x20] sm:$0x3f] %vm2024_vm9, %v2995_v24  ;;  %2031 = vst.msk [vmem:[#allocation4 + $0x30] sm:$0x3f] %vm2024_vm9, %v2995_v24 }
 0x125   :  { %2034 = vst.msk [vmem:[#allocation4 + $0x48] sm:$0x3f] %vm2024_vm9, %v2995_v24  ;;  %2035 = vst.msk [vmem:[#allocation4 + $0x50] sm:$0x3f] %vm2024_vm9, %v2995_v24 }
 0x1d1   :  { %v2839_v29 = vpop.f32.mrb[0].mxu1 }
 0x1d2   :  { %v411_v31 = vadd.f32 %v2839_v29, %v3299_v28  ;;  %v402_v32 = vpop.f32.mrb[1].mxu1 }
 0x1d3   :  { %v403_v36 = vadd.f32 %v3299_v28, %v402_v32  ;;  %v2840_v37 = vpop.f32.mrb[2].mxu1 }
 0x1d4   :  { %v467_v40 = vmax.f32 %v411_v31, 0.0  ;;  %v414_v41 = vadd.f32 %v2840_v37, %v3299_v28  ;;  %v405_v42 = vpop.f32.mrb[3].mxu1 }
 0x1d5   :  { %v465_v43 = vmax.f32 %v403_v36, 0.0  ;;  %v406_v44 = vadd.f32 %v3299_v28, %v405_v42 }
 0x1d6   :  { %v483_v47 = vmin.f32 %v467_v40, 6.0  ;;  %v468_v48 = vmax.f32 %v414_v41, 0.0 }
 0x1d7   :  { %v481_v53 = vmin.f32 %v465_v43, 6.0  ;;  %v466_v54 = vmax.f32 %v406_v44, 0.0 }
 0x1d8   :  { %542 = vst.msk [vmem:[#allocation2 + $0x31] sm:$0xff] %vm497_vm4, %v483_v47  ;;  %v484_v56 = vmin.f32 %v468_v48, 6.0 }
 0x1d9   :  { %540 = vst.msk [vmem:[#allocation2 + $0x11] sm:$0xff] %vm497_vm4, %v481_v53  ;;  %v482_v57 = vmin.f32 %v466_v54, 6.0  ;;  %v2843_v58 = vpop.f32.mrb[4].mxu1 }
 0x1da   :  { %543 = vst.msk [vmem:[#allocation2 + $0x41] sm:$0xff] %vm497_vm4, %v484_v56  ;;  %v427_v60 = vadd.f32 %v2843_v58, %v3299_v28  ;;  %v418_v61 = vpop.f32.mrb[5].mxu1 }
 0x1db   :  { %541 = vst.msk [vmem:[#allocation2 + $0x21] sm:$0xff] %vm497_vm4, %v482_v57  ;;  %v419_v1 = vadd.f32 %v3299_v28, %v418_v61  ;;  %v2844_v2 = vpop.f32.mrb[6].mxu1 }
 0x1dc   :  { %v471_v3 = vmax.f32 %v427_v60, 0.0  ;;  %v430_v4 = vadd.f32 %v2844_v2, %v3299_v28  ;;  %v421_v5 = vpop.f32.mrb[7].mxu1 }
 0x1dd   :  { %v469_v9 = vmax.f32 %v419_v1, 0.0  ;;  %v422_v10 = vadd.f32 %v3299_v28, %v421_v5 }
 0x1de   :  { %v487_v15 = vmin.f32 %v471_v3, 6.0  ;;  %v472_v16 = vmax.f32 %v430_v4, 0.0 }
 0x1df   :  { %v485_v21 = vmin.f32 %v469_v9, 6.0  ;;  %v470_v22 = vmax.f32 %v422_v10, 0.0  ;;  %v3366_v23 = vld [vmem:[#allocation2 + $0x30] sm:$0xff] }
 0x1e0   :  { %v3368_v14 = vld [vmem:[#allocation2 + $0x31] sm:$0xff]  ;;  %546 = vst.msk [vmem:[#allocation2 + $0x71] sm:$0xff] %vm497_vm4, %v487_v15  ;;  %v488_v29 = vmin.f32 %v472_v16, 6.0  ;;  %v3381_v34 = vmul.f32 %v3336_v6, %v3366_v23 }
 0x1e1   :  { %v3370_v25 = vld [vmem:[#allocation2 + $0x32] sm:$0xff]  ;;  %v3385_v36 = vmul.f32 %v3347_v12, %v3368_v14  ;;  %544 = vst.msk [vmem:[#allocation2 + $0x51] sm:$0xff] %vm497_vm4, %v485_v21  ;;  %v486_v38 = vmin.f32 %v470_v22, 6.0  ;;  %v2847_v39 = vpop.f32.mrb[8].mxu1  ;;  %v580_v21 = vmul.f32 %v3305_v33, %v3366_v23 }
 0x1e2   :  { %v557_v30 = vld [vmem:[#allocation2 + $0x10] sm:$0xff]  ;;  %v3389_v37 = vmul.f32 %v3352_v13, %v3370_v25  ;;  %547 = vst.msk [vmem:[#allocation2 + $0x81] sm:$0xff] %vm497_vm4, %v488_v29  ;;  %v443_v43 = vadd.f32 %v2847_v39, %v3299_v28  ;;  %v434_v44 = vpop.f32.mrb[9].mxu1  ;;  %v716_v45 = vld [vmem:[#allocation2 + $0x20] sm:$0xff] }
 0x1e3   :  { %v610_v31 = vld [vmem:[#allocation2 + $0x11] sm:$0xff]  ;;  %v578_v40 = vmul.f32 %v3305_v33, %v557_v30  ;;  %v736_v46 = vmul.f32 %v3342_v11, %v557_v30  ;;  %v769_v47 = vld [vmem:[#allocation2 + $0x21] sm:$0xff]  ;;  %545 = vst.msk [vmem:[#allocation2 + $0x61] sm:$0xff] %vm497_vm4, %v486_v38  ;;  %v435_v52 = vadd.f32 %v3299_v28, %v434_v44  ;;  %v2848_v53 = vpop.f32.mrb[10].mxu1  ;;  %v737_v55 = vmul.f32 %v3342_v11, %v716_v45 }
 0x1e4   :  { %v663_v32 = vld [vmem:[#allocation2 + $0x12] sm:$0xff]  ;;  %v631_v41 = vmul.f32 %v3310_v35, %v610_v31  ;;  %v789_v48 = vmul.f32 %v3357_v18, %v610_v31  ;;  %v822_v49 = vld [vmem:[#allocation2 + $0x22] sm:$0xff]  ;;  %v790_v56 = vmul.f32 %v3357_v18, %v769_v47  ;;  %v475_v57 = vmax.f32 %v443_v43, 0.0  ;;  %v437_v59 = vpop.f32.mrb[11].mxu1 }
 0x1e5   :  { %v684_v42 = vmul.f32 %v3320_v50, %v663_v32  ;;  %v842_v51 = vmul.f32 %v3362_v19, %v663_v32  ;;  %v446_v58 = vadd.f32 %v2848_v53, %v3299_v28  ;;  %v752_v60 = vadd.f32 %v736_v46, %v699_v17 }
 0x1e6   :  { %v647_v54 = vadd.f32 %v631_v41, %v578_v40  ;;  %v843_v61 = vmul.f32 %v3362_v19, %v822_v49  ;;  %v473_v62 = vmax.f32 %v435_v52, 0.0  ;;  %v438_v63 = vadd.f32 %v3299_v28, %v437_v59 }
 0x1e7   :  { %v896_v1 = vmul.f32 %v3336_v6, %v716_v45  ;;  %v491_v2 = vmin.f32 %v475_v57, 6.0  ;;  %v476_v3 = vmax.f32 %v446_v58, 0.0  ;;  %v805_v4 = vadd.f32 %v789_v48, %v752_v60  ;;  %v3433_v58 = vld [vmem:[%s4040_s6] ss:$0 sm:$0xff] }
 0x1e8   :  { %v700_v0 = vadd.f32 %v684_v42, %v647_v54  ;;  %v949_v5 = vmul.f32 %v3347_v12, %v769_v47  ;;  %v489_v7 = vmin.f32 %v473_v62, 6.0  ;;  %v474_v8 = vmax.f32 %v438_v63, 0.0  ;;  %v718_v54 = vld [vmem:[#allocation2 + $0x40] sm:$0xff] }
 0x1e9   :  { %v1002_v10 = vmul.f32 %v3352_v13, %v822_v49  ;;  %550 = vst.msk [vmem:[#allocation2 + $0xd1] sm:$0xff] %vm497_vm4, %v491_v2  ;;  %v492_v15 = vmin.f32 %v476_v3, 6.0  ;;  %v858_v16 = vadd.f32 %v842_v51, %v805_v4  ;;  %v579_v17 = vmul.f32 %v3305_v33, %v716_v45  ;;  %v2851_v29 = vpop.f32.mrb[12].mxu1 }
 0x1ea   :  { %v753_v9 = vadd.f32 %v737_v55, %v700_v0  ;;  %548 = vst.msk [vmem:[#allocation2 + $0xb1] sm:$0xff] %vm497_vm4, %v489_v7  ;;  %v490_v22 = vmin.f32 %v474_v8, 6.0  ;;  %v632_v31 = vmul.f32 %v3310_v35, %v769_v47  ;;  %v633_v32 = vmul.f32 %v3310_v35, %v3368_v14  ;;  %v450_v39 = vpop.f32.mrb[13].mxu1  ;;  %v771_v0 = vld [vmem:[#allocation2 + $0x41] sm:$0xff] }
 0x1eb   :  { %551 = vst.msk [vmem:[#allocation2 + $0xe1] sm:$0xff] %vm497_vm4, %v492_v15  ;;  %v459_v38 = vadd.f32 %v2851_v29, %v3299_v28  ;;  %v912_v40 = vadd.f32 %v896_v1, %v858_v16  ;;  %v685_v41 = vmul.f32 %v3320_v50, %v822_v49  ;;  %v686_v42 = vmul.f32 %v3320_v50, %v3370_v25  ;;  %v2852_v44 = vpop.f32.mrb[14].mxu1  ;;  %v824_v8 = vld [vmem:[#allocation2 + $0x42] sm:$0xff]  ;;  %v931_v29 = vld [vmem:[#allocation2 + $0x51] sm:$0xff] }
 0x1ec   :  { %v806_v30 = vadd.f32 %v790_v56, %v753_v9  ;;  %549 = vst.msk [vmem:[#allocation2 + $0xc1] sm:$0xff] %vm497_vm4, %v490_v22  ;;  %v451_v43 = vadd.f32 %v3299_v28, %v450_v39  ;;  %v648_v46 = vadd.f32 %v632_v31, %v579_v17  ;;  %v649_v47 = vadd.f32 %v633_v32, %v580_v21  ;;  %v453_v52 = vpop.f32.mrb[15].mxu1  ;;  %v878_v9 = vld [vmem:[#allocation2 + $0x50] sm:$0xff] }
 0x1ed   :  { %v479_v48 = vmax.f32 %v459_v38, 0.0  ;;  %v462_v51 = vadd.f32 %v2852_v44, %v3299_v28  ;;  %v965_v53 = vadd.f32 %v949_v5, %v912_v40  ;;  %v738_v49 = vmul.f32 %v3342_v11, %v3366_v23 }
 0x1ee   :  { %v859_v45 = vadd.f32 %v843_v61, %v806_v30  ;;  %v477_v55 = vmax.f32 %v451_v43, 0.0  ;;  %v454_v56 = vadd.f32 %v3299_v28, %v453_v52  ;;  %v701_v59 = vadd.f32 %v685_v41, %v648_v46  ;;  %v988_v28 = vld [vmem:[#allocation2 + $0x92] sm:$0xff] }
 0x1ef   :  { %v495_v60 = vmin.f32 %v479_v48, 6.0  ;;  %v480_v61 = vmax.f32 %v462_v51, 0.0  ;;  %v1018_v62 = vadd.f32 %v1002_v10, %v965_v53  ;;  %v702_v63 = vadd.f32 %v686_v42, %v649_v47 }
 0x1f0   :  { %v913_v57 = vadd.f32 %v3381_v34, %v859_v45  ;;  %v493_v1 = vmin.f32 %v477_v55, 6.0  ;;  %v478_v2 = vmax.f32 %v454_v56, 0.0  ;;  %v739_v3 = vmul.f32 %v3342_v11, %v718_v54  ;;  %v720_v56 = vld [vmem:[#allocation2 + $0x60] sm:$0xff] }
 0x1f1   :  { %554 = vst.msk [vmem:[#allocation2 + $0x111] sm:$0xff] %vm497_vm4, %v495_v60  ;;  %v496_v34 = vmin.f32 %v480_v61, 6.0  ;;  %v1041_v4 = vadd.f32 %v3433_v58, %v1018_v62  ;;  %v754_v5 = vadd.f32 %v738_v49, %v701_v59  ;;  %v791_v7 = vmul.f32 %v3357_v18, %v3368_v14  ;;  %v773_v62 = vld [vmem:[#allocation2 + $0x61] sm:$0xff] }
 0x1f2   :  { %v966_v23 = vadd.f32 %v3385_v36, %v913_v57  ;;  %552 = vst.msk [vmem:[#allocation2 + $0xf1] sm:$0xff] %vm497_vm4, %v493_v1  ;;  %v494_v10 = vmin.f32 %v478_v2, 6.0  ;;  %v755_v36 = vadd.f32 %v739_v3, %v702_v63  ;;  %v792_v16 = vmul.f32 %v3357_v18, %v771_v0 }
 0x1f3   :  { %555 = vst.msk [vmem:[#allocation2 + $0x121] sm:$0xff] %vm497_vm4, %v496_v34  ;;  %v1057_v17 = vmax.f32 %v1041_v4, 0.0  ;;  %v807_v21 = vadd.f32 %v791_v7, %v754_v5  ;;  %v844_v22 = vmul.f32 %v3362_v19, %v3370_v25  ;;  %v3448_v14 = vmul.f32 %v3352_v13, %v988_v28  ;;  %v984_v25 = vld [vmem:[#allocation2 + $0x52] sm:$0xff] }
 0x1f4   :  { %v1019_v15 = vadd.f32 %v3389_v37, %v966_v23  ;;  %553 = vst.msk [vmem:[#allocation2 + $0x101] sm:$0xff] %vm497_vm4, %v494_v10  ;;  %v808_v31 = vadd.f32 %v792_v16, %v755_v36  ;;  %v845_v37 = vmul.f32 %v3362_v19, %v824_v8  ;;  %v899_v32 = vmul.f32 %v3336_v6, %v878_v9  ;;  %v880_v4 = vld [vmem:[#allocation2 + $0x70] sm:$0xff] }
 0x1f5   :  { %v1073_v38 = vmin.f32 %v1057_v17, 6.0  ;;  %v860_v39 = vadd.f32 %v844_v22, %v807_v21  ;;  %v898_v40 = vmul.f32 %v3336_v6, %v718_v54  ;;  %v951_v41 = vmul.f32 %v3347_v12, %v771_v0  ;;  %v933_v10 = vld [vmem:[#allocation2 + $0x71] sm:$0xff] }
 0x1f6   :  { %v1042_v30 = vadd.f32 %v3433_v58, %v1019_v15  ;;  %v861_v43 = vadd.f32 %v845_v37, %v808_v31  ;;  %v952_v44 = vmul.f32 %v3347_v12, %v931_v29  ;;  %v1004_v45 = vmul.f32 %v3352_v13, %v824_v8 }
 0x1f7   :  { %v914_v46 = vadd.f32 %v898_v40, %v860_v39  ;;  %v581_v47 = vmul.f32 %v3305_v33, %v718_v54  ;;  %v582_v48 = vmul.f32 %v3305_v33, %v878_v9  ;;  %v634_v51 = vmul.f32 %v3310_v35, %v771_v0  ;;  %v826_v0 = vld [vmem:[#allocation2 + $0x62] sm:$0xff] }
 0x1f8   :  { %v1058_v42 = vmax.f32 %v1042_v30, 0.0  ;;  %v915_v53 = vadd.f32 %v899_v32, %v861_v43  ;;  %v1005_v49 = vmul.f32 %v3352_v13, %v984_v25  ;;  %v635_v55 = vmul.f32 %v3310_v35, %v931_v29 }
 0x1f9   :  { %v967_v57 = vadd.f32 %v951_v41, %v914_v46  ;;  %v650_v59 = vadd.f32 %v634_v51, %v581_v47  ;;  %v687_v60 = vmul.f32 %v3320_v50, %v824_v8  ;;  %v740_v61 = vmul.f32 %v3342_v11, %v878_v9  ;;  %v722_v47 = vld [vmem:[#allocation2 + $0x80] sm:$0xff] }
 0x1fa   :  { %v1074_v52 = vmin.f32 %v1058_v42, 6.0  ;;  %v968_v54 = vadd.f32 %v952_v44, %v915_v53  ;;  %v651_v1 = vadd.f32 %v635_v55, %v582_v48  ;;  %v688_v2 = vmul.f32 %v3320_v50, %v984_v25 }
 0x1fb   :  { %v1020_v23 = vadd.f32 %v1004_v45, %v967_v57  ;;  %v703_v3 = vadd.f32 %v687_v60, %v650_v59  ;;  %v741_v28 = vmul.f32 %v3342_v11, %v720_v56  ;;  %v793_v34 = vmul.f32 %v3357_v18, %v931_v29  ;;  %v775_v59 = vld [vmem:[#allocation2 + $0x81] sm:$0xff] }
 0x1fc   :  { %v1089_v63 = vpack.c.bf16 %v1074_v52, %v1073_v38  ;;  %v1021_v5 = vadd.f32 %v1005_v49, %v968_v54  ;;  %v704_v7 = vadd.f32 %v688_v2, %v651_v1  ;;  %v794_v8 = vmul.f32 %v3357_v18, %v773_v62  ;;  %v986_v38 = vld [vmem:[#allocation2 + $0x72] sm:$0xff]  ;;  %v828_v60 = vld [vmem:[#allocation2 + $0x82] sm:$0xff] }
 0x1fd   :  { %v846_v9 = vmul.f32 %v3362_v19, %v984_v25  ;;  %v1043_v15 = vadd.f32 %v3433_v58, %v1020_v23  ;;  %v756_v36 = vadd.f32 %v740_v61, %v703_v3  ;;  %v847_v16 = vmul.f32 %v3362_v19, %v826_v0 }
 0x1fe   :  { %2857 = vmatprep.mubr.msk.bf16.mxu1 %vm497_vm4, %v1089_v63  ;;  %v900_v17 = vmul.f32 %v3336_v6, %v720_v56  ;;  %v1044_v21 = vadd.f32 %v3433_v58, %v1021_v5  ;;  %v757_v22 = vadd.f32 %v741_v28, %v704_v7  ;;  %v901_v29 = vmul.f32 %v3336_v6, %v880_v4  ;;  %v565_v28 = vld [vmem:[#allocation2 + $0xb0] sm:$0xff] }
 0x1ff   :  { %v953_v30 = vmul.f32 %v3347_v12, %v773_v62  ;;  %v1059_v31 = vmax.f32 %v1043_v15, 0.0  ;;  %v809_v37 = vadd.f32 %v793_v34, %v756_v36  ;;  %v954_v32 = vmul.f32 %v3347_v12, %v933_v10 }
 0x200   :  { %v1006_v39 = vmul.f32 %v3352_v13, %v826_v0  ;;  %v1060_v40 = vmax.f32 %v1044_v21, 0.0  ;;  %v810_v41 = vadd.f32 %v794_v8, %v757_v22  ;;  %v583_v25 = vmul.f32 %v3305_v33, %v720_v56 }
 0x201   :  { %v584_v42 = vmul.f32 %v3305_v33, %v880_v4  ;;  %v1075_v43 = vmin.f32 %v1059_v31, 6.0  ;;  %v862_v44 = vadd.f32 %v846_v9, %v809_v37  ;;  %v636_v45 = vmul.f32 %v3310_v35, %v773_v62 }
 0x202   :  { %v637_v46 = vmul.f32 %v3310_v35, %v933_v10  ;;  %v1076_v48 = vmin.f32 %v1060_v40, 6.0  ;;  %v863_v51 = vadd.f32 %v847_v16, %v810_v41  ;;  %v1007_v52 = vmul.f32 %v3352_v13, %v986_v38  ;;  %v671_v16 = vld [vmem:[#allocation2 + $0xb2] sm:$0xff] }
 0x203   :  { %v689_v53 = vmul.f32 %v3320_v50, %v826_v0  ;;  %v916_v49 = vadd.f32 %v900_v17, %v862_v44  ;;  %v652_v55 = vadd.f32 %v636_v45, %v583_v25  ;;  %v690_v56 = vmul.f32 %v3320_v50, %v986_v38  ;;  %v618_v0 = vld [vmem:[#allocation2 + $0xb1] sm:$0xff]  ;;  %v777_v25 = vld [vmem:[#allocation2 + $0xc1] sm:$0xff] }
 0x204   :  { %v653_v57 = vadd.f32 %v637_v46, %v584_v42  ;;  %v1090_v61 = vpack.c.bf16 %v1076_v48, %v1075_v43  ;;  %v917_v63 = vadd.f32 %v901_v29, %v863_v51  ;;  %v742_v62 = vmul.f32 %v3342_v11, %v880_v4  ;;  %v724_v29 = vld [vmem:[#allocation2 + $0xc0] sm:$0xff] }
 0x205   :  { %v743_v54 = vmul.f32 %v3342_v11, %v722_v47  ;;  %v969_v1 = vadd.f32 %v953_v30, %v916_v49  ;;  %v705_v2 = vadd.f32 %v689_v53, %v652_v55  ;;  %v795_v3 = vmul.f32 %v3357_v18, %v933_v10 }
 0x206   :  { %v706_v23 = vadd.f32 %v690_v56, %v653_v57  ;;  %2858 = vmatmul.mubr.msk.bf16.vlgmr.msra.gmra.mrb[16].mxu1 %vm497_vm4, %v1090_v61  ;;  %v970_v34 = vadd.f32 %v954_v32, %v917_v63  ;;  %v796_v5 = vmul.f32 %v3357_v18, %v775_v59  ;;  %v848_v7 = vmul.f32 %v3362_v19, %v986_v38  ;;  %v884_v56 = vld [vmem:[#allocation2 + $0xd0] sm:$0xff] }
 0x207   :  { %v849_v8 = vmul.f32 %v3362_v19, %v828_v60  ;;  %v1022_v9 = vadd.f32 %v1006_v39, %v969_v1  ;;  %v758_v4 = vadd.f32 %v742_v62, %v705_v2  ;;  %v902_v36 = vmul.f32 %v3336_v6, %v722_v47  ;;  %v937_v62 = vld [vmem:[#allocation2 + $0xd1] sm:$0xff] }
 0x208   :  { %v759_v15 = vadd.f32 %v743_v54, %v706_v23  ;;  %v1023_v17 = vadd.f32 %v1007_v52, %v970_v34  ;;  %v955_v10 = vmul.f32 %v3347_v12, %v775_v59  ;;  %v586_v21 = vmul.f32 %v3305_v33, %v565_v28  ;;  %v830_v52 = vld [vmem:[#allocation2 + $0xc2] sm:$0xff] }
 0x209   :  { %v639_v22 = vmul.f32 %v3310_v35, %v618_v0  ;;  %v1045_v30 = vadd.f32 %v3433_v58, %v1022_v9  ;;  %v811_v31 = vadd.f32 %v795_v3, %v758_v4  ;;  %v1008_v32 = vmul.f32 %v3352_v13, %v828_v60 }
 0x20a   :  { %v812_v37 = vadd.f32 %v796_v5, %v759_v15  ;;  %v1046_v38 = vadd.f32 %v3433_v58, %v1023_v17  ;;  %v692_v40 = vmul.f32 %v3320_v50, %v671_v16  ;;  %v744_v41 = vmul.f32 %v3342_v11, %v565_v28 }
 0x20b   :  { %v655_v39 = vadd.f32 %v639_v22, %v586_v21  ;;  %v1061_v42 = vmax.f32 %v1045_v30, 0.0  ;;  %v864_v43 = vadd.f32 %v848_v7, %v811_v31  ;;  %v745_v45 = vmul.f32 %v3342_v11, %v724_v29 }
 0x20c   :  { %v865_v44 = vadd.f32 %v849_v8, %v812_v37  ;;  %v1062_v46 = vmax.f32 %v1046_v38, 0.0  ;;  %v760_v48 = vadd.f32 %v744_v41, %v3364_v20  ;;  %v797_v51 = vmul.f32 %v3357_v18, %v618_v0  ;;  %v990_v8 = vld [vmem:[#allocation2 + $0xd2] sm:$0xff] }
 0x20d   :  { %v708_v47 = vadd.f32 %v692_v40, %v655_v39  ;;  %v1077_v53 = vmin.f32 %v1061_v42, 6.0  ;;  %v918_v49 = vadd.f32 %v902_v36, %v864_v43  ;;  %v798_v57 = vmul.f32 %v3357_v18, %v777_v25 }
 0x20e   :  { %v919_v55 = vadd.f32 %v3373_v26, %v865_v44  ;;  %v1078_v59 = vmin.f32 %v1062_v46, 6.0  ;;  %v813_v61 = vadd.f32 %v797_v51, %v760_v48  ;;  %v850_v63 = vmul.f32 %v3362_v19, %v671_v16  ;;  %v779_v46 = vld [vmem:[#allocation2 + $0xe1] sm:$0xff] }
 0x20f   :  { %v761_v60 = vadd.f32 %v745_v45, %v708_v47  ;;  %v971_v54 = vadd.f32 %v955_v10, %v918_v49  ;;  %v851_v20 = vmul.f32 %v3362_v19, %v830_v52  ;;  %v904_v2 = vmul.f32 %v3336_v6, %v724_v29  ;;  %v832_v49 = vld [vmem:[#allocation2 + $0xe2] sm:$0xff] }
 0x210   :  { %v972_v1 = vadd.f32 %v3376_v27, %v919_v55  ;;  %v1091_v23 = vpack.c.bf16 %v1078_v59, %v1077_v53  ;;  %v866_v28 = vadd.f32 %v850_v63, %v813_v61  ;;  %v905_v26 = vmul.f32 %v3336_v6, %v884_v56  ;;  %v886_v59 = vld [vmem:[#allocation2 + $0xf0] sm:$0xff] }
 0x211   :  { %v814_v3 = vadd.f32 %v798_v57, %v761_v60  ;;  %v1024_v0 = vadd.f32 %v1008_v32, %v971_v54  ;;  %v957_v5 = vmul.f32 %v3347_v12, %v777_v25  ;;  %v958_v7 = vmul.f32 %v3347_v12, %v937_v62 }
 0x212   :  { %v1025_v34 = vadd.f32 %v3448_v14, %v972_v1  ;;  %2861 = vmatprep.mubr.msk.bf16.mxu1 %vm497_vm4, %v1091_v23  ;;  %v920_v9 = vadd.f32 %v904_v2, %v866_v28  ;;  %v1010_v4 = vmul.f32 %v3352_v13, %v830_v52  ;;  %v587_v15 = vmul.f32 %v3305_v33, %v724_v29  ;;  %v726_v29 = vld [vmem:[#allocation2 + $0xe0] sm:$0xff]  ;;  %v939_v28 = vld [vmem:[#allocation2 + $0xf1] sm:$0xff] }
 0x213   :  { %v867_v27 = vadd.f32 %v851_v20, %v814_v3  ;;  %v1047_v36 = vadd.f32 %v3433_v58, %v1024_v0  ;;  %v588_v17 = vmul.f32 %v3305_v33, %v884_v56  ;;  %v640_v14 = vmul.f32 %v3310_v35, %v777_v25 }
 0x214   :  { %v1048_v16 = vadd.f32 %v3433_v58, %v1025_v34  ;;  %v973_v21 = vadd.f32 %v957_v5, %v920_v9  ;;  %v1011_v22 = vmul.f32 %v3352_v13, %v990_v8  ;;  %v641_v30 = vmul.f32 %v3310_v35, %v937_v62  ;;  %v992_v9 = vld [vmem:[#allocation2 + $0xf2] sm:$0xff] }
 0x215   :  { %v921_v10 = vadd.f32 %v905_v26, %v867_v27  ;;  %v1063_v31 = vmax.f32 %v1047_v36, 0.0  ;;  %v656_v32 = vadd.f32 %v640_v14, %v587_v15  ;;  %v693_v38 = vmul.f32 %v3320_v50, %v830_v52  ;;  %v728_v14 = vld [vmem:[#allocation2 + $0x100] sm:$0xff] }
 0x216   :  { %v1064_v37 = vmax.f32 %v1048_v16, 0.0  ;;  %v1026_v40 = vadd.f32 %v1010_v4, %v973_v21  ;;  %v657_v41 = vadd.f32 %v641_v30, %v588_v17  ;;  %v694_v42 = vmul.f32 %v3320_v50, %v990_v8 }
 0x217   :  { %v974_v39 = vadd.f32 %v958_v7, %v921_v10  ;;  %v1079_v43 = vmin.f32 %v1063_v31, 6.0  ;;  %v709_v25 = vadd.f32 %v693_v38, %v656_v32  ;;  %v746_v45 = vmul.f32 %v3342_v11, %v884_v56  ;;  %v781_v31 = vld [vmem:[#allocation2 + $0x101] sm:$0xff] }
 0x218   :  { %v1080_v44 = vmin.f32 %v1064_v37, 6.0  ;;  %v1049_v48 = vadd.f32 %v3433_v58, %v1026_v40  ;;  %v710_v51 = vadd.f32 %v694_v42, %v657_v41  ;;  %v747_v53 = vmul.f32 %v3342_v11, %v726_v29 }
 0x219   :  { %v1027_v47 = vadd.f32 %v1011_v22, %v974_v39  ;;  %v762_v55 = vadd.f32 %v746_v45, %v709_v25  ;;  %v799_v57 = vmul.f32 %v3357_v18, %v937_v62  ;;  %v800_v54 = vmul.f32 %v3357_v18, %v779_v46  ;;  %v834_v39 = vld [vmem:[#allocation2 + $0x102] sm:$0xff] }
 0x21a   :  { %v1092_v52 = vpack.c.bf16 %v1080_v44, %v1079_v43  ;;  %v1065_v61 = vmax.f32 %v1049_v48, 0.0  ;;  %v763_v63 = vadd.f32 %v747_v53, %v710_v51  ;;  %v852_v1 = vmul.f32 %v3362_v19, %v990_v8  ;;  %v888_v44 = vld [vmem:[#allocation2 + $0x110] sm:$0xff] }
 0x21b   :  { %v1050_v60 = vadd.f32 %v3433_v58, %v1027_v47  ;;  %v815_v56 = vadd.f32 %v799_v57, %v762_v55  ;;  %v853_v20 = vmul.f32 %v3362_v19, %v832_v49  ;;  %v906_v3 = vmul.f32 %v3336_v6, %v726_v29 }
 0x21c   :  { %2862 = vmatmul.mubr.msk.bf16.gmra.mrb[20].mxu1 %vm497_vm4, %v1092_v52  ;;  %v816_v23 = vadd.f32 %v800_v54, %v763_v63  ;;  %v907_v62 = vmul.f32 %v3336_v6, %v886_v59  ;;  %v1081_v26 = vmin.f32 %v1065_v61, 6.0  ;;  %v959_v34 = vmul.f32 %v3347_v12, %v779_v46 }
 0x21d   :  { %v1066_v2 = vmax.f32 %v1050_v60, 0.0  ;;  %v868_v0 = vadd.f32 %v852_v1, %v815_v56  ;;  %v589_v5 = vmul.f32 %v3305_v33, %v726_v29  ;;  %v590_v8 = vmul.f32 %v3305_v33, %v886_v59  ;;  %v941_v60 = vld [vmem:[#allocation2 + $0x111] sm:$0xff] }
 0x21e   :  { %v869_v27 = vadd.f32 %v853_v20, %v816_v23  ;;  %v642_v4 = vmul.f32 %v3310_v35, %v779_v46  ;;  %v960_v36 = vmul.f32 %v3347_v12, %v939_v28  ;;  %v643_v16 = vmul.f32 %v3310_v35, %v939_v28 }
 0x21f   :  { %v1082_v7 = vmin.f32 %v1066_v2, 6.0  ;;  %v922_v15 = vadd.f32 %v906_v3, %v868_v0  ;;  %v695_v17 = vmul.f32 %v3320_v50, %v832_v49  ;;  %v748_v30 = vmul.f32 %v3342_v11, %v886_v59  ;;  %v994_v2 = vld [vmem:[#allocation2 + $0x112] sm:$0xff] }
 0x220   :  { %v923_v21 = vadd.f32 %v907_v62, %v869_v27  ;;  %v658_v22 = vadd.f32 %v642_v4, %v589_v5  ;;  %v1012_v32 = vmul.f32 %v3352_v13, %v832_v49  ;;  %v659_v38 = vadd.f32 %v643_v16, %v590_v8 }
 0x221   :  { %v1093_v10 = vpack.c.bf16 %v1082_v7, %v1081_v26  ;;  %v975_v37 = vadd.f32 %v959_v34, %v922_v15  ;;  %v696_v29 = vmul.f32 %v3320_v50, %v992_v9  ;;  %v1013_v41 = vmul.f32 %v3352_v13, %v992_v9 }
 0x222   :  { %v976_v40 = vadd.f32 %v960_v36, %v923_v21  ;;  %v711_v42 = vadd.f32 %v695_v17, %v658_v22  ;;  %v749_v43 = vmul.f32 %v3342_v11, %v728_v14  ;;  %v801_v46 = vmul.f32 %v3357_v18, %v939_v28 }
 0x223   :  { %2865 = vmatprep.mubr.msk.bf16.mxu1 %vm497_vm4, %v1093_v10  ;;  %v1028_v25 = vadd.f32 %v1012_v32, %v975_v37  ;;  %v712_v45 = vadd.f32 %v696_v29, %v659_v38  ;;  %v802_v47 = vmul.f32 %v3357_v18, %v781_v31  ;;  %v854_v53 = vmul.f32 %v3362_v19, %v992_v9  ;;  %v730_v9 = vld [vmem:[#allocation2 + $0x120] sm:$0xff] }
 0x224   :  { %v1029_v48 = vadd.f32 %v1013_v41, %v976_v40  ;;  %v764_v51 = vadd.f32 %v748_v30, %v711_v42  ;;  %v855_v49 = vmul.f32 %v3362_v19, %v834_v39  ;;  %v908_v57 = vmul.f32 %v3336_v6, %v728_v14  ;;  %v783_v10 = vld [vmem:[#allocation2 + $0x121] sm:$0xff] }
 0x225   :  { %v1051_v52 = vadd.f32 %v3433_v58, %v1028_v25  ;;  %v765_v55 = vadd.f32 %v749_v43, %v712_v45  ;;  %v909_v59 = vmul.f32 %v3336_v6, %v888_v44  ;;  %v961_v54 = vmul.f32 %v3347_v12, %v781_v31  ;;  %v836_v29 = vld [vmem:[#allocation2 + $0x122] sm:$0xff]  ;;  %v943_v25 = vld [vmem:[#allocation2 + $0x131] sm:$0xff] }
 0x226   :  { %v1052_v61 = vadd.f32 %v3433_v58, %v1029_v48  ;;  %v817_v63 = vadd.f32 %v801_v46, %v764_v51  ;;  %v591_v56 = vmul.f32 %v3305_v33, %v728_v14  ;;  %v592_v23 = vmul.f32 %v3305_v33, %v888_v44 }
 0x227   :  { %v1067_v1 = vmax.f32 %v1051_v52, 0.0  ;;  %v818_v20 = vadd.f32 %v802_v47, %v765_v55  ;;  %v644_v3 = vmul.f32 %v3310_v35, %v781_v31  ;;  %v962_v26 = vmul.f32 %v3347_v12, %v941_v60 }
 0x228   :  { %v1068_v62 = vmax.f32 %v1052_v61, 0.0  ;;  %v870_v28 = vadd.f32 %v854_v53, %v817_v63  ;;  %v645_v0 = vmul.f32 %v3310_v35, %v941_v60  ;;  %v697_v27 = vmul.f32 %v3320_v50, %v834_v39 }
 0x229   :  { %v1083_v34 = vmin.f32 %v1067_v1, 6.0  ;;  %v871_v5 = vadd.f32 %v855_v49, %v818_v20  ;;  %v660_v7 = vadd.f32 %v644_v3, %v591_v56  ;;  %v698_v36 = vmul.f32 %v3320_v50, %v994_v2  ;;  %v890_v50 = vld [vmem:[#allocation2 + $0x130] sm:$0xff] }
 0x22a   :  { %v1084_v8 = vmin.f32 %v1068_v62, 6.0  ;;  %v924_v4 = vadd.f32 %v908_v57, %v870_v28  ;;  %v661_v15 = vadd.f32 %v645_v0, %v592_v23  ;;  %v1014_v16 = vmul.f32 %v3352_v13, %v834_v39  ;;  %v996_v49 = vld [vmem:[#allocation2 + $0x132] sm:$0xff] }
 0x22b   :  { %v925_v33 = vadd.f32 %v909_v59, %v871_v5  ;;  %v713_v17 = vadd.f32 %v697_v27, %v660_v7  ;;  %v750_v14 = vmul.f32 %v3342_v11, %v888_v44  ;;  %v751_v30 = vmul.f32 %v3342_v11, %v730_v9 }
 0x22c   :  { %v1094_v21 = vpack.c.bf16 %v1084_v8, %v1083_v34  ;;  %v977_v35 = vadd.f32 %v961_v54, %v924_v4  ;;  %v714_v22 = vadd.f32 %v698_v36, %v661_v15  ;;  %v1015_v37 = vmul.f32 %v3352_v13, %v994_v2 }
 0x22d   :  { %v978_v31 = vadd.f32 %v962_v26, %v925_v33  ;;  %v766_v32 = vadd.f32 %v750_v14, %v713_v17  ;;  %v803_v38 = vmul.f32 %v3357_v18, %v941_v60  ;;  %v804_v41 = vmul.f32 %v3357_v18, %v783_v10 }
 0x22e   :  { %2866 = vmatmul.mubr.msk.bf16.gmra.mrb[24].mxu1 %vm497_vm4, %v1094_v21  ;;  %v1030_v39 = vadd.f32 %v1014_v16, %v977_v35  ;;  %v767_v40 = vadd.f32 %v751_v30, %v714_v22  ;;  %v856_v44 = vmul.f32 %v3362_v19, %v994_v2  ;;  %v857_v46 = vmul.f32 %v3362_v19, %v836_v29 }
 0x22f   :  { %v1031_v42 = vadd.f32 %v1015_v37, %v978_v31  ;;  %v819_v43 = vadd.f32 %v803_v38, %v766_v32  ;;  %v911_v47 = vmul.f32 %v3336_v6, %v890_v50  ;;  %v910_v53 = vmul.f32 %v3336_v6, %v730_v9 }
 0x230   :  { %v1053_v11 = vadd.f32 %v3433_v58, %v1030_v39  ;;  %v820_v45 = vadd.f32 %v804_v41, %v767_v40  ;;  %v964_v55 = vmul.f32 %v3347_v12, %v943_v25  ;;  %v963_v60 = vmul.f32 %v3347_v12, %v783_v10 }
 0x231   :  { %v1054_v48 = vadd.f32 %v3433_v58, %v1031_v42  ;;  %v872_v51 = vadd.f32 %v856_v44, %v819_v43  ;;  %v1017_v63 = vmul.f32 %v3352_v13, %v996_v49  ;;  %v1016_v1 = vmul.f32 %v3352_v13, %v836_v29  ;;  %v2688_v13 = vld [vmem:[%s4041_s3] ss:$0 sm:$0xff] }
 0x232   :  { %v1069_v52 = vmax.f32 %v1053_v11, 0.0  ;;  %v873_v18 = vadd.f32 %v857_v46, %v820_v45 }
 0x233   :  { %v1070_v57 = vmax.f32 %v1054_v48, 0.0  ;;  %v926_v59 = vadd.f32 %v910_v53, %v872_v51 }
 0x234   :  { %v927_v61 = vadd.f32 %v911_v47, %v873_v18  ;;  %v1085_v19 = vmin.f32 %v1069_v52, 6.0  ;;  %v2958_v18 = vld [vmem:[%s4005_s13] sm:$0xff]  }
 0x235   :  { %v1086_v54 = vmin.f32 %v1070_v57, 6.0  ;;  %v979_v56 = vadd.f32 %v963_v60, %v926_v59  ;;  %2891 = vmatprep.subr.bf16.mxu0 %v2958_v18  ;;  %v2960_v57 = vld [vmem:[%s4005_s13 + $0x10] sm:$0xff]   ;;  %v3682_v59 = vld [vmem:[%s4002_s10] ss:$0 sm:$0xff] }
 0x236   :  { %v980_v20 = vadd.f32 %v964_v55, %v927_v61  ;;  %v2959_v55 = vld [vmem:[%s4005_s13 + $0x8] sm:$0xff]   ;;  %s2998_s13 = smov [#allocation5]  }
 0x237   :  { %v1095_v2 = vpack.c.bf16 %v1086_v54, %v1085_v19  ;;  %v1032_v6 = vadd.f32 %v1016_v1, %v979_v56  ;;  %s2573_s27 = sshll.u32 %s2998_s13, 4  ;;  %s2574_s27 = int_to_ptr.vmem [resolvable:$true] %s2573_s27 }
 0x238   :  { %v1033_v23 = vadd.f32 %v1017_v63, %v980_v20  ;;  %p2976_p1 = scmp.lt.s32.totalorder %s2574_s27, %s2574_s27 }
 0x239   :  { %2869 = vmatprep.mubr.msk.bf16.mxu1 %vm497_vm4, %v1095_v2  ;;  %v1055_v3 = vadd.f32 %v3433_v58, %v1032_v6 }
 0x23a   :  { %v1056_v62 = vadd.f32 %v3433_v58, %v1033_v23 }
 0x23b   :  { %v1071_v28 = vmax.f32 %v1055_v3, 0.0 }
 0x23c   :  { %v1072_v12 = vmax.f32 %v1056_v62, 0.0 }
 0x23d   :  { %v1087_v26 = vmin.f32 %v1071_v28, 6.0 }
 0x23e   :  { %v1088_v0 = vmin.f32 %v1072_v12, 6.0 }
 0x240   :  { %v1096_v34 = vpack.c.bf16 %v1088_v0, %v1087_v26  ;;  %v1476_v0 = vld [vmem:[#allocation3] ss:$2 sm:$0xf] }
 0x242   :  { %2870 = vmatmul.mubr.msk.bf16.gmra.mrb[28].mxu1 %vm497_vm4, %v1096_v34  ;;  %v3693_v34 = vld [vmem:[%s4003_s11] ss:$0 sm:$0xff] }
 0x243   :  { %2913 = vmatprep.mubr.msk.bf16.mxu1 %vm2996_vm10, %v2995_v24 }
 0x2d9   :  { %v2859_v5 = vpop.f32.mrb[16].mxu1 }
 0x2da   :  { %v1177_v7 = vpop.f32.mrb[17].mxu1  ;;  %v1186_v9 = vadd.f32 %v2859_v5, %v2688_v13  ;;  %v1513_v5 = vld [vmem:[#allocation3 + $0x1] ss:$2 sm:$0xf] }
 0x2db   :  { %v2860_v27 = vpop.f32.mrb[18].mxu1  ;;  %v1178_v15 = vadd.f32 %v2688_v13, %v1177_v7  ;;  %v1496_v7 = vmul.f32 %v3693_v34, %v1476_v0 }
 0x2dc   :  { %v1189_v8 = vadd.f32 %v2860_v27, %v2688_v13  ;;  %v1180_v4 = vpop.f32.mrb[19].mxu1 }
 0x2dd   :  { %v1181_v36 = vadd.f32 %v2688_v13, %v1180_v4 }
 0x2de   :  { %v1241_v58 = vpack.c.bf16 %v1189_v8, %v1186_v9  ;;  %v1550_v9 = vld [vmem:[#allocation3 + $0x2] ss:$2 sm:$0xf] }
 0x2df   :  { %v1240_v33 = vpack.c.bf16 %v1181_v36, %v1178_v15  ;;  %v3707_v8 = vld [vmem:[%s4003_s11 + $0x2] ss:$0 sm:$0xff] }
 0x2e0   :  { %v1570_v15 = vmul.f32 %v3707_v8, %v1550_v9 }
 0x2e1   :  { %2875 = vmatprep.mubr.msk.bf16.mxu0 %vm1263_vm6, %v1240_v33 }
 0x2e2   :  { %2876 = vmatmul.mubr.msk.bf16.vlgmr.msra.gmra.mrb[16].mxu0 %vm1263_vm6, %v1241_v58  ;;  %v3713_v58 = vld [vmem:[%s4003_s11 + $0x3] ss:$0 sm:$0xff] }
 0x2e3   :  { %2892 = vmatpush3.bf16.msra.mxu0 %v2958_v18 }
 0x2e4   :  { %2893 = vmatprep.subr.bf16.mxu0 %v2959_v55 }
 0x2e7   :  { %2894 = vmatpush3.bf16.msra.mxu0 %v2959_v55 }
 0x2e8   :  { %2895 = vmatprep.subr.bf16.mxu0 %v2960_v57 }
 0x2eb   :  { %2896 = vmatpush3.bf16.msra.mxu0 %v2960_v57 }
 0x2ef   :  { %v2863_v16 = vpop.f32.mrb[20].mxu1 }
 0x2f0   :  { %v1193_v17 = vpop.f32.mrb[21].mxu1  ;;  %v1202_v10 = vadd.f32 %v2863_v16, %v2688_v13 }
 0x2f1   :  { %v2864_v14 = vpop.f32.mrb[22].mxu1  ;;  %v1194_v22 = vadd.f32 %v2688_v13, %v1193_v17 }
 0x2f2   :  { %v1205_v21 = vadd.f32 %v2864_v14, %v2688_v13  ;;  %v1196_v35 = vpop.f32.mrb[23].mxu1 }
 0x2f3   :  { %v1197_v30 = vadd.f32 %v2688_v13, %v1196_v35 }
 0x2f4   :  { %v1243_v31 = vpack.c.bf16 %v1205_v21, %v1202_v10 }
 0x2f5   :  { %v1242_v37 = vpack.c.bf16 %v1197_v30, %v1194_v22 }
 0x2f7   :  { %2879 = vmatprep.mubr.msk.bf16.mxu0 %vm1263_vm6, %v1242_v37 }
 0x2f8   :  { %2880 = vmatmul.mubr.msk.bf16.gmra.mrb[20].mxu0 %vm1263_vm6, %v1243_v31 }
 0x301   :  { %v2867_v32 = vpop.f32.mrb[24].mxu1 }
 0x302   :  { %v1209_v38 = vpop.f32.mrb[25].mxu1  ;;  %v1218_v50 = vadd.f32 %v2867_v32, %v2688_v13 }
 0x303   :  { %v2868_v29 = vpop.f32.mrb[26].mxu1  ;;  %v1210_v41 = vadd.f32 %v2688_v13, %v1209_v38 }
 0x304   :  { %v1221_v39 = vadd.f32 %v2868_v29, %v2688_v13  ;;  %v1212_v40 = vpop.f32.mrb[27].mxu1 }
 0x305   :  { %v1213_v42 = vadd.f32 %v2688_v13, %v1212_v40 }
 0x306   :  { %v1245_v43 = vpack.c.bf16 %v1221_v39, %v1218_v50 }
 0x307   :  { %v1244_v44 = vpack.c.bf16 %v1213_v42, %v1210_v41  ;;  %v3724_v41 = vld [vmem:[%s4003_s11 + $0x4] ss:$0 sm:$0xff] }
 0x309   :  { %2883 = vmatprep.mubr.msk.bf16.mxu0 %vm1263_vm6, %v1244_v44 }
 0x30a   :  { %2884 = vmatmul.mubr.msk.bf16.gmra.mrb[24].mxu0 %vm1263_vm6, %v1245_v43 }
 0x315   :  { %v2871_v25 = vpop.f32.mrb[28].mxu1 }
 0x316   :  { %v1225_v11 = vpop.f32.mrb[29].mxu1  ;;  %v1234_v46 = vadd.f32 %v2871_v25, %v2688_v13 }
 0x317   :  { %v2872_v45 = vpop.f32.mrb[30].mxu1  ;;  %v1226_v51 = vadd.f32 %v2688_v13, %v1225_v11 }
 0x318   :  { %v1237_v47 = vadd.f32 %v2872_v45, %v2688_v13  ;;  %v1228_v48 = vpop.f32.mrb[31].mxu1 }
 0x319   :  { %v1229_v53 = vadd.f32 %v2688_v13, %v1228_v48  ;;  %v3699_v13 = vld [vmem:[%s4003_s11 + $0x1] ss:$0 sm:$0xff] }
 0x31a   :  { %v1247_v49 = vpack.c.bf16 %v1237_v47, %v1234_v46  ;;  %v1533_v27 = vmul.f32 %v3699_v13, %v1513_v5 }
 0x31b   :  { %v1246_v52 = vpack.c.bf16 %v1229_v53, %v1226_v51  ;;  %v3732_v51 = vld [vmem:[%s4003_s11 + $0x5] ss:$0 sm:$0xff] }
 0x31c   :  { %v1541_v4 = vadd.f32 %v1533_v27, %v1496_v7  ;;  %v3752_v7 = vld [vmem:[%s4003_s11 + $0x7] ss:$0 sm:$0xff] }
 0x31d   :  { %2887 = vmatprep.mubr.msk.bf16.mxu0 %vm1263_vm6, %v1246_v52 }
 0x31e   :  { %2888 = vmatmul.mubr.msk.bf16.gmra.mrb[28].mxu0 %vm1263_vm6, %v1247_v49  ;;  %v1578_v22 = vadd.f32 %v1570_v15, %v1541_v4 }
 0x3b5   :  { %v2877_v60 = vpop.f32.mrb[16].mxu0 }
 0x3b6   :  { %v1331_v61 = vadd.f32 %v2877_v60, %v3682_v59  ;;  %v1322_v63 = vpop.f32.mrb[17].mxu0 }
 0x3b7   :  { %v1323_v19 = vadd.f32 %v3682_v59, %v1322_v63  ;;  %v2878_v54 = vpop.f32.mrb[18].mxu0 }
 0x3b8   :  { %v1387_v56 = vmax.f32 %v1331_v61, 0.0  ;;  %v1334_v1 = vadd.f32 %v2878_v54, %v3682_v59  ;;  %v1325_v20 = vpop.f32.mrb[19].mxu0 }
 0x3b9   :  { %v1385_v2 = vmax.f32 %v1323_v19, 0.0  ;;  %v1326_v6 = vadd.f32 %v3682_v59, %v1325_v20 }
 0x3ba   :  { %v1403_v23 = vmin.f32 %v1387_v56, 6.0  ;;  %v1388_v3 = vmax.f32 %v1334_v1, 0.0 }
 0x3bb   :  { %v1401_v62 = vmin.f32 %v1385_v2, 6.0  ;;  %v1386_v28 = vmax.f32 %v1326_v6, 0.0 }
 0x3bc   :  { %1462 = vst.msk [vmem:[#allocation3 + $0x31] sm:$0xff] %vm1417_vm7, %v1403_v23  ;;  %v1404_v12 = vmin.f32 %v1388_v3, 6.0 }
 0x3bd   :  { %1460 = vst.msk [vmem:[#allocation3 + $0x11] sm:$0xff] %vm1417_vm7, %v1401_v62  ;;  %v1402_v26 = vmin.f32 %v1386_v28, 6.0  ;;  %v3746_v62 = vld [vmem:[%s4003_s11 + $0x6] ss:$0 sm:$0xff] }
 0x3be   :  { %1463 = vst.msk [vmem:[#allocation3 + $0x41] sm:$0xff] %vm1417_vm7, %v1404_v12 }
 0x3bf   :  { %1461 = vst.msk [vmem:[#allocation3 + $0x21] sm:$0xff] %vm1417_vm7, %v1402_v26 }
 0x3c3   :  { %v1588_v37 = vld [vmem:[#allocation3 + $0x30] ss:$2 sm:$0xf]  ;;  %v1625_v45 = vld [vmem:[#allocation3 + $0x31] ss:$2 sm:$0xf] }
 0x3c4   :  { %v1586_v36 = vld [vmem:[#allocation3 + $0x10] ss:$2 sm:$0xf]  ;;  %v1623_v40 = vld [vmem:[#allocation3 + $0x11] ss:$2 sm:$0xf]  ;;  %v1607_v25 = vmul.f32 %v3713_v58, %v1588_v37  ;;  %v1644_v19 = vmul.f32 %v3724_v41, %v1625_v45 }
 0x3c5   :  { %v1606_v30 = vmul.f32 %v3713_v58, %v1586_v36  ;;  %v1480_v48 = vld [vmem:[#allocation3 + $0x40] ss:$2 sm:$0xf]  ;;  %v1517_v52 = vld [vmem:[#allocation3 + $0x41] ss:$2 sm:$0xf]  ;;  %v1643_v55 = vmul.f32 %v3724_v41, %v1623_v40 }
 0x3c6   :  { %v1478_v33 = vld [vmem:[#allocation3 + $0x20] ss:$2 sm:$0xf]  ;;  %v1515_v16 = vld [vmem:[#allocation3 + $0x21] ss:$2 sm:$0xf]  ;;  %v1498_v1 = vmul.f32 %v3693_v34, %v1480_v48  ;;  %v1535_v20 = vmul.f32 %v3699_v13, %v1517_v52 }
 0x3c7   :  { %v1497_v17 = vmul.f32 %v3693_v34, %v1478_v33  ;;  %v1534_v14 = vmul.f32 %v3699_v13, %v1515_v16  ;;  %v1552_v10 = vld [vmem:[#allocation3 + $0x22] ss:$2 sm:$0xf]  ;;  %v1614_v11 = vadd.f32 %v1606_v30, %v1578_v22  ;;  %v1660_v61 = vld [vmem:[#allocation3 + $0x12] ss:$2 sm:$0xf] }
 0x3c8   :  { %v1571_v35 = vmul.f32 %v3707_v8, %v1552_v10  ;;  %v1662_v2 = vld [vmem:[#allocation3 + $0x32] ss:$2 sm:$0xf]  ;;  %v1680_v23 = vmul.f32 %v3732_v51, %v1660_v61  ;;  %v1697_v3 = vld [vmem:[#allocation3 + $0x20] ss:$2 sm:$0xf]  ;;  %v1543_v0 = vadd.f32 %v1535_v20, %v1498_v1 }
 0x3c9   :  { %v1542_v21 = vadd.f32 %v1534_v14, %v1497_v17  ;;  %v1651_v54 = vadd.f32 %v1643_v55, %v1614_v11  ;;  %v1554_v28 = vld [vmem:[#allocation3 + $0x42] ss:$2 sm:$0xf]  ;;  %v1681_v12 = vmul.f32 %v3732_v51, %v1662_v2  ;;  %v1717_v9 = vmul.f32 %v3746_v62, %v1697_v3  ;;  %v1734_v4 = vld [vmem:[#allocation3 + $0x21] ss:$2 sm:$0xf] }
 0x3ca   :  { %v1699_v5 = vld [vmem:[#allocation3 + $0x40] ss:$2 sm:$0xf]  ;;  %v1736_v15 = vld [vmem:[#allocation3 + $0x41] ss:$2 sm:$0xf]  ;;  %v1572_v36 = vmul.f32 %v3707_v8, %v1554_v28 }
 0x3cb   :  { %v2881_v31 = vpop.f32.mrb[20].mxu0  ;;  %v1579_v29 = vadd.f32 %v1571_v35, %v1542_v21  ;;  %v1688_v26 = vadd.f32 %v1680_v23, %v1651_v54  ;;  %v1771_v33 = vld [vmem:[#allocation3 + $0x22] ss:$2 sm:$0xf]  ;;  %v3764_v14 = vld [vmem:[%s4004_s12] ss:$0 sm:$0xff]  ;;  %v1718_v35 = vmul.f32 %v3746_v62, %v1699_v5  ;;  %v1755_v40 = vmul.f32 %v3752_v7, %v1736_v15 }
 0x3cc   :  { %v1347_v32 = vadd.f32 %v2881_v31, %v3682_v59  ;;  %v1338_v38 = vpop.f32.mrb[21].mxu0  ;;  %v1773_v16 = vld [vmem:[#allocation3 + $0x42] ss:$2 sm:$0xf]  ;;  %v1580_v30 = vadd.f32 %v1572_v36, %v1543_v0 }
 0x3cd   :  { %v1339_v50 = vadd.f32 %v3682_v59, %v1338_v38  ;;  %v2882_v39 = vpop.f32.mrb[22].mxu0  ;;  %v1615_v18 = vadd.f32 %v1607_v25, %v1579_v29  ;;  %v3759_v17 = vld [vmem:[%s4003_s11 + $0x8] ss:$0 sm:$0xff]  ;;  %v1725_v22 = vadd.f32 %v1717_v9, %v1688_v26  ;;  %s2971_s11 = scalar_lea.vmem %s2574_s27, 32 }
 0x3ce   :  { %v1391_v42 = vmax.f32 %v1347_v32, 0.0  ;;  %v1350_v43 = vadd.f32 %v2882_v39, %v3682_v59  ;;  %v1341_v44 = vpop.f32.mrb[23].mxu0  ;;  %v1754_v39 = vmul.f32 %v3752_v7, %v1734_v4  ;;  %v1791_v52 = vmul.f32 %v3759_v17, %v1771_v33  ;;  %p2972_p0 = scmp.ne.s32.totalorder %s2574_s27, %s2971_s11  ;;  %p2977_p2 = scmp.lt.s32.totalorder %s2971_s11, %s2971_s11 }
 0x3cf   :  { %v1389_v46 = vmax.f32 %v1339_v50, 0.0  ;;  %v1342_v47 = vadd.f32 %v3682_v59, %v1341_v44  ;;  %v1652_v6 = vadd.f32 %v1644_v19, %v1615_v18  ;;  %v1792_v18 = vmul.f32 %v3759_v17, %v1773_v16 }
 0x3d0   :  { %v1407_v53 = vmin.f32 %v1391_v42, 6.0  ;;  %v1392_v49 = vmax.f32 %v1350_v43, 0.0  ;;  %v3772_v42 = vcombine.high %v3764_v14, %v3764_v14  ;;  %p2978_p3 = por %p2977_p2, %p2976_p1 }
 0x3d1   :  { %v1405_v57 = vmin.f32 %v1389_v46, 6.0  ;;  %v1390_v60 = vmax.f32 %v1342_v47, 0.0  ;;  %v1689_v27 = vadd.f32 %v1681_v12, %v1652_v6 }
 0x3d2   :  { %1466 = vst.msk [vmem:[#allocation3 + $0x71] sm:$0xff] %vm1417_vm7, %v1407_v53  ;;  %v1408_v63 = vmin.f32 %v1392_v49, 6.0  ;;  %v1762_v49 = vadd.f32 %v1754_v39, %v1725_v22  ;;  %p2979_p4 = pnand %p2978_p3, %p2972_p0 }
 0x3d3   :  { %1464 = vst.msk [vmem:[#allocation3 + $0x51] sm:$0xff] %vm1417_vm7, %v1405_v57  ;;  %v1406_v56 = vmin.f32 %v1390_v60, 6.0  ;;  %v1726_v50 = vadd.f32 %v1718_v35, %v1689_v27 }
 0x3d4   :  { %1467 = vst.msk [vmem:[#allocation3 + $0x81] sm:$0xff] %vm1417_vm7, %v1408_v63  ;;  %v1799_v39 = vadd.f32 %v1791_v52, %v1762_v49 }
 0x3d5   :  { %1465 = vst.msk [vmem:[#allocation3 + $0x61] sm:$0xff] %vm1417_vm7, %v1406_v56  ;;  %v1763_v2 = vadd.f32 %v1755_v40, %v1726_v50 }
 0x3d9   :  { %v1592_v31 = vld [vmem:[#allocation3 + $0x70] ss:$2 sm:$0xf]  ;;  %v1629_v48 = vld [vmem:[#allocation3 + $0x71] ss:$2 sm:$0xf] }
 0x3da   :  { %v1590_v10 = vld [vmem:[#allocation3 + $0x50] ss:$2 sm:$0xf]  ;;  %v1627_v21 = vld [vmem:[#allocation3 + $0x51] ss:$2 sm:$0xf]  ;;  %v1609_v1 = vmul.f32 %v3713_v58, %v1592_v31  ;;  %v1646_v27 = vmul.f32 %v3724_v41, %v1629_v48 }
 0x3db   :  { %v1608_v37 = vmul.f32 %v3713_v58, %v1590_v10  ;;  %v1664_v32 = vld [vmem:[#allocation3 + $0x52] ss:$2 sm:$0xf]  ;;  %v1645_v45 = vmul.f32 %v3724_v41, %v1627_v21  ;;  %v1703_v22 = vld [vmem:[#allocation3 + $0x80] ss:$2 sm:$0xf] }
 0x3dc   :  { %v1482_v38 = vld [vmem:[#allocation3 + $0x60] ss:$2 sm:$0xf]  ;;  %v1519_v29 = vld [vmem:[#allocation3 + $0x61] ss:$2 sm:$0xf]  ;;  %v1682_v53 = vmul.f32 %v3732_v51, %v1664_v32 }
 0x3dd   :  { %v1499_v43 = vmul.f32 %v3693_v34, %v1482_v38  ;;  %v1536_v44 = vmul.f32 %v3699_v13, %v1519_v29  ;;  %v1556_v25 = vld [vmem:[#allocation3 + $0x62] ss:$2 sm:$0xf]  ;;  %v1616_v11 = vadd.f32 %v1608_v37, %v1580_v30  ;;  %v2885_v47 = vpop.f32.mrb[24].mxu0  ;;  %v1800_v30 = vadd.f32 %v1792_v18, %v1763_v2 }
 0x3de   :  { %v1701_v46 = vld [vmem:[#allocation3 + $0x60] ss:$2 sm:$0xf]  ;;  %v1363_v55 = vadd.f32 %v2885_v47, %v3682_v59  ;;  %v1354_v57 = vpop.f32.mrb[25].mxu0  ;;  %v1573_v61 = vmul.f32 %v3707_v8, %v1556_v25 }
 0x3df   :  { %v1544_v60 = vadd.f32 %v1536_v44, %v1499_v43  ;;  %v1653_v63 = vadd.f32 %v1645_v45, %v1616_v11  ;;  %v1738_v19 = vld [vmem:[#allocation3 + $0x61] ss:$2 sm:$0xf]  ;;  %v1355_v54 = vadd.f32 %v3682_v59, %v1354_v57  ;;  %v2886_v56 = vpop.f32.mrb[26].mxu0  ;;  %v1719_v20 = vmul.f32 %v3746_v62, %v1701_v46 }
 0x3e0   :  { %v1395_v6 = vmax.f32 %v1363_v55, 0.0  ;;  %v1366_v23 = vadd.f32 %v2886_v56, %v3682_v59  ;;  %v1357_v3 = vpop.f32.mrb[27].mxu0  ;;  %v1666_v12 = vld [vmem:[#allocation3 + $0x72] ss:$2 sm:$0xf]  ;;  %v1756_v9 = vmul.f32 %v3752_v7, %v1738_v19  ;;  %v1720_v43 = vmul.f32 %v3746_v62, %v1703_v22 }
 0x3e1   :  { %v1581_v28 = vadd.f32 %v1573_v61, %v1544_v60  ;;  %v1690_v26 = vadd.f32 %v1682_v53, %v1653_v63  ;;  %v1393_v0 = vmax.f32 %v1355_v54, 0.0  ;;  %v1358_v5 = vadd.f32 %v3682_v59, %v1357_v3  ;;  %v1775_v4 = vld [vmem:[#allocation3 + $0x62] ss:$2 sm:$0xf] }
 0x3e2   :  { %v1411_v15 = vmin.f32 %v1395_v6, 6.0  ;;  %v1396_v36 = vmax.f32 %v1366_v23, 0.0  ;;  %v1683_v35 = vmul.f32 %v3732_v51, %v1666_v12  ;;  %v1793_v38 = vmul.f32 %v3759_v17, %v1775_v4  ;;  %v1740_v50 = vld [vmem:[#allocation3 + $0x81] ss:$2 sm:$0xf] }
 0x3e3   :  { %v1617_v33 = vadd.f32 %v1609_v1, %v1581_v28  ;;  %v1727_v16 = vadd.f32 %v1719_v20, %v1690_v26  ;;  %v1409_v10 = vmin.f32 %v1393_v0, 6.0  ;;  %v1394_v21 = vmax.f32 %v1358_v5, 0.0  ;;  %v1484_v25 = vld [vmem:[#allocation3 + $0xa0] ss:$2 sm:$0xf] }
 0x3e4   :  { %1470 = vst.msk [vmem:[#allocation3 + $0xd1] sm:$0xff] %vm1417_vm7, %v1411_v15  ;;  %v1412_v31 = vmin.f32 %v1396_v36, 6.0  ;;  %v1777_v11 = vld [vmem:[#allocation3 + $0x82] ss:$2 sm:$0xf]  ;;  %v1817_v45 = vadd.f32 %v3772_v42, %v1800_v30  ;;  %v1757_v48 = vmul.f32 %v3752_v7, %v1740_v50  ;;  %v1816_v53 = vadd.f32 %v3764_v14, %v1799_v39 }
 0x3e5   :  { %v1654_v37 = vadd.f32 %v1646_v27, %v1617_v33  ;;  %v1764_v32 = vadd.f32 %v1756_v9, %v1727_v16  ;;  %1468 = vst.msk [vmem:[#allocation3 + $0xb1] sm:$0xff] %vm1417_vm7, %v1409_v10  ;;  %v1410_v29 = vmin.f32 %v1394_v21, 6.0  ;;  %v1521_v46 = vld [vmem:[#allocation3 + $0xa1] ss:$2 sm:$0xf]  ;;  %v1794_v18 = vmul.f32 %v3759_v17, %v1777_v11 }
 0x3e6   :  { %1471 = vst.msk [vmem:[#allocation3 + $0xe1] sm:$0xff] %vm1417_vm7, %v1412_v31  ;;  %v1500_v55 = vmul.f32 %v3693_v34, %v1484_v25  ;;  %v1537_v57 = vmul.f32 %v3699_v13, %v1521_v46  ;;  %v1825_v60 = vmax.f32 %v1817_v45, 0.0  ;;  %v1558_v61 = vld [vmem:[#allocation3 + $0xa2] ss:$2 sm:$0xf]  ;;  %v1824_v19 = vmax.f32 %v1816_v53, 0.0 }
 0x3e7   :  { %v1691_v40 = vadd.f32 %v1683_v35, %v1654_v37  ;;  %v1801_v44 = vadd.f32 %v1793_v38, %v1764_v32  ;;  %1469 = vst.msk [vmem:[#allocation3 + $0xc1] sm:$0xff] %vm1417_vm7, %v1410_v29  ;;  %v1574_v6 = vmul.f32 %v3707_v8, %v1558_v61 }
 0x3e8   :  { %v1545_v2 = vadd.f32 %v1537_v57, %v1500_v55  ;;  %v1833_v23 = vmin.f32 %v1825_v60, 6.0  ;;  %v1832_v27 = vmin.f32 %v1824_v19, 6.0 }
 0x3e9   :  { %v1728_v47 = vadd.f32 %v1720_v43, %v1691_v40  ;;  %v1818_v49 = vadd.f32 %v3764_v14, %v1801_v44 }
 0x3ea   :  { %v1582_v21 = vadd.f32 %v1574_v6, %v1545_v2  ;;  %v1848_v30 = vcombine.low %v1832_v27, %v1833_v23 }
 0x3eb   :  { %v1765_v52 = vadd.f32 %v1757_v48, %v1728_v47  ;;  %v1826_v54 = vmax.f32 %v1818_v49, 0.0  ;;  %v1596_v0 = vld [vmem:[#allocation3 + $0xd0] ss:$2 sm:$0xf] }
 0x3ec   :  { %v1594_v15 = vld [vmem:[#allocation3 + $0xb0] ss:$2 sm:$0xf]  ;;  %v1611_v37 = vmul.f32 %v3713_v58, %v1596_v0  ;;  %v1633_v40 = vld [vmem:[#allocation3 + $0xd1] ss:$2 sm:$0xf] }
 0x3ed   :  { %v1802_v63 = vadd.f32 %v1794_v18, %v1765_v52  ;;  %v1834_v16 = vmin.f32 %v1826_v54, 6.0  ;;  %v1610_v39 = vmul.f32 %v3713_v58, %v1594_v15  ;;  %v1488_v25 = vld [vmem:[#allocation3 + $0xe0] ss:$2 sm:$0xf]  ;;  %v1648_v57 = vmul.f32 %v3724_v41, %v1633_v40 }
 0x3ee   :  { %v1486_v1 = vld [vmem:[#allocation3 + $0xc0] ss:$2 sm:$0xf]  ;;  %v1523_v20 = vld [vmem:[#allocation3 + $0xc1] ss:$2 sm:$0xf]  ;;  %v1502_v60 = vmul.f32 %v3693_v34, %v1488_v25 }
 0x3ef   :  { %v1819_v56 = vadd.f32 %v3772_v42, %v1802_v63  ;;  %v1501_v3 = vmul.f32 %v3693_v34, %v1486_v1  ;;  %v1538_v28 = vmul.f32 %v3699_v13, %v1523_v20  ;;  %v1560_v12 = vld [vmem:[#allocation3 + $0xc2] ss:$2 sm:$0xf]  ;;  %v1525_v47 = vld [vmem:[#allocation3 + $0xe1] ss:$2 sm:$0xf]  ;;  %v1618_v55 = vadd.f32 %v1610_v39, %v1582_v21 }
 0x3f0   :  { %v1575_v4 = vmul.f32 %v3707_v8, %v1560_v12  ;;  %v1631_v52 = vld [vmem:[#allocation3 + $0xb1] ss:$2 sm:$0xf]  ;;  %v1539_v61 = vmul.f32 %v3699_v13, %v1525_v47  ;;  %v1670_v63 = vld [vmem:[#allocation3 + $0xd2] ss:$2 sm:$0xf] }
 0x3f1   :  { %v1827_v26 = vmax.f32 %v1819_v56, 0.0  ;;  %v2889_v5 = vpop.f32.mrb[28].mxu0  ;;  %v1546_v9 = vadd.f32 %v1538_v28, %v1501_v3  ;;  %v1647_v19 = vmul.f32 %v3724_v41, %v1631_v52  ;;  %v1668_v56 = vld [vmem:[#allocation3 + $0xb2] ss:$2 sm:$0xf]  ;;  %v1685_v2 = vmul.f32 %v3732_v51, %v1670_v63 }
 0x3f2   :  { %v1379_v36 = vadd.f32 %v2889_v5, %v3682_v59  ;;  %v1370_v33 = vpop.f32.mrb[29].mxu0  ;;  %v1562_v1 = vld [vmem:[#allocation3 + $0xe2] ss:$2 sm:$0xf]  ;;  %v1547_v6 = vadd.f32 %v1539_v61, %v1502_v60  ;;  %v1684_v3 = vmul.f32 %v3732_v51, %v1668_v56 }
 0x3f3   :  { %v1835_v10 = vmin.f32 %v1827_v26, 6.0  ;;  %v1371_v35 = vadd.f32 %v3682_v59, %v1370_v33  ;;  %v2890_v22 = vpop.f32.mrb[30].mxu0  ;;  %v1583_v31 = vadd.f32 %v1575_v4, %v1546_v9  ;;  %v1655_v20 = vadd.f32 %v1647_v19, %v1618_v55  ;;  %v1707_v23 = vld [vmem:[#allocation3 + $0xe0] ss:$2 sm:$0xf] }
 0x3f4   :  { %v1399_v32 = vmax.f32 %v1379_v36, 0.0  ;;  %v1382_v38 = vadd.f32 %v2890_v22, %v3682_v59  ;;  %v1373_v29 = vpop.f32.mrb[31].mxu0  ;;  %v1576_v12 = vmul.f32 %v3707_v8, %v1562_v1  ;;  %v1705_v26 = vld [vmem:[#allocation3 + $0xc0] ss:$2 sm:$0xf]  ;;  %v1722_v9 = vmul.f32 %v3746_v62, %v1707_v23 }
 0x3f5   :  { %v1849_v50 = vcombine.low %v1834_v16, %v1835_v10  ;;  %v1397_v43 = vmax.f32 %v1371_v35, 0.0  ;;  %v1374_v44 = vadd.f32 %v3682_v59, %v1373_v29  ;;  %v1619_v48 = vadd.f32 %v1611_v37, %v1583_v31  ;;  %v1744_v33 = vld [vmem:[#allocation3 + $0xe1] ss:$2 sm:$0xf] }
 0x3f6   :  { %v1415_v11 = vmin.f32 %v1399_v32, 6.0  ;;  %v1400_v45 = vmax.f32 %v1382_v38, 0.0  ;;  %v1692_v27 = vadd.f32 %v1684_v3, %v1655_v20  ;;  %v1584_v4 = vadd.f32 %v1576_v12, %v1547_v6  ;;  %v1742_v38 = vld [vmem:[#allocation3 + $0xc1] ss:$2 sm:$0xf] }
 0x3f7   :  { %v1856_v46 = vpack.c.bf16 %v1849_v50, %v1848_v30  ;;  %v1413_v53 = vmin.f32 %v1397_v43, 6.0  ;;  %v1398_v49 = vmax.f32 %v1374_v44, 0.0  ;;  %v1656_v54 = vadd.f32 %v1648_v57, %v1619_v48 }
 0x3f8   :  { %1474 = vst.msk [vmem:[#allocation3 + $0x111] sm:$0xff] %vm1417_vm7, %v1415_v11  ;;  %v1416_v18 = vmin.f32 %v1400_v45, 6.0  ;;  %v1721_v21 = vmul.f32 %v3746_v62, %v1705_v26  ;;  %v1759_v40 = vmul.f32 %v3752_v7, %v1744_v33  ;;  %v1781_v45 = vld [vmem:[#allocation3 + $0xe2] ss:$2 sm:$0xf] }
 0x3f9   :  { %2897 = vmatprep.mubr.msk.bf16.mxu0 %vm1417_vm7, %v1856_v46  ;;  %1472 = vst.msk [vmem:[#allocation3 + $0xf1] sm:$0xff] %vm1417_vm7, %v1413_v53  ;;  %v1414_v59 = vmin.f32 %v1398_v49, 6.0  ;;  %v1693_v28 = vadd.f32 %v1685_v2, %v1656_v54 }
 0x3fa   :  { %1475 = vst.msk [vmem:[#allocation3 + $0x121] sm:$0xff] %vm1417_vm7, %v1416_v18  ;;  %v1729_v39 = vadd.f32 %v1721_v21, %v1692_v27  ;;  %v1779_v18 = vld [vmem:[#allocation3 + $0xc2] ss:$2 sm:$0xf] }
 0x3fb   :  { %1473 = vst.msk [vmem:[#allocation3 + $0x101] sm:$0xff] %vm1417_vm7, %v1414_v59  ;;  %v1730_v35 = vadd.f32 %v1722_v9, %v1693_v28  ;;  %v1795_v56 = vmul.f32 %v3759_v17, %v1779_v18 }
 0x3fd   :  { %v1767_v47 = vadd.f32 %v1759_v40, %v1730_v35 }
 0x3ff   :  { %v1600_v29 = vld [vmem:[#allocation3 + $0x110] ss:$2 sm:$0xf] }
 0x400   :  { %v1598_v0 = vld [vmem:[#allocation3 + $0xf0] ss:$2 sm:$0xf]  ;;  %v1635_v5 = vld [vmem:[#allocation3 + $0xf1] ss:$2 sm:$0xf]  ;;  %v1613_v53 = vmul.f32 %v3713_v58, %v1600_v29 }
 0x401   :  { %v1612_v15 = vmul.f32 %v3713_v58, %v1598_v0  ;;  %v1672_v36 = vld [vmem:[#allocation3 + $0xf2] ss:$2 sm:$0xf]  ;;  %v1649_v32 = vmul.f32 %v3724_v41, %v1635_v5  ;;  %v1711_v54 = vld [vmem:[#allocation3 + $0x120] ss:$2 sm:$0xf] }
 0x402   :  { %v1490_v16 = vld [vmem:[#allocation3 + $0x100] ss:$2 sm:$0xf]  ;;  %v1527_v10 = vld [vmem:[#allocation3 + $0x101] ss:$2 sm:$0xf]  ;;  %v1686_v11 = vmul.f32 %v3732_v51, %v1672_v36  ;;  %v1724_v28 = vmul.f32 %v3746_v62, %v1711_v54 }
 0x403   :  { %v1503_v22 = vmul.f32 %v3693_v34, %v1490_v16  ;;  %v1540_v30 = vmul.f32 %v3699_v13, %v1527_v10  ;;  %v1564_v31 = vld [vmem:[#allocation3 + $0x102] ss:$2 sm:$0xf]  ;;  %v1620_v37 = vadd.f32 %v1612_v15, %v1584_v4  ;;  %v1637_v34 = vld [vmem:[#allocation3 + $0x111] ss:$2 sm:$0xf]  ;;  %v1758_v13 = vmul.f32 %v3752_v7, %v1742_v38 }
 0x404   :  { %v1709_v50 = vld [vmem:[#allocation3 + $0x100] ss:$2 sm:$0xf]  ;;  %v1577_v44 = vmul.f32 %v3707_v8, %v1564_v31  ;;  %v1746_v46 = vld [vmem:[#allocation3 + $0x101] ss:$2 sm:$0xf]  ;;  %v1796_v8 = vmul.f32 %v3759_v17, %v1781_v45  ;;  %v1650_v61 = vmul.f32 %v3724_v41, %v1637_v34 }
 0x405   :  { %v1548_v43 = vadd.f32 %v1540_v30, %v1503_v22  ;;  %v1657_v25 = vadd.f32 %v1649_v32, %v1620_v37  ;;  %v1723_v52 = vmul.f32 %v3746_v62, %v1709_v50  ;;  %v1674_v55 = vld [vmem:[#allocation3 + $0x112] ss:$2 sm:$0xf]  ;;  %v1766_v57 = vadd.f32 %v1758_v13, %v1729_v39  ;;  %v1783_v59 = vld [vmem:[#allocation3 + $0x102] ss:$2 sm:$0xf] }
 0x406   :  { %v1760_v19 = vmul.f32 %v3752_v7, %v1746_v46  ;;  %v1804_v1 = vadd.f32 %v1796_v8, %v1767_v47  ;;  %v1687_v20 = vmul.f32 %v3732_v51, %v1674_v55  ;;  %v1797_v6 = vmul.f32 %v3759_v17, %v1783_v59  ;;  %v1748_v23 = vld [vmem:[#allocation3 + $0x121] ss:$2 sm:$0xf]  ;;  %v1785_v41 = vld [vmem:[#allocation3 + $0x122] ss:$2 sm:$0xf] }
 0x407   :  { %v1585_v48 = vadd.f32 %v1577_v44, %v1548_v43  ;;  %v1694_v49 = vadd.f32 %v1686_v11, %v1657_v25  ;;  %v1803_v12 = vadd.f32 %v1795_v56, %v1766_v57  ;;  %v1761_v5 = vmul.f32 %v3752_v7, %v1748_v23  ;;  %v2962_v45 = vld [vmem:[%s4011_s19] sm:$0xff]   ;;  %v2963_v34 = vld [vmem:[%s4011_s19 + $0x8] sm:$0xff]   ;;  %v2964_v46 = vld [vmem:[%s4011_s19 + $0x10] sm:$0xff]  }
 0x408   :  { %v1821_v27 = vadd.f32 %v3772_v42, %v1804_v1  ;;  %v1798_v4 = vmul.f32 %v3759_v17, %v1785_v41  ;;  %v2961_v17 = vld [vmem:[%s4007_s15] sm:$0xff]   ;;  %2908 = vmatpush3.bf16.msra.mxu1 %v2962_v45  ;;  %v2084_v55 = vld [vmem:[#allocation4 + $0x31] ss:$2 sm:$0x3] }
 0x409   :  { %v1621_v60 = vadd.f32 %v1613_v53, %v1585_v48  ;;  %v1731_v63 = vadd.f32 %v1723_v52, %v1694_v49  ;;  %v1820_v51 = vadd.f32 %v3764_v14, %v1803_v12  ;;  %2901 = vmatprep.subr.bf16.mxu0 %v2961_v17  ;;  %2909 = vmatprep.subr.bf16.mxu1 %v2995_v24  ;;  %v2965_v13 = vld [vmem:[%s4013_s21] sm:$0xff]   ;;  %v2063_v53 = vld [vmem:[#allocation4 + $0x30] ss:$2 sm:$0x3] }
 0x40a   :  { %v1829_v33 = vmax.f32 %v1821_v27, 0.0  ;;  %v2725_v47 = vld [vmem:[%s4008_s16] ss:$0 sm:$0xff]  ;;  %v3902_v57 = vld [vmem:[%s4009_s17 + $0x1] ss:$0 sm:$0xff] }
 0x40b   :  { %v1658_v58 = vadd.f32 %v1650_v61, %v1621_v60  ;;  %v1768_v2 = vadd.f32 %v1760_v19, %v1731_v63  ;;  %v1828_v62 = vmax.f32 %v1820_v51, 0.0  ;;  %v3897_v52 = vld [vmem:[%s4009_s17] ss:$0 sm:$0xff]  ;;  %v2080_v54 = vld [vmem:[#allocation4 + $0x1] ss:$2 sm:$0x3] }
 0x40c   :  { %v1837_v35 = vmin.f32 %v1829_v33, 6.0  ;;  %2910 = vmatpush3.bf16.msra.mxu1 %v2963_v34  ;;  %v2059_v60 = vld [vmem:[#allocation4] ss:$2 sm:$0x3]  ;;  %v2256_v33 = vlaneseq }
 0x40d   :  { %v1695_v3 = vadd.f32 %v1687_v20, %v1658_v58  ;;  %v1805_v26 = vadd.f32 %v1797_v6, %v1768_v2  ;;  %v1836_v22 = vmin.f32 %v1828_v62, 6.0  ;;  %2911 = vmatprep.subr.bf16.mxu1 %v2995_v24  ;;  %v2073_v2 = vmul.f32 %v3897_v52, %v2063_v53  ;;  %v2105_v23 = vld [vmem:[#allocation4 + $0x32] ss:$2 sm:$0x3]  ;;  %v2731_v41 = vld [vmem:[%s4009_s17 + $0x2] ss:$0 sm:$0xff] }
 0x40e   :  { %v2094_v6 = vmul.f32 %v3902_v57, %v2084_v55  ;;  %v2071_v12 = vmul.f32 %v3897_v52, %v2059_v60  ;;  %v2101_v27 = vld [vmem:[#allocation4 + $0x2] ss:$2 sm:$0x3] }
 0x40f   :  { %v1732_v0 = vadd.f32 %v1724_v28, %v1695_v3  ;;  %v1822_v15 = vadd.f32 %v3764_v14, %v1805_v26  ;;  %v1850_v31 = vcombine.low %v1836_v22, %v1837_v35  ;;  %v2092_v26 = vmul.f32 %v3902_v57, %v2080_v54  ;;  %v2732_v22 = vld [vmem:[%s4009_s17 + $0x3] ss:$0 sm:$0xff] }
 0x410   :  { %2912 = vmatpush3.bf16.msra.mxu1 %v2964_v46  ;;  %v2734_v46 = vld [vmem:[%s4009_s17 + $0x5] ss:$0 sm:$0xff] }
 0x411   :  { %v1769_v9 = vadd.f32 %v1761_v5, %v1732_v0  ;;  %v1830_v10 = vmax.f32 %v1822_v15, 0.0  ;;  %2925 = vmatprep.subr.bf16.mxu1 %v2995_v24  ;;  %v2098_v15 = vadd.f32 %v2094_v6, %v2073_v2  ;;  %v2096_v62 = vadd.f32 %v2092_v26, %v2071_v12 }
 0x413   :  { %v1806_v36 = vadd.f32 %v1798_v4, %v1769_v9  ;;  %v1838_v30 = vmin.f32 %v1830_v10, 6.0  ;;  %v2113_v10 = vmul.f32 %v2731_v41, %v2101_v27 }
 0x415   :  { %v1823_v16 = vadd.f32 %v3772_v42, %v1806_v36  ;;  %v2719_v42 = vld [vmem:[%s4006_s14] ss:$0 sm:$0xff]  ;;  %v2115_v36 = vmul.f32 %v2731_v41, %v2105_v23 }
 0x417   :  { %v1831_v21 = vmax.f32 %v1823_v16, 0.0 }
 0x419   :  { %v1839_v7 = vmin.f32 %v1831_v21, 6.0  ;;  %v2997_v21 = vmov 1983009808  }
 0x41a   :  { %v2254_v35 = vunpack.c.l.s4 %v2997_v21 }
 0x41b   :  { %v1851_v37 = vcombine.low %v1838_v30, %v1839_v7  ;;  %v2119_v30 = vadd.f32 %v2115_v36, %v2098_v15  ;;  %v2733_v7 = vld [vmem:[%s4009_s17 + $0x4] ss:$0 sm:$0xff] }
 0x41d   :  { %v1857_v32 = vpack.c.bf16 %v1851_v37, %v1850_v31  ;;  %v2738_v31 = vld [vmem:[%s4010_s18] ss:$0 sm:$0xff]  ;;  %v2257_v37 = vshrl.u32 %v2256_v33, 7  ;;  %v2737_v33 = vld [vmem:[%s4009_s17 + $0x8] ss:$0 sm:$0xff] }
 0x41f   :  { %2898 = vmatmul.mubr.msk.bf16.vlgmr.msra.gmra.mrb[32].mxu0 %vm1417_vm7, %v1857_v32 }
 0x420   :  { %2902 = vmatpush3.bf16.msra.mxu0 %v2961_v17  ;;  %v2117_v17 = vadd.f32 %v2113_v10, %v2096_v62 }
 0x421   :  { %2917 = vmatprep.subr.bf16.mxu0 %v2995_v24 }
 0x4f2   :  { %v2899_v14 = vpop.f32.mrb[32].mxu0 }
 0x4f3   :  { %v1929_v38 = vpop.f32.mrb[33].mxu0  ;;  %v1938_v50 = vadd.f32 %v2899_v14, %v2719_v42 }
 0x4f4   :  { %v2900_v29 = vpop.f32.mrb[34].mxu0  ;;  %v1930_v43 = vadd.f32 %v2719_v42, %v1929_v38 }
 0x4f5   :  { %v1941_v39 = vadd.f32 %v2900_v29, %v2719_v42  ;;  %v1932_v40 = vpop.f32.mrb[35].mxu0 }
 0x4f6   :  { %v1933_v44 = vadd.f32 %v2719_v42, %v1932_v40  ;;  %v2255_v42 = vunpack.c.0.s8 %v2254_v35 }
 0x4f7   :  { %v1945_v25 = vpack.c.bf16 %v1941_v39, %v1938_v50 }
 0x4f8   :  { %v1944_v11 = vpack.c.bf16 %v1933_v44, %v1930_v43  ;;  %v3934_v55 = vsub.s32 %v2255_v42, %v2257_v37 }
 0x4fa   :  { %2903 = vmatprep.mubr.msk.bf16.mxu0 %vm1263_vm6, %v1944_v11 }
 0x4fb   :  { %2904 = vmatmul.mubr.msk.bf16.vlgmr.msra.gmra.mrb[36].mxu0 %vm1263_vm6, %v1945_v25 }
 0x4fc   :  { %2921 = vmatprep.mubr.msk.bf16.mxu0 %vm2996_vm10, %v2995_v24  ;;  %2918 = vmatpush3.bf16.msra.mxu0 %v2965_v13  ;;  %v2252_v13 = vcombine.high %v2738_v31, %v2738_v31 }
 0x4fd   :  { %2919 = vmatprep.subr.bf16.mxu0 %v2995_v24 }
 0x5ce   :  { %v2905_v48 = vpop.f32.mrb[36].mxu0 }
 0x5cf   :  { %v2010_v49 = vadd.f32 %v2905_v48, %v2725_v47  ;;  %v2001_v18 = vpop.f32.mrb[37].mxu0 }
 0x5d0   :  { %v2002_v59 = vadd.f32 %v2725_v47, %v2001_v18  ;;  %v2906_v8 = vpop.f32.mrb[38].mxu0 }
 0x5d1   :  { %v2018_v61 = vmax.f32 %v2010_v49, 0.0  ;;  %v2013_v63 = vadd.f32 %v2906_v8, %v2725_v47  ;;  %v2004_v19 = vpop.f32.mrb[39].mxu0 }
 0x5d2   :  { %v2016_v56 = vmax.f32 %v2002_v59, 0.0  ;;  %v2005_v1 = vadd.f32 %v2725_v47, %v2004_v19 }
 0x5d3   :  { %v2022_v58 = vmin.f32 %v2018_v61, 6.0  ;;  %v2019_v20 = vmax.f32 %v2013_v63, 0.0 }
 0x5d4   :  { %v2020_v3 = vmin.f32 %v2016_v56, 6.0  ;;  %v2017_v28 = vmax.f32 %v2005_v1, 0.0 }
 0x5d5   :  { %v2043_v0 = vcombine.high %v2022_v58, %v2022_v58  ;;  %2055 = vst.msk [vmem:[#allocation4 + $0x39] sm:$0xf] %vm2050_vm11, %v2022_v58  ;;  %v2023_v5 = vmin.f32 %v2019_v20, 6.0 }
 0x5d6   :  { %v2041_v9 = vcombine.high %v2020_v3, %v2020_v3  ;;  %2051 = vst.msk [vmem:[#allocation4 + $0x9] sm:$0xf] %vm2050_vm11, %v2020_v3  ;;  %v2021_v4 = vmin.f32 %v2017_v28, 6.0 }
 0x5d7   :  { %2056 = vst.msk [vmem:[#allocation4 + $0x41] sm:$0xf] %vm2050_vm11, %v2043_v0  ;;  %v2044_v51 = vcombine.high %v2023_v5, %v2023_v5  ;;  %2057 = vst.msk [vmem:[#allocation4 + $0x49] sm:$0xf] %vm2050_vm11, %v2023_v5  ;;  %v2259_v0 = vrot.slane %v2738_v31, %v3934_v55  ;;  %v2266_v5 = vrot.slane %v2252_v13, %v3934_v55 }
 0x5d8   :  { %2052 = vst.msk [vmem:[#allocation4 + $0x11] sm:$0xf] %vm2050_vm11, %v2041_v9  ;;  %v2042_v16 = vcombine.high %v2021_v4, %v2021_v4  ;;  %2053 = vst.msk [vmem:[#allocation4 + $0x19] sm:$0xf] %vm2050_vm11, %v2021_v4 }
 0x5d9   :  { %2058 = vst.msk [vmem:[#allocation4 + $0x51] sm:$0xf] %vm2050_vm11, %v2044_v51 }
 0x5da   :  { %2054 = vst.msk [vmem:[#allocation4 + $0x21] sm:$0xf] %vm2050_vm11, %v2042_v16 }
 0x5dc   :  { %v2125_v32 = vld [vmem:[#allocation4 + $0x38] ss:$2 sm:$0x3]  ;;  %v2146_v14 = vld [vmem:[#allocation4 + $0x39] ss:$2 sm:$0x3] }
 0x5dd   :  { %v2121_v38 = vld [vmem:[#allocation4 + $0x8] ss:$2 sm:$0x3]  ;;  %v2135_v29 = vmul.f32 %v2732_v22, %v2125_v32  ;;  %v2142_v50 = vld [vmem:[#allocation4 + $0x9] ss:$2 sm:$0x3]  ;;  %v2156_v19 = vmul.f32 %v2733_v7, %v2146_v14 }
 0x5de   :  { %v2065_v39 = vld [vmem:[#allocation4 + $0x40] ss:$2 sm:$0x3]  ;;  %v2086_v40 = vld [vmem:[#allocation4 + $0x41] ss:$2 sm:$0x3]  ;;  %v2133_v43 = vmul.f32 %v2732_v22, %v2121_v38  ;;  %v2154_v18 = vmul.f32 %v2733_v7, %v2142_v50 }
 0x5df   :  { %v2074_v44 = vmul.f32 %v3897_v52, %v2065_v39  ;;  %v2095_v25 = vmul.f32 %v3902_v57, %v2086_v40  ;;  %v2107_v11 = vld [vmem:[#allocation4 + $0x42] ss:$2 sm:$0x3]  ;;  %v2061_v45 = vld [vmem:[#allocation4 + $0x10] ss:$2 sm:$0x3]  ;;  %v2139_v34 = vadd.f32 %v2135_v29, %v2119_v30 }
 0x5e0   :  { %v2072_v47 = vmul.f32 %v3897_v52, %v2061_v45  ;;  %v2082_v48 = vld [vmem:[#allocation4 + $0x11] ss:$2 sm:$0x3]  ;;  %v2103_v53 = vld [vmem:[#allocation4 + $0x12] ss:$2 sm:$0x3]  ;;  %v2137_v49 = vadd.f32 %v2133_v43, %v2117_v17  ;;  %v2116_v63 = vmul.f32 %v2731_v41, %v2107_v11 }
 0x5e1   :  { %v2093_v59 = vmul.f32 %v3902_v57, %v2082_v48  ;;  %v2127_v8 = vld [vmem:[#allocation4 + $0x48] ss:$2 sm:$0x3]  ;;  %v2123_v60 = vld [vmem:[#allocation4 + $0x18] ss:$2 sm:$0x3]  ;;  %v2099_v61 = vadd.f32 %v2095_v25, %v2074_v44  ;;  %v2114_v54 = vmul.f32 %v2731_v41, %v2103_v53  ;;  %v2160_v23 = vadd.f32 %v2156_v19, %v2139_v34 }
 0x5e2   :  { %v2148_v56 = vld [vmem:[#allocation4 + $0x49] ss:$2 sm:$0x3]  ;;  %v2158_v1 = vadd.f32 %v2154_v18, %v2137_v49  ;;  %v2735_v52 = vld [vmem:[%s4009_s17 + $0x6] ss:$0 sm:$0xff]  ;;  %v2136_v2 = vmul.f32 %v2732_v22, %v2127_v8  ;;  %v2134_v28 = vmul.f32 %v2732_v22, %v2123_v60  ;;  %v2268_v19 = vcombine.high %v2266_v5, %v2266_v5 }
 0x5e3   :  { %v2097_v58 = vadd.f32 %v2093_v59, %v2072_v47  ;;  %v2120_v20 = vadd.f32 %v2116_v63, %v2099_v61  ;;  %v2144_v6 = vld [vmem:[#allocation4 + $0x19] ss:$2 sm:$0x3]  ;;  %v2163_v3 = vld [vmem:[#allocation4 + $0xa] ss:$2 sm:$0x3]  ;;  %v2157_v4 = vmul.f32 %v2733_v7, %v2148_v56 }
 0x5e4   :  { %v2736_v57 = vld [vmem:[%s4009_s17 + $0x7] ss:$0 sm:$0xff]  ;;  %v2167_v12 = vld [vmem:[#allocation4 + $0x3a] ss:$2 sm:$0x3]  ;;  %v2175_v41 = vmul.f32 %v2734_v46, %v2163_v3  ;;  %v2155_v16 = vmul.f32 %v2733_v7, %v2144_v6 }
 0x5e5   :  { %v2169_v26 = vld [vmem:[#allocation4 + $0x4a] ss:$2 sm:$0x3]  ;;  %v2118_v27 = vadd.f32 %v2114_v54, %v2097_v58  ;;  %v2140_v9 = vadd.f32 %v2136_v2, %v2120_v20  ;;  %v2165_v51 = vld [vmem:[#allocation4 + $0x1a] ss:$2 sm:$0x3]  ;;  %v2177_v15 = vmul.f32 %v2734_v46, %v2167_v12  ;;  %v2267_v2 = vcombine.high %v2259_v0, %v2259_v0 }
 0x5e6   :  { %v2184_v36 = vld [vmem:[#allocation4 + $0x10] ss:$2 sm:$0x3]  ;;  %v2178_v62 = vmul.f32 %v2734_v46, %v2169_v26  ;;  %v2179_v10 = vadd.f32 %v2175_v41, %v2158_v1  ;;  %v2188_v21 = vld [vmem:[#allocation4 + $0x40] ss:$2 sm:$0x3]  ;;  %v2176_v42 = vmul.f32 %v2734_v46, %v2165_v51 }
 0x5e7   :  { %v2190_v35 = vld [vmem:[#allocation4 + $0x50] ss:$2 sm:$0x3]  ;;  %v2196_v22 = vmul.f32 %v2735_v52, %v2184_v36  ;;  %v2138_v30 = vadd.f32 %v2134_v28, %v2118_v27  ;;  %v2161_v31 = vadd.f32 %v2157_v4, %v2140_v9  ;;  %v2181_v37 = vadd.f32 %v2177_v15, %v2160_v23  ;;  %v2186_v32 = vld [vmem:[#allocation4 + $0x20] ss:$2 sm:$0x3] }
 0x5e8   :  { %v2198_v17 = vmul.f32 %v2735_v52, %v2188_v21  ;;  %v2205_v14 = vld [vmem:[#allocation4 + $0x11] ss:$2 sm:$0x3]  ;;  %v2199_v38 = vmul.f32 %v2735_v52, %v2190_v35  ;;  %v2209_v50 = vld [vmem:[#allocation4 + $0x41] ss:$2 sm:$0x3]  ;;  %v2197_v34 = vmul.f32 %v2735_v52, %v2186_v32 }
 0x5e9   :  { %v2200_v29 = vadd.f32 %v2196_v22, %v2179_v10  ;;  %v2211_v39 = vld [vmem:[#allocation4 + $0x51] ss:$2 sm:$0x3]  ;;  %v2217_v40 = vmul.f32 %v2736_v57, %v2205_v14  ;;  %v2159_v43 = vadd.f32 %v2155_v16, %v2138_v30  ;;  %v2182_v44 = vadd.f32 %v2178_v62, %v2161_v31  ;;  %v2207_v25 = vld [vmem:[#allocation4 + $0x21] ss:$2 sm:$0x3] }
 0x5ea   :  { %v2202_v7 = vadd.f32 %v2198_v17, %v2181_v37  ;;  %v2219_v11 = vmul.f32 %v2736_v57, %v2209_v50  ;;  %v2226_v45 = vld [vmem:[#allocation4 + $0x12] ss:$2 sm:$0x3]  ;;  %v2220_v13 = vmul.f32 %v2736_v57, %v2211_v39  ;;  %v2230_v48 = vld [vmem:[#allocation4 + $0x42] ss:$2 sm:$0x3]  ;;  %v2218_v61 = vmul.f32 %v2736_v57, %v2207_v25 }
 0x5eb   :  { %v2221_v47 = vadd.f32 %v2217_v40, %v2200_v29  ;;  %v2232_v53 = vld [vmem:[#allocation4 + $0x52] ss:$2 sm:$0x3]  ;;  %v2238_v49 = vmul.f32 %v2737_v33, %v2226_v45  ;;  %v2180_v18 = vadd.f32 %v2176_v42, %v2159_v43  ;;  %v2203_v59 = vadd.f32 %v2199_v38, %v2182_v44  ;;  %v2228_v8 = vld [vmem:[#allocation4 + $0x22] ss:$2 sm:$0x3] }
 0x5ec   :  { %v2223_v46 = vadd.f32 %v2219_v11, %v2202_v7  ;;  %v2240_v60 = vmul.f32 %v2737_v33, %v2230_v48  ;;  %v2241_v1 = vmul.f32 %v2737_v33, %v2232_v53  ;;  %v2239_v20 = vmul.f32 %v2737_v33, %v2228_v8  ;;  %v2739_v35 = vld [vmem:[%s4012_s20] ss:$0 sm:$0xff]  ;;  %v2968_v14 = vld [vmem:[%s4015_s23 + $0x8] sm:$0xff]   ;;  %v2969_v42 = vld [vmem:[%s4015_s23 + $0x10] sm:$0xff]  }
 0x5ed   :  { %v2242_v63 = vadd.f32 %v2238_v49, %v2221_v47  ;;  %v2201_v54 = vadd.f32 %v2197_v34, %v2180_v18  ;;  %v2224_v56 = vadd.f32 %v2220_v13, %v2203_v59  ;;  %v2967_v17 = vld [vmem:[%s4015_s23] sm:$0xff]   ;;  %v2970_v38 = vld [vmem:[%s4015_s23 + $0x18] sm:$0xff]  }
 0x5ee   :  { %v2244_v58 = vadd.f32 %v2240_v60, %v2223_v46  ;;  %v2744_v29 = vld [vmem:[%s4014_s22] ss:$0 sm:$0xff] }
 0x5ef   :  { %v2222_v52 = vadd.f32 %v2218_v61, %v2201_v54  ;;  %v2245_v6 = vadd.f32 %v2241_v1, %v2224_v56  ;;  %v2273_v23 = vadd.f32 %v2259_v0, %v2242_v63 }
 0x5f0   :  { %v2275_v3 = vadd.f32 %v2266_v5, %v2244_v58  ;;  %v2966_v5 = vld [vmem:[%s4013_s21 + $0x8] sm:$0xff]  }
 0x5f1   :  { %v2243_v28 = vadd.f32 %v2239_v20, %v2222_v52  ;;  %v2276_v12 = vadd.f32 %v2268_v19, %v2245_v6  ;;  %v2277_v27 = vmax.f32 %v2273_v23, 0.0  ;;  %2920 = vmatpush3.bf16.msra.mxu0 %v2966_v5  ;;  %v2748_v52 = vld [vmem:[%s4016_s24] ss:$0 sm:$0xff] }
 0x5f2   :  { %v2279_v26 = vmax.f32 %v2275_v3, 0.0 }
 0x5f3   :  { %v2274_v41 = vadd.f32 %v2267_v2, %v2243_v28  ;;  %v2280_v9 = vmax.f32 %v2276_v12, 0.0  ;;  %v2281_v15 = vmin.f32 %v2277_v27, 6.0 }
 0x5f4   :  { %v2283_v57 = vmin.f32 %v2279_v26, 6.0 }
 0x5f5   :  { %v2278_v4 = vmax.f32 %v2274_v41, 0.0  ;;  %v2284_v51 = vmin.f32 %v2280_v9, 6.0 }
 0x5f7   :  { %v2282_v36 = vmin.f32 %v2278_v4, 6.0  ;;  %v2290_v16 = vcombine.low %v2283_v57, %v2284_v51 }
 0x5f9   :  { %v2289_v62 = vcombine.low %v2281_v15, %v2282_v36  ;;  %v2304_v33 = vrot.slane %v2290_v16, %v3934_v55 }
 0x5fb   :  { %v2297_v10 = vrot.slane %v2289_v62, %v3934_v55 }
 0x5fd   :  { %v2305_v21 = vcombine.low %v2297_v10, %v2304_v33 }
 0x5ff   :  { %v2307_v0 = vpack.c.bf16 %v2305_v21, %v2305_v21 }
 0x601   :  { %2914 = vmatmul.mubr.msk.bf16.vlgmr.msra.gmra.mrb[32].mxu1 %vm1417_vm7, %v2307_v0 }
 0x602   :  { %2933 = vmatprep.mubr.msk.bf16.mxu1 %vm2996_vm10, %v2995_v24  ;;  %2926 = vmatpush3.bf16.msra.mxu1 %v2967_v17 }
 0x603   :  { %2927 = vmatprep.subr.bf16.mxu1 %v2995_v24 }
 0x606   :  { %2928 = vmatpush3.bf16.msra.mxu1 %v2968_v14 }
 0x607   :  { %2929 = vmatprep.subr.bf16.mxu1 %v2995_v24 }
 0x60a   :  { %2930 = vmatpush3.bf16.msra.mxu1 %v2969_v42 }
 0x60b   :  { %2931 = vmatprep.subr.bf16.mxu1 %v2995_v24 }
 0x60e   :  { %2932 = vmatpush3.bf16.msra.mxu1 %v2970_v38 }
 0x6d4   :  { %v2376_v22 = vpop.f32.mrb[32].mxu1 }
 0x6d5   :  { %v2377_v30 = vadd.f32 %v2739_v35, %v2376_v22  ;;  %v2915_v31 = vpop.f32.mrb[33].mxu1 }
 0x6d6   :  { %v2379_v55 = vpop.f32.mrb[34].mxu1 }
 0x6d7   :  { %v2382_v37 = vpack.c.bf16 %v2377_v30, %v2377_v30  ;;  %v2916_v32 = vpop.f32.mrb[35].mxu1 }
 0x6d9   :  { %2922 = vmatmul.mubr.msk.bf16.vlgmr.msra.gmra.mrb[40].mxu0 %vm2406_vm12, %v2382_v37 }
 0x7ac   :  { %v2444_v50 = vpop.f32.mrb[40].mxu0 }
 0x7ad   :  { %v2445_v39 = vadd.f32 %v2744_v29, %v2444_v50  ;;  %v2923_v40 = vpop.f32.mrb[41].mxu0 }
 0x7ae   :  { %v2447_v43 = vpop.f32.mrb[42].mxu0 }
 0x7af   :  { %v2450_v44 = vmax.f32 %v2445_v39, 0.0  ;;  %v2924_v7 = vpop.f32.mrb[43].mxu0 }
 0x7b1   :  { %v2451_v25 = vmin.f32 %v2450_v44, 6.0 }
 0x7b3   :  { %v2453_v11 = vcombine.high %v2451_v25, %v2451_v25  ;;  %v2456_v45 = vsel %vm2455_vm13, %v2451_v25, 0.0 }
 0x7b4   :  { %v2457_v34 = vrot.slane %v2456_v45, 4 }
 0x7b5   :  { %v2463_v13 = vsel %vm2455_vm13, %v2453_v11, 0.0 }
 0x7b6   :  { %v2458_v47 = vadd.f32 %v2457_v34, %v2456_v45  ;;  %v2464_v48 = vrot.slane %v2463_v13, 4 }
 0x7b8   :  { %v2459_v24 = vrot.slane %v2458_v47, 2  ;;  %v2465_v53 = vadd.f32 %v2464_v48, %v2463_v13 }
 0x7ba   :  { %v2460_v49 = vadd.f32 %v2459_v24, %v2458_v47  ;;  %v2466_v18 = vrot.slane %v2465_v53, 2 }
 0x7bc   :  { %v2461_v59 = vrot.slane %v2460_v49, 1  ;;  %v2467_v46 = vadd.f32 %v2466_v18, %v2465_v53 }
 0x7be   :  { %v2462_v8 = vadd.f32 %v2461_v59, %v2460_v49  ;;  %v2468_v60 = vrot.slane %v2467_v46, 1 }
 0x7c0   :  { %v2469_v61 = vadd.f32 %v2468_v60, %v2467_v46  ;;  %v2471_v63 = vmul.f32 0.25, %v2462_v8 }
 0x7c2   :  { %v2472_v19 = vmul.f32 0.25, %v2469_v61  ;;  %v2473_v54 = vpack.c.bf16 %v2471_v63, %v2471_v63 }
 0x7c4   :  { %v2474_v56 = vpack.c.bf16 %v2472_v19, %v2472_v19  ;;  %v2492_v1 = vunpack.c.l.b16 %v2473_v54 }
 0x7c6   :  { %v2493_v58 = vunpack.c.l.b16 %v2474_v56 }
 0x7c8   :  { %v2495_v20 = vsel %vm2494_vm14, %v2493_v58, %v2492_v1 }
 0x7c9   :  { %v2496_v2 = vpack.c.b16 %v2495_v20, %v2495_v20 }
 0x7cb   :  { %2934 = vmatmul.mubr.msk.bf16.vlgmr.msra.gmra.mrb[36].mxu1 %vm2521_vm15, %v2496_v2 }
 0x89e   :  { %v2559_v6 = vpop.f32.mrb[36].mxu1 }
 0x89f   :  { %v2560_v23 = vadd.f32 %v2748_v52, %v2559_v6  ;;  %v2935_v3 = vpop.f32.mrb[37].mxu1 }
 0x8a0   :  { %v2562_v28 = vpop.f32.mrb[38].mxu1 }
 0x8a1   :  { %v2936_v12 = vpop.f32.mrb[39].mxu1  ;;  %2566 = vst.msk [vmem:[#allocation5] sm:$0x3] %vm2565_vm0, %v2560_v23 }
 0x8a2   :  { %2982 = shalt.err (!%p2979_p4)
}
 0x8a3   :  { %s2983_s24 = scalar_lea.hbm %s4017_s25, 32 }
 0x8a4   :  { %p2984_p5 = scmp.ne.s32.totalorder %s4017_s25, %s2983_s24  ;;  %p2987_p6 = scmp.lt.u32.totalorder %s2983_s24, %s4017_s25 }
 0x8a6   :  { %p2989_p7 = pnand %p2987_p6, %p2984_p5 }
 0x8a8   :  { %2992 = shalt.err (!%p2989_p7)
}
 0x8a9   :  { %2576 = dma.vmem_to_hbm [thread:$0]  %s2574_s27, 32, %s4017_s25, [#allocation6]  }
 0x8aa   :  { %2993 = dma.done.wait [#allocation6], 32  }
 0x8ab   :  { %2994 = vsyncadd [#allocation6], 4294967264 }
 0x8ac   :  { %2580 = vsyncpa [#allocation6], 1 }

</bundles_post_ra>
